<compile_context>
chip_gen: v7x
topology: tpu7x:2x2x1
jax: 0.10.0
libtpu: 0.0.40
codegen_flags: <defaults>
</compile_context>

<pallas_src>
import functools

import jax
import jax.numpy as jnp
from jax import lax
from jax.experimental import pallas as pl
from jax.experimental.pallas import tpu as pltpu

LANE = 128
SUBLANE = 8


# ----------------------------- Pallas kernel -----------------------------

def _inverted_residual_kernel(x_ref, w1_ref, b1_ref, dw_ref, b2_ref,
                              w2_ref, b3_ref, o_ref, hbuf_ref,
                              *, use_res, th, w_real, unroll):
    # x_ref : (H, Wp, Cin_p) f32        w1_ref: (Cin_p, hid_p) bf16 (BN-folded)
    # dw_ref: (3, 3, hid_p) f32 folded  w2_ref: (hid_p, Cout_p) bf16 (BN-folded)
    # b*_ref: (1, C) f32 folded BN biases
    # hbuf_ref: (H + 2, Wp, hid_p) bf16 scratch (expanded activations + H halo)
    H, Wp, _ = x_ref.shape
    hid_p = w1_ref.shape[1]
    Cout_p = w2_ref.shape[1]
    nstrips = H // th
    nchunks = hid_p // LANE

    # Small per-channel tensors, loaded once (hoisted out of all loops).
    b1 = b1_ref[...]                                  # (1, hid_p)
    b2 = b2_ref[...]                                  # (1, hid_p)
    b3 = b3_ref[...]                                  # (1, Cout_p)
    dwv = dw_ref[...]                                 # (3, 3, hid_p)

    # Column masks cancelling the wrap-around of the W (sublane) rolls.
    # Hoisted: applied once per strip-chunk, not once per tap.
    col = lax.broadcasted_iota(jnp.int32, (1, Wp, LANE), 1)
    not_first = col != 0
    not_last = col != (w_real - 1)

    # Zero only the two H-halo rows; the interior is fully rewritten below.
    # Done every grid step so the kernel stays correct when the batch axis is
    # sharded across TensorCores ("parallel" semantics).
    hbuf_ref[0] = jnp.zeros((Wp, hid_p), hbuf_ref.dtype)
    hbuf_ref[H + 1] = jnp.zeros((Wp, hid_p), hbuf_ref.dtype)

    def _strip_loop(body):
        if unroll:                      # small static trip count: full unroll
            for i in range(nstrips):
                body(i)
        else:
            pl.loop(0, nstrips)(body)

    def _y0(i):
        return i * th if isinstance(i, int) else pl.multiple_of(i * th, th)

    # ---- Pass 1: 1x1 expand conv (BN scale folded) + bias + ReLU6 -> hbuf ----
    def expand_strip(i):
        y0 = _y0(i)
        xs = x_ref[pl.ds(y0, th)].reshape(th * Wp, -1).astype(jnp.bfloat16)
        for c in range(nchunks):                       # 128-lane hidden chunks
            cs = slice(c * LANE, (c + 1) * LANE)
            hm = jnp.dot(xs, w1_ref[:, cs],            # bf16 x bf16 -> f32 MXU
                         preferred_element_type=jnp.float32)
            hm = jnp.clip(hm + b1[:, cs], 0.0, 6.0)
            hbuf_ref[pl.ds(y0 + 1, th), :, cs] = (
                hm.reshape(th, Wp, LANE).astype(hbuf_ref.dtype))

    _strip_loop(expand_strip)

    # ---- Pass 2: 3x3 depthwise + bias + ReLU6, then 1x1 project + residual ----
    def project_strip(i):
        y0 = _y0(i)
        pacc = jnp.zeros((th * Wp, Cout_p), jnp.float32)
        for c in range(nchunks):                       # 128-lane hidden chunks
            cs = slice(c * LANE, (c + 1) * LANE)
            acc_c = jnp.zeros((th, Wp, LANE), jnp.float32)
            acc_l = jnp.zeros((th, Wp, LANE), jnp.float32)
            acc_r = jnp.zeros((th, Wp, LANE), jnp.float32)
            for dy in range(3):                        # unrolled H taps
                strip = hbuf_ref[pl.ds(y0 + dy, th), :, cs].astype(jnp.float32)
                acc_c = acc_c + strip * dwv[dy, 1, cs].reshape(1, 1, LANE)
                # W shifts on the XLU: positive rolls only (Wp-1 == -1 mod Wp).
                acc_l = acc_l + (pltpu.roll(strip, 1, 1)
                                 * dwv[dy, 0, cs].reshape(1, 1, LANE))
                acc_r = acc_r + (pltpu.roll(strip, Wp - 1, 1)
                                 * dwv[dy, 2, cs].reshape(1, 1, LANE))
            acc = (acc_c
                   + jnp.where(not_first, acc_l, 0.0)
                   + jnp.where(not_last, acc_r, 0.0))
            d = jnp.clip(acc + b2[:, cs].reshape(1, 1, LANE), 0.0, 6.0)
            d2 = d.reshape(th * Wp, LANE).astype(jnp.bfloat16)
            pacc = pacc + jnp.dot(d2, w2_ref[cs, :],   # bf16 x bf16 -> f32 MXU
                                  preferred_element_type=jnp.float32)
        p = (pacc + b3).reshape(th, Wp, Cout_p)
        if use_res:
            p = p + x_ref[pl.ds(y0, th)]               # residual stays f32
        o_ref[pl.ds(y0, th)] = p.astype(o_ref.dtype)

    _strip_loop(project_strip)


# ------------------------------- Wrapper ----------------------------------

def _round_up(x, m):
    return (x + m - 1) // m * m


def _pick_strip_height(H, Wp):
    # Largest divisor of H with th*Wp <= 64 rows of matmul M (bounds the
    # depthwise live set to ~5 * th*Wp/8 vregs per 128-lane hidden chunk).
    best = 1
    for th in range(1, H + 1):
        if H % th == 0 and th * Wp <= 64:
            best = th
    return best


def inverted_residual_pallas(x_nchw, params, *, stride=1, use_res=True):
    assert stride == 1, "only the stride-1 residual path is implemented"
    w1, s1, b1, dw, s2, b2, w2, s3, b3 = params

    # Fold the BatchNorm scales into the conv weights (eval mode); only the
    # bias adds remain in the kernel.
    w1f = w1 * s1                                    # (Cin, hidden) * (1, hidden)
    dwf = dw * s2.reshape(1, 1, -1)                  # (3, 3, hidden)
    w2f = w2 * s3                                    # (hidden, Cout) * (1, Cout)

    x = jnp.transpose(x_nchw, (0, 2, 3, 1)).astype(jnp.float32)  # NCHW -> NHWC
    N, H, W, Cin = x.shape
    hidden = w1.shape[1]
    Cout = w2.shape[1]

    # Lane-dense channel padding (unmasked stores, full-width MXU tiles) and
    # W padded to a sublane multiple (clean (th,Wp,C)->(th*Wp,C) reshapes).
    Cin_p = _round_up(Cin, LANE)
    hid_p = _round_up(hidden, LANE)
    Cout_p = _round_up(Cout, LANE)
    if use_res:
        assert Cin == Cout, "residual path requires inp == oup"
        Cin_p = Cout_p = max(Cin_p, Cout_p)
    Wp = _round_up(W, SUBLANE)

    xp = jnp.pad(x, ((0, 0), (0, 0), (0, Wp - W), (0, Cin_p - Cin)))
    w1p = jnp.pad(w1f, ((0, Cin_p - Cin), (0, hid_p - hidden))).astype(jnp.bfloat16)
    dwp = jnp.pad(dwf, ((0, 0), (0, 0), (0, hid_p - hidden)))            # f32
    w2p = jnp.pad(w2f, ((0, hid_p - hidden), (0, Cout_p - Cout))).astype(jnp.bfloat16)
    b1p = jnp.pad(b1, ((0, 0), (0, hid_p - hidden)))
    b2p = jnp.pad(b2, ((0, 0), (0, hid_p - hidden)))
    b3p = jnp.pad(b3, ((0, 0), (0, Cout_p - Cout)))

    th = _pick_strip_height(H, Wp)
    nstrips = H // th
    unroll = nstrips <= 8

    # VMEM budget from the actual blocks (input/output double-buffered by the
    # BlockSpec pipeline) plus the bf16 hbuf scratch.
    x_blk = H * Wp * Cin_p * 4
    o_blk = H * Wp * Cout_p * 4
    w_blk = (w1p.size + w2p.size) * 2 + (dwp.size + b1p.size + b2p.size + b3p.size) * 4
    hbuf_blk = (H + 2) * Wp * hid_p * 2
    vmem_need = 2 * (x_blk + o_blk + w_blk) + hbuf_blk
    vmem_limit = int(min(max(vmem_need * 5 // 4, 32 << 20), 96 << 20))

    flops = int(2 * N * H * W * hidden * (Cin + 9 + Cout))
    bytes_accessed = int(xp.size * 4 + N * H * Wp * Cout_p * 4
                         + (w1p.size + w2p.size) * 2
                         + (dwp.size + b1p.size + b2p.size + b3p.size) * 4)

    kernel = functools.partial(_inverted_residual_kernel,
                               use_res=use_res, th=th, w_real=W, unroll=unroll)
    out = pl.pallas_call(
        kernel,
        out_shape=jax.ShapeDtypeStruct((N, H, Wp, Cout_p), jnp.float32),
        grid_spec=pltpu.PrefetchScalarGridSpec(
            num_scalar_prefetch=0,
            grid=(N,),                                   # one image per step
            in_specs=[
                pl.BlockSpec((None, H, Wp, Cin_p), lambda n: (n, 0, 0, 0)),
                pl.BlockSpec((Cin_p, hid_p), lambda n: (0, 0)),
                pl.BlockSpec((1, hid_p), lambda n: (0, 0)),
                pl.BlockSpec((3, 3, hid_p), lambda n: (0, 0, 0)),
                pl.BlockSpec((1, hid_p), lambda n: (0, 0)),
                pl.BlockSpec((hid_p, Cout_p), lambda n: (0, 0)),
                pl.BlockSpec((1, Cout_p), lambda n: (0, 0)),
            ],
            out_specs=pl.BlockSpec((None, H, Wp, Cout_p), lambda n: (n, 0, 0, 0)),
            scratch_shapes=[pltpu.VMEM((H + 2, Wp, hid_p), jnp.bfloat16)],
        ),
        compiler_params=pltpu.CompilerParams(
            dimension_semantics=("parallel",),           # batch images independent
            vmem_limit_bytes=vmem_limit),
        cost_estimate=pl.CostEstimate(flops=flops, transcendentals=0,
                                      bytes_accessed=bytes_accessed),
    )(xp, w1p, b1p, dwp, b2p, w2p, b3p)

    out = out[:, :, :W, :Cout]                           # drop W / channel padding
    return jnp.transpose(out, (0, 3, 1, 2))              # NHWC -> NCHW


# ---------------------- Deterministic parameter setup ----------------------

def make_params(key, inp, oup, expand_ratio, eps=1e-5):
    hidden = int(round(inp * expand_ratio))
    ks = jax.random.split(key, 12)

    # PyTorch conv weight layouts, then converted to kernel layouts.
    w1_oihw = jax.random.normal(ks[0], (hidden, inp, 1, 1), jnp.float32) * 0.3
    dw_oihw = jax.random.normal(ks[1], (hidden, 1, 3, 3), jnp.float32) * 0.3
    w2_oihw = jax.random.normal(ks[2], (oup, hidden, 1, 1), jnp.float32) * 0.3

    def bn(k, c):
        k1, k2, k3, k4 = jax.random.split(k, 4)
        gamma = 1.0 + 0.1 * jax.random.normal(k1, (c,), jnp.float32)
        beta = 0.1 * jax.random.normal(k2, (c,), jnp.float32)
        mean = 0.1 * jax.random.normal(k3, (c,), jnp.float32)
        var = 1.0 + jnp.abs(jax.random.normal(k4, (c,), jnp.float32)) * 0.1
        scale = gamma / jnp.sqrt(var + eps)
        bias = beta - mean * scale
        return scale, bias

    s1, b1 = bn(ks[3], hidden)
    s2, b2 = bn(ks[4], hidden)
    s3, b3 = bn(ks[5], oup)

    raw = (w1_oihw, dw_oihw, w2_oihw, s1, b1, s2, b2, s3, b3)

    # Kernel-side layouts (unfused; the wrapper folds the BN scales).
    w1 = jnp.transpose(w1_oihw[:, :, 0, 0], (1, 0))          # (inp, hidden)
    dw = jnp.transpose(dw_oihw[:, 0, :, :], (1, 2, 0))       # (3, 3, hidden)
    w2 = jnp.transpose(w2_oihw[:, :, 0, 0], (1, 0))          # (hidden, oup)
    params = (w1, s1.reshape(1, -1), b1.reshape(1, -1),
              dw, s2.reshape(1, -1), b2.reshape(1, -1),
              w2, s3.reshape(1, -1), b3.reshape(1, -1))
    return params, raw


# ----------------------- Pure-JAX reference (NCHW) -------------------------

def reference_forward(x, raw):
    w1_oihw, dw_oihw, w2_oihw, s1, b1, s2, b2, s3, b3 = raw
    dn = ("NCHW", "OIHW", "NCHW")
    hidden = w1_oihw.shape[0]

    h = lax.conv_general_dilated(x, w1_oihw, (1, 1), "VALID",
                                 dimension_numbers=dn)
    h = h * s1[None, :, None, None] + b1[None, :, None, None]
    h = jnp.clip(h, 0.0, 6.0)

    d = lax.conv_general_dilated(h, dw_oihw, (1, 1), ((1, 1), (1, 1)),
                                 dimension_numbers=dn,
                                 feature_group_count=hidden)
    d = d * s2[None, :, None, None] + b2[None, :, None, None]
    d = jnp.clip(d, 0.0, 6.0)

    p = lax.conv_general_dilated(d, w2_oihw, (1, 1), "VALID",
                                 dimension_numbers=dn)
    p = p * s3[None, :, None, None] + b3[None, :, None, None]
    return x + p


# --------------------------------- Main ------------------------------------

if __name__ == "__main__":
    N, inp, oup, H, W = 2, 4, 4, 16, 16
    stride, expand_ratio = 1, 6                # use_res_connect == True

    key = jax.random.PRNGKey(0)
    kx, kp = jax.random.split(key)
    x = jax.random.normal(kx, (N, inp, H, W), jnp.float32)   # PyTorch NCHW

    params, raw = make_params(kp, inp, oup, expand_ratio)

    out = inverted_residual_pallas(x, params, stride=stride, use_res=True)
    out = jax.block_until_ready(out)

    ref = jax.block_until_ready(reference_forward(x, raw))
    assert out.shape == (N, oup, H, W)
    # bf16 MXU operands + bf16 expanded-activation scratch vs. an f32
    # reference: tolerance is set for bf16-level rounding.
    assert jnp.allclose(out, ref, atol=2e-1, rtol=5e-2), (
        float(jnp.max(jnp.abs(out - ref))))

    print("KERNEL_OK")
</pallas_src>

<mosaic_0001>
module attributes {stable_mosaic.version = 11 : i64} {
  func.func @_inverted_residual_kernel(%arg0: i32, %arg1: memref<1x16x16x128xf32, #tpu.memory_space<vmem>>, %arg2: memref<128x128xbf16, #tpu.memory_space<vmem>>, %arg3: memref<1x128xf32, #tpu.memory_space<vmem>>, %arg4: memref<3x3x128xf32, #tpu.memory_space<vmem>>, %arg5: memref<1x128xf32, #tpu.memory_space<vmem>>, %arg6: memref<128x128xbf16, #tpu.memory_space<vmem>>, %arg7: memref<1x128xf32, #tpu.memory_space<vmem>>, %arg8: memref<1x16x16x128xf32, #tpu.memory_space<vmem>>, %arg9: memref<18x16x128xbf16, #tpu.memory_space<vmem>>) attributes {dimension_semantics = [#tpu.dimension_semantics<parallel>], iteration_bounds = array<i64: 2>, scalar_prefetch = 0 : i64, scratch_operands = 1 : i64, tpu.core_type = #tpu.core_type<tc>, window_params = [{transform_indices = @transform_0, window_bounds = array<i64: 1, 16, 16, 128>}, {pipeline_mode = #tpu.pipeline_mode<synchronous>, transform_indices = @transform_1, window_bounds = array<i64: 128, 128>}, {pipeline_mode = #tpu.pipeline_mode<synchronous>, transform_indices = @transform_2, window_bounds = array<i64: 1, 128>}, {pipeline_mode = #tpu.pipeline_mode<synchronous>, transform_indices = @transform_3, window_bounds = array<i64: 3, 3, 128>}, {pipeline_mode = #tpu.pipeline_mode<synchronous>, transform_indices = @transform_4, window_bounds = array<i64: 1, 128>}, {pipeline_mode = #tpu.pipeline_mode<synchronous>, transform_indices = @transform_5, window_bounds = array<i64: 128, 128>}, {pipeline_mode = #tpu.pipeline_mode<synchronous>, transform_indices = @transform_6, window_bounds = array<i64: 1, 128>}, {transform_indices = @transform_7, window_bounds = array<i64: 1, 16, 16, 128>}]} {
    %c0 = arith.constant 0 : index
    %c0_0 = arith.constant 0 : index
    %0 = vector.load %arg3[%c0, %c0_0] : memref<1x128xf32, #tpu.memory_space<vmem>>, vector<1x128xf32>
    %c0_1 = arith.constant 0 : index
    %c0_2 = arith.constant 0 : index
    %1 = vector.load %arg5[%c0_1, %c0_2] : memref<1x128xf32, #tpu.memory_space<vmem>>, vector<1x128xf32>
    %c0_3 = arith.constant 0 : index
    %c0_4 = arith.constant 0 : index
    %2 = vector.load %arg7[%c0_3, %c0_4] : memref<1x128xf32, #tpu.memory_space<vmem>>, vector<1x128xf32>
    %c0_5 = arith.constant 0 : index
    %c0_6 = arith.constant 0 : index
    %c0_7 = arith.constant 0 : index
    %3 = vector.load %arg4[%c0_5, %c0_6, %c0_7] : memref<3x3x128xf32, #tpu.memory_space<vmem>>, vector<3x3x128xf32>
    %4 = tpu.iota {dimensions = array<i32: 1>} : vector<1x16x128xi32>
    %c0_i32 = arith.constant 0 : i32
    %5 = vector.broadcast %c0_i32 : i32 to vector<1x16x128xi32>
    %6 = arith.cmpi ne, %4, %5 : vector<1x16x128xi32>
    %c15_i32 = arith.constant 15 : i32
    %7 = vector.broadcast %c15_i32 : i32 to vector<1x16x128xi32>
    %8 = arith.cmpi ne, %4, %7 : vector<1x16x128xi32>
    %cst = arith.constant 0.000000e+00 : bf16
    %9 = vector.broadcast %cst : bf16 to vector<16x128xbf16>
    %c0_8 = arith.constant 0 : index
    %c0_9 = arith.constant 0 : index
    %c0_10 = arith.constant 0 : index
    %10 = vector.load %arg9[%c0_8, %c0_9, %c0_10] : memref<18x16x128xbf16, #tpu.memory_space<vmem>>, vector<1x16x128xbf16>
    %11 = vector.shape_cast %10 : vector<1x16x128xbf16> to vector<16x128xbf16>
    %12 = vector.shape_cast %9 : vector<16x128xbf16> to vector<1x16x128xbf16>
    tpu.vector_store %arg9[%c0_8, %c0_9, %c0_10], %12 {strides = array<i32>} : memref<18x16x128xbf16, #tpu.memory_space<vmem>>, vector<1x16x128xbf16>,
    %cst_11 = arith.constant 0.000000e+00 : bf16
    %13 = vector.broadcast %cst_11 : bf16 to vector<16x128xbf16>
    %c17 = arith.constant 17 : index
    %c0_12 = arith.constant 0 : index
    %c0_13 = arith.constant 0 : index
    %14 = vector.load %arg9[%c17, %c0_12, %c0_13] : memref<18x16x128xbf16, #tpu.memory_space<vmem>>, vector<1x16x128xbf16>
    %15 = vector.shape_cast %14 : vector<1x16x128xbf16> to vector<16x128xbf16>
    %16 = vector.shape_cast %13 : vector<16x128xbf16> to vector<1x16x128xbf16>
    tpu.vector_store %arg9[%c17, %c0_12, %c0_13], %16 {strides = array<i32>} : memref<18x16x128xbf16, #tpu.memory_space<vmem>>, vector<1x16x128xbf16>,
    %c0_14 = arith.constant 0 : index
    %c0_15 = arith.constant 0 : index
    %c0_16 = arith.constant 0 : index
    %c0_17 = arith.constant 0 : index
    %17 = vector.load %arg1[%c0_14, %c0_15, %c0_16, %c0_17] : memref<1x16x16x128xf32, #tpu.memory_space<vmem>>, vector<1x4x16x128xf32>
    %18 = vector.shape_cast %17 : vector<1x4x16x128xf32> to vector<4x16x128xf32>
    %19 = vector.shape_cast %18 : vector<4x16x128xf32> to vector<64x128xf32>
    %20 = arith.truncf %19 : vector<64x128xf32> to vector<64x128xbf16>
    %c0_18 = arith.constant 0 : index
    %c0_19 = arith.constant 0 : index
    %21 = vector.load %arg2[%c0_18, %c0_19] : memref<128x128xbf16, #tpu.memory_space<vmem>>, vector<128x128xbf16>
    %cst_20 = arith.constant dense<0.000000e+00> : vector<64x128xf32>
    %22 = tpu.matmul %20, %21, %cst_20 {dimension_numbers = #tpu.dot_dimension_numbers<[1], [0], [0], [1], [0, 0, 1, 1], [], []>} : vector<64x128xbf16>, vector<128x128xbf16>, vector<64x128xf32> -> vector<64x128xf32>
    %23 = vector.broadcast %0 : vector<1x128xf32> to vector<64x128xf32>
    %24 = arith.addf %22, %23 : vector<64x128xf32>
    %cst_21 = arith.constant 0.000000e+00 : f32
    %cst_22 = arith.constant 6.000000e+00 : f32
    %25 = vector.broadcast %cst_21 : f32 to vector<64x128xf32>
    %26 = arith.maximumf %25, %24 : vector<64x128xf32>
    %27 = vector.broadcast %cst_22 : f32 to vector<64x128xf32>
    %28 = arith.minimumf %27, %26 : vector<64x128xf32>
    %29 = vector.shape_cast %28 : vector<64x128xf32> to vector<4x16x128xf32>
    %30 = arith.truncf %29 : vector<4x16x128xf32> to vector<4x16x128xbf16>
    %c1 = arith.constant 1 : index
    %c0_23 = arith.constant 0 : index
    %c0_24 = arith.constant 0 : index
    %31 = vector.load %arg9[%c1, %c0_23, %c0_24] : memref<18x16x128xbf16, #tpu.memory_space<vmem>>, vector<4x16x128xbf16>
    tpu.vector_store %arg9[%c1, %c0_23, %c0_24], %30 {strides = array<i32>} : memref<18x16x128xbf16, #tpu.memory_space<vmem>>, vector<4x16x128xbf16>,
    %c0_25 = arith.constant 0 : index
    %c4 = arith.constant 4 : index
    %c0_26 = arith.constant 0 : index
    %c0_27 = arith.constant 0 : index
    %32 = vector.load %arg1[%c0_25, %c4, %c0_26, %c0_27] : memref<1x16x16x128xf32, #tpu.memory_space<vmem>>, vector<1x4x16x128xf32>
    %33 = vector.shape_cast %32 : vector<1x4x16x128xf32> to vector<4x16x128xf32>
    %34 = vector.shape_cast %33 : vector<4x16x128xf32> to vector<64x128xf32>
    %35 = arith.truncf %34 : vector<64x128xf32> to vector<64x128xbf16>
    %c0_28 = arith.constant 0 : index
    %c0_29 = arith.constant 0 : index
    %36 = vector.load %arg2[%c0_28, %c0_29] : memref<128x128xbf16, #tpu.memory_space<vmem>>, vector<128x128xbf16>
    %cst_30 = arith.constant dense<0.000000e+00> : vector<64x128xf32>
    %37 = tpu.matmul %35, %36, %cst_30 {dimension_numbers = #tpu.dot_dimension_numbers<[1], [0], [0], [1], [0, 0, 1, 1], [], []>} : vector<64x128xbf16>, vector<128x128xbf16>, vector<64x128xf32> -> vector<64x128xf32>
    %38 = vector.broadcast %0 : vector<1x128xf32> to vector<64x128xf32>
    %39 = arith.addf %37, %38 : vector<64x128xf32>
    %cst_31 = arith.constant 0.000000e+00 : f32
    %cst_32 = arith.constant 6.000000e+00 : f32
    %40 = vector.broadcast %cst_31 : f32 to vector<64x128xf32>
    %41 = arith.maximumf %40, %39 : vector<64x128xf32>
    %42 = vector.broadcast %cst_32 : f32 to vector<64x128xf32>
    %43 = arith.minimumf %42, %41 : vector<64x128xf32>
    %44 = vector.shape_cast %43 : vector<64x128xf32> to vector<4x16x128xf32>
    %45 = arith.truncf %44 : vector<4x16x128xf32> to vector<4x16x128xbf16>
    %c5 = arith.constant 5 : index
    %c0_33 = arith.constant 0 : index
    %c0_34 = arith.constant 0 : index
    %46 = vector.load %arg9[%c5, %c0_33, %c0_34] : memref<18x16x128xbf16, #tpu.memory_space<vmem>>, vector<4x16x128xbf16>
    tpu.vector_store %arg9[%c5, %c0_33, %c0_34], %45 {strides = array<i32>} : memref<18x16x128xbf16, #tpu.memory_space<vmem>>, vector<4x16x128xbf16>,
    %c0_35 = arith.constant 0 : index
    %c8 = arith.constant 8 : index
    %c0_36 = arith.constant 0 : index
    %c0_37 = arith.constant 0 : index
    %47 = vector.load %arg1[%c0_35, %c8, %c0_36, %c0_37] : memref<1x16x16x128xf32, #tpu.memory_space<vmem>>, vector<1x4x16x128xf32>
    %48 = vector.shape_cast %47 : vector<1x4x16x128xf32> to vector<4x16x128xf32>
    %49 = vector.shape_cast %48 : vector<4x16x128xf32> to vector<64x128xf32>
    %50 = arith.truncf %49 : vector<64x128xf32> to vector<64x128xbf16>
    %c0_38 = arith.constant 0 : index
    %c0_39 = arith.constant 0 : index
    %51 = vector.load %arg2[%c0_38, %c0_39] : memref<128x128xbf16, #tpu.memory_space<vmem>>, vector<128x128xbf16>
    %cst_40 = arith.constant dense<0.000000e+00> : vector<64x128xf32>
    %52 = tpu.matmul %50, %51, %cst_40 {dimension_numbers = #tpu.dot_dimension_numbers<[1], [0], [0], [1], [0, 0, 1, 1], [], []>} : vector<64x128xbf16>, vector<128x128xbf16>, vector<64x128xf32> -> vector<64x128xf32>
    %53 = vector.broadcast %0 : vector<1x128xf32> to vector<64x128xf32>
    %54 = arith.addf %52, %53 : vector<64x128xf32>
    %cst_41 = arith.constant 0.000000e+00 : f32
    %cst_42 = arith.constant 6.000000e+00 : f32
    %55 = vector.broadcast %cst_41 : f32 to vector<64x128xf32>
    %56 = arith.maximumf %55, %54 : vector<64x128xf32>
    %57 = vector.broadcast %cst_42 : f32 to vector<64x128xf32>
    %58 = arith.minimumf %57, %56 : vector<64x128xf32>
    %59 = vector.shape_cast %58 : vector<64x128xf32> to vector<4x16x128xf32>
    %60 = arith.truncf %59 : vector<4x16x128xf32> to vector<4x16x128xbf16>
    %c9 = arith.constant 9 : index
    %c0_43 = arith.constant 0 : index
    %c0_44 = arith.constant 0 : index
    %61 = vector.load %arg9[%c9, %c0_43, %c0_44] : memref<18x16x128xbf16, #tpu.memory_space<vmem>>, vector<4x16x128xbf16>
    tpu.vector_store %arg9[%c9, %c0_43, %c0_44], %60 {strides = array<i32>} : memref<18x16x128xbf16, #tpu.memory_space<vmem>>, vector<4x16x128xbf16>,
    %c0_45 = arith.constant 0 : index
    %c12 = arith.constant 12 : index
    %c0_46 = arith.constant 0 : index
    %c0_47 = arith.constant 0 : index
    %62 = vector.load %arg1[%c0_45, %c12, %c0_46, %c0_47] : memref<1x16x16x128xf32, #tpu.memory_space<vmem>>, vector<1x4x16x128xf32>
    %63 = vector.shape_cast %62 : vector<1x4x16x128xf32> to vector<4x16x128xf32>
    %64 = vector.shape_cast %63 : vector<4x16x128xf32> to vector<64x128xf32>
    %65 = arith.truncf %64 : vector<64x128xf32> to vector<64x128xbf16>
    %c0_48 = arith.constant 0 : index
    %c0_49 = arith.constant 0 : index
    %66 = vector.load %arg2[%c0_48, %c0_49] : memref<128x128xbf16, #tpu.memory_space<vmem>>, vector<128x128xbf16>
    %cst_50 = arith.constant dense<0.000000e+00> : vector<64x128xf32>
    %67 = tpu.matmul %65, %66, %cst_50 {dimension_numbers = #tpu.dot_dimension_numbers<[1], [0], [0], [1], [0, 0, 1, 1], [], []>} : vector<64x128xbf16>, vector<128x128xbf16>, vector<64x128xf32> -> vector<64x128xf32>
    %68 = vector.broadcast %0 : vector<1x128xf32> to vector<64x128xf32>
    %69 = arith.addf %67, %68 : vector<64x128xf32>
    %cst_51 = arith.constant 0.000000e+00 : f32
    %cst_52 = arith.constant 6.000000e+00 : f32
    %70 = vector.broadcast %cst_51 : f32 to vector<64x128xf32>
    %71 = arith.maximumf %70, %69 : vector<64x128xf32>
    %72 = vector.broadcast %cst_52 : f32 to vector<64x128xf32>
    %73 = arith.minimumf %72, %71 : vector<64x128xf32>
    %74 = vector.shape_cast %73 : vector<64x128xf32> to vector<4x16x128xf32>
    %75 = arith.truncf %74 : vector<4x16x128xf32> to vector<4x16x128xbf16>
    %c13 = arith.constant 13 : index
    %c0_53 = arith.constant 0 : index
    %c0_54 = arith.constant 0 : index
    %76 = vector.load %arg9[%c13, %c0_53, %c0_54] : memref<18x16x128xbf16, #tpu.memory_space<vmem>>, vector<4x16x128xbf16>
    tpu.vector_store %arg9[%c13, %c0_53, %c0_54], %75 {strides = array<i32>} : memref<18x16x128xbf16, #tpu.memory_space<vmem>>, vector<4x16x128xbf16>,
    %cst_55 = arith.constant 0.000000e+00 : f32
    %77 = vector.broadcast %cst_55 : f32 to vector<64x128xf32>
    %cst_56 = arith.constant 0.000000e+00 : f32
    %78 = vector.broadcast %cst_56 : f32 to vector<4x16x128xf32>
    %cst_57 = arith.constant 0.000000e+00 : f32
    %79 = vector.broadcast %cst_57 : f32 to vector<4x16x128xf32>
    %cst_58 = arith.constant 0.000000e+00 : f32
    %80 = vector.broadcast %cst_58 : f32 to vector<4x16x128xf32>
    %c0_59 = arith.constant 0 : index
    %c0_60 = arith.constant 0 : index
    %c0_61 = arith.constant 0 : index
    %81 = vector.load %arg9[%c0_59, %c0_60, %c0_61] : memref<18x16x128xbf16, #tpu.memory_space<vmem>>, vector<4x16x128xbf16>
    %82 = arith.extf %81 : vector<4x16x128xbf16> to vector<4x16x128xf32>
    %83 = vector.extract_strided_slice %3 {offsets = [0, 1, 0], sizes = [1, 1, 128], strides = [1, 1, 1]} : vector<3x3x128xf32> to vector<1x1x128xf32>
    %84 = vector.shape_cast %83 : vector<1x1x128xf32> to vector<128xf32>
    %85 = vector.shape_cast %84 : vector<128xf32> to vector<1x1x128xf32>
    %86 = vector.broadcast %85 : vector<1x1x128xf32> to vector<4x16x128xf32>
    %87 = arith.mulf %82, %86 : vector<4x16x128xf32>
    %88 = arith.addf %78, %87 : vector<4x16x128xf32>
    %c1_i32 = arith.constant 1 : i32
    %89 = tpu.dynamic_rotate %82 by %c1_i32 dim 1 : vector<4x16x128xf32>, i32 -> vector<4x16x128xf32>
    %90 = vector.extract_strided_slice %3 {offsets = [0, 0, 0], sizes = [1, 1, 128], strides = [1, 1, 1]} : vector<3x3x128xf32> to vector<1x1x128xf32>
    %91 = vector.shape_cast %90 : vector<1x1x128xf32> to vector<128xf32>
    %92 = vector.shape_cast %91 : vector<128xf32> to vector<1x1x128xf32>
    %93 = vector.broadcast %92 : vector<1x1x128xf32> to vector<4x16x128xf32>
    %94 = arith.mulf %89, %93 : vector<4x16x128xf32>
    %95 = arith.addf %79, %94 : vector<4x16x128xf32>
    %c15_i32_62 = arith.constant 15 : i32
    %96 = tpu.dynamic_rotate %82 by %c15_i32_62 dim 1 : vector<4x16x128xf32>, i32 -> vector<4x16x128xf32>
    %97 = vector.extract_strided_slice %3 {offsets = [0, 2, 0], sizes = [1, 1, 128], strides = [1, 1, 1]} : vector<3x3x128xf32> to vector<1x1x128xf32>
    %98 = vector.shape_cast %97 : vector<1x1x128xf32> to vector<128xf32>
    %99 = vector.shape_cast %98 : vector<128xf32> to vector<1x1x128xf32>
    %100 = vector.broadcast %99 : vector<1x1x128xf32> to vector<4x16x128xf32>
    %101 = arith.mulf %96, %100 : vector<4x16x128xf32>
    %102 = arith.addf %80, %101 : vector<4x16x128xf32>
    %c1_63 = arith.constant 1 : index
    %c0_64 = arith.constant 0 : index
    %c0_65 = arith.constant 0 : index
    %103 = vector.load %arg9[%c1_63, %c0_64, %c0_65] : memref<18x16x128xbf16, #tpu.memory_space<vmem>>, vector<4x16x128xbf16>
    %104 = arith.extf %103 : vector<4x16x128xbf16> to vector<4x16x128xf32>
    %105 = vector.extract_strided_slice %3 {offsets = [1, 1, 0], sizes = [1, 1, 128], strides = [1, 1, 1]} : vector<3x3x128xf32> to vector<1x1x128xf32>
    %106 = vector.shape_cast %105 : vector<1x1x128xf32> to vector<128xf32>
    %107 = vector.shape_cast %106 : vector<128xf32> to vector<1x1x128xf32>
    %108 = vector.broadcast %107 : vector<1x1x128xf32> to vector<4x16x128xf32>
    %109 = arith.mulf %104, %108 : vector<4x16x128xf32>
    %110 = arith.addf %88, %109 : vector<4x16x128xf32>
    %c1_i32_66 = arith.constant 1 : i32
    %111 = tpu.dynamic_rotate %104 by %c1_i32_66 dim 1 : vector<4x16x128xf32>, i32 -> vector<4x16x128xf32>
    %112 = vector.extract_strided_slice %3 {offsets = [1, 0, 0], sizes = [1, 1, 128], strides = [1, 1, 1]} : vector<3x3x128xf32> to vector<1x1x128xf32>
    %113 = vector.shape_cast %112 : vector<1x1x128xf32> to vector<128xf32>
    %114 = vector.shape_cast %113 : vector<128xf32> to vector<1x1x128xf32>
    %115 = vector.broadcast %114 : vector<1x1x128xf32> to vector<4x16x128xf32>
    %116 = arith.mulf %111, %115 : vector<4x16x128xf32>
    %117 = arith.addf %95, %116 : vector<4x16x128xf32>
    %c15_i32_67 = arith.constant 15 : i32
    %118 = tpu.dynamic_rotate %104 by %c15_i32_67 dim 1 : vector<4x16x128xf32>, i32 -> vector<4x16x128xf32>
    %119 = vector.extract_strided_slice %3 {offsets = [1, 2, 0], sizes = [1, 1, 128], strides = [1, 1, 1]} : vector<3x3x128xf32> to vector<1x1x128xf32>
    %120 = vector.shape_cast %119 : vector<1x1x128xf32> to vector<128xf32>
    %121 = vector.shape_cast %120 : vector<128xf32> to vector<1x1x128xf32>
    %122 = vector.broadcast %121 : vector<1x1x128xf32> to vector<4x16x128xf32>
    %123 = arith.mulf %118, %122 : vector<4x16x128xf32>
    %124 = arith.addf %102, %123 : vector<4x16x128xf32>
    %c2 = arith.constant 2 : index
    %c0_68 = arith.constant 0 : index
    %c0_69 = arith.constant 0 : index
    %125 = vector.load %arg9[%c2, %c0_68, %c0_69] : memref<18x16x128xbf16, #tpu.memory_space<vmem>>, vector<4x16x128xbf16>
    %126 = arith.extf %125 : vector<4x16x128xbf16> to vector<4x16x128xf32>
    %127 = vector.extract_strided_slice %3 {offsets = [2, 1, 0], sizes = [1, 1, 128], strides = [1, 1, 1]} : vector<3x3x128xf32> to vector<1x1x128xf32>
    %128 = vector.shape_cast %127 : vector<1x1x128xf32> to vector<128xf32>
    %129 = vector.shape_cast %128 : vector<128xf32> to vector<1x1x128xf32>
    %130 = vector.broadcast %129 : vector<1x1x128xf32> to vector<4x16x128xf32>
    %131 = arith.mulf %126, %130 : vector<4x16x128xf32>
    %132 = arith.addf %110, %131 : vector<4x16x128xf32>
    %c1_i32_70 = arith.constant 1 : i32
    %133 = tpu.dynamic_rotate %126 by %c1_i32_70 dim 1 : vector<4x16x128xf32>, i32 -> vector<4x16x128xf32>
    %134 = vector.extract_strided_slice %3 {offsets = [2, 0, 0], sizes = [1, 1, 128], strides = [1, 1, 1]} : vector<3x3x128xf32> to vector<1x1x128xf32>
    %135 = vector.shape_cast %134 : vector<1x1x128xf32> to vector<128xf32>
    %136 = vector.shape_cast %135 : vector<128xf32> to vector<1x1x128xf32>
    %137 = vector.broadcast %136 : vector<1x1x128xf32> to vector<4x16x128xf32>
    %138 = arith.mulf %133, %137 : vector<4x16x128xf32>
    %139 = arith.addf %117, %138 : vector<4x16x128xf32>
    %c15_i32_71 = arith.constant 15 : i32
    %140 = tpu.dynamic_rotate %126 by %c15_i32_71 dim 1 : vector<4x16x128xf32>, i32 -> vector<4x16x128xf32>
    %141 = vector.extract_strided_slice %3 {offsets = [2, 2, 0], sizes = [1, 1, 128], strides = [1, 1, 1]} : vector<3x3x128xf32> to vector<1x1x128xf32>
    %142 = vector.shape_cast %141 : vector<1x1x128xf32> to vector<128xf32>
    %143 = vector.shape_cast %142 : vector<128xf32> to vector<1x1x128xf32>
    %144 = vector.broadcast %143 : vector<1x1x128xf32> to vector<4x16x128xf32>
    %145 = arith.mulf %140, %144 : vector<4x16x128xf32>
    %146 = arith.addf %124, %145 : vector<4x16x128xf32>
    %cst_72 = arith.constant 0.000000e+00 : f32
    %147 = vector.shape_cast %6 : vector<1x16x128xi1> to vector<1x16x128xi1>
    %148 = vector.broadcast %147 : vector<1x16x128xi1> to vector<4x16x128xi1>
    %149 = vector.broadcast %cst_72 : f32 to vector<4x16x128xf32>
    %150 = arith.select %148, %139, %149 : vector<4x16x128xi1>, vector<4x16x128xf32>
    %151 = arith.addf %132, %150 : vector<4x16x128xf32>
    %cst_73 = arith.constant 0.000000e+00 : f32
    %152 = vector.shape_cast %8 : vector<1x16x128xi1> to vector<1x16x128xi1>
    %153 = vector.broadcast %152 : vector<1x16x128xi1> to vector<4x16x128xi1>
    %154 = vector.broadcast %cst_73 : f32 to vector<4x16x128xf32>
    %155 = arith.select %153, %146, %154 : vector<4x16x128xi1>, vector<4x16x128xf32>
    %156 = arith.addf %151, %155 : vector<4x16x128xf32>
    %157 = vector.shape_cast %1 : vector<1x128xf32> to vector<1x1x128xf32>
    %158 = vector.broadcast %157 : vector<1x1x128xf32> to vector<4x16x128xf32>
    %159 = arith.addf %156, %158 : vector<4x16x128xf32>
    %cst_74 = arith.constant 0.000000e+00 : f32
    %cst_75 = arith.constant 6.000000e+00 : f32
    %160 = vector.broadcast %cst_74 : f32 to vector<4x16x128xf32>
    %161 = arith.maximumf %160, %159 : vector<4x16x128xf32>
    %162 = vector.broadcast %cst_75 : f32 to vector<4x16x128xf32>
    %163 = arith.minimumf %162, %161 : vector<4x16x128xf32>
    %164 = vector.shape_cast %163 : vector<4x16x128xf32> to vector<64x128xf32>
    %165 = arith.truncf %164 : vector<64x128xf32> to vector<64x128xbf16>
    %c0_76 = arith.constant 0 : index
    %c0_77 = arith.constant 0 : index
    %166 = vector.load %arg6[%c0_76, %c0_77] : memref<128x128xbf16, #tpu.memory_space<vmem>>, vector<128x128xbf16>
    %cst_78 = arith.constant dense<0.000000e+00> : vector<64x128xf32>
    %167 = tpu.matmul %165, %166, %cst_78 {dimension_numbers = #tpu.dot_dimension_numbers<[1], [0], [0], [1], [0, 0, 1, 1], [], []>} : vector<64x128xbf16>, vector<128x128xbf16>, vector<64x128xf32> -> vector<64x128xf32>
    %168 = arith.addf %77, %167 : vector<64x128xf32>
    %169 = vector.broadcast %2 : vector<1x128xf32> to vector<64x128xf32>
    %170 = arith.addf %168, %169 : vector<64x128xf32>
    %171 = vector.shape_cast %170 : vector<64x128xf32> to vector<4x16x128xf32>
    %c0_79 = arith.constant 0 : index
    %c0_80 = arith.constant 0 : index
    %c0_81 = arith.constant 0 : index
    %c0_82 = arith.constant 0 : index
    %172 = vector.load %arg1[%c0_79, %c0_80, %c0_81, %c0_82] : memref<1x16x16x128xf32, #tpu.memory_space<vmem>>, vector<1x4x16x128xf32>
    %173 = vector.shape_cast %172 : vector<1x4x16x128xf32> to vector<4x16x128xf32>
    %174 = arith.addf %171, %173 : vector<4x16x128xf32>
    %c0_83 = arith.constant 0 : index
    %c0_84 = arith.constant 0 : index
    %c0_85 = arith.constant 0 : index
    %c0_86 = arith.constant 0 : index
    %175 = vector.load %arg8[%c0_83, %c0_84, %c0_85, %c0_86] : memref<1x16x16x128xf32, #tpu.memory_space<vmem>>, vector<1x4x16x128xf32>
    %176 = vector.shape_cast %175 : vector<1x4x16x128xf32> to vector<4x16x128xf32>
    %177 = vector.shape_cast %174 : vector<4x16x128xf32> to vector<1x4x16x128xf32>
    tpu.vector_store %arg8[%c0_83, %c0_84, %c0_85, %c0_86], %177 {strides = array<i32>} : memref<1x16x16x128xf32, #tpu.memory_space<vmem>>, vector<1x4x16x128xf32>,
    %cst_87 = arith.constant 0.000000e+00 : f32
    %178 = vector.broadcast %cst_87 : f32 to vector<64x128xf32>
    %cst_88 = arith.constant 0.000000e+00 : f32
    %179 = vector.broadcast %cst_88 : f32 to vector<4x16x128xf32>
    %cst_89 = arith.constant 0.000000e+00 : f32
    %180 = vector.broadcast %cst_89 : f32 to vector<4x16x128xf32>
    %cst_90 = arith.constant 0.000000e+00 : f32
    %181 = vector.broadcast %cst_90 : f32 to vector<4x16x128xf32>
    %c4_91 = arith.constant 4 : index
    %c0_92 = arith.constant 0 : index
    %c0_93 = arith.constant 0 : index
    %182 = vector.load %arg9[%c4_91, %c0_92, %c0_93] : memref<18x16x128xbf16, #tpu.memory_space<vmem>>, vector<4x16x128xbf16>
    %183 = arith.extf %182 : vector<4x16x128xbf16> to vector<4x16x128xf32>
    %184 = vector.extract_strided_slice %3 {offsets = [0, 1, 0], sizes = [1, 1, 128], strides = [1, 1, 1]} : vector<3x3x128xf32> to vector<1x1x128xf32>
    %185 = vector.shape_cast %184 : vector<1x1x128xf32> to vector<128xf32>
    %186 = vector.shape_cast %185 : vector<128xf32> to vector<1x1x128xf32>
    %187 = vector.broadcast %186 : vector<1x1x128xf32> to vector<4x16x128xf32>
    %188 = arith.mulf %183, %187 : vector<4x16x128xf32>
    %189 = arith.addf %179, %188 : vector<4x16x128xf32>
    %c1_i32_94 = arith.constant 1 : i32
    %190 = tpu.dynamic_rotate %183 by %c1_i32_94 dim 1 : vector<4x16x128xf32>, i32 -> vector<4x16x128xf32>
    %191 = vector.extract_strided_slice %3 {offsets = [0, 0, 0], sizes = [1, 1, 128], strides = [1, 1, 1]} : vector<3x3x128xf32> to vector<1x1x128xf32>
    %192 = vector.shape_cast %191 : vector<1x1x128xf32> to vector<128xf32>
    %193 = vector.shape_cast %192 : vector<128xf32> to vector<1x1x128xf32>
    %194 = vector.broadcast %193 : vector<1x1x128xf32> to vector<4x16x128xf32>
    %195 = arith.mulf %190, %194 : vector<4x16x128xf32>
    %196 = arith.addf %180, %195 : vector<4x16x128xf32>
    %c15_i32_95 = arith.constant 15 : i32
    %197 = tpu.dynamic_rotate %183 by %c15_i32_95 dim 1 : vector<4x16x128xf32>, i32 -> vector<4x16x128xf32>
    %198 = vector.extract_strided_slice %3 {offsets = [0, 2, 0], sizes = [1, 1, 128], strides = [1, 1, 1]} : vector<3x3x128xf32> to vector<1x1x128xf32>
    %199 = vector.shape_cast %198 : vector<1x1x128xf32> to vector<128xf32>
    %200 = vector.shape_cast %199 : vector<128xf32> to vector<1x1x128xf32>
    %201 = vector.broadcast %200 : vector<1x1x128xf32> to vector<4x16x128xf32>
    %202 = arith.mulf %197, %201 : vector<4x16x128xf32>
    %203 = arith.addf %181, %202 : vector<4x16x128xf32>
    %c5_96 = arith.constant 5 : index
    %c0_97 = arith.constant 0 : index
    %c0_98 = arith.constant 0 : index
    %204 = vector.load %arg9[%c5_96, %c0_97, %c0_98] : memref<18x16x128xbf16, #tpu.memory_space<vmem>>, vector<4x16x128xbf16>
    %205 = arith.extf %204 : vector<4x16x128xbf16> to vector<4x16x128xf32>
    %206 = vector.extract_strided_slice %3 {offsets = [1, 1, 0], sizes = [1, 1, 128], strides = [1, 1, 1]} : vector<3x3x128xf32> to vector<1x1x128xf32>
    %207 = vector.shape_cast %206 : vector<1x1x128xf32> to vector<128xf32>
    %208 = vector.shape_cast %207 : vector<128xf32> to vector<1x1x128xf32>
    %209 = vector.broadcast %208 : vector<1x1x128xf32> to vector<4x16x128xf32>
    %210 = arith.mulf %205, %209 : vector<4x16x128xf32>
    %211 = arith.addf %189, %210 : vector<4x16x128xf32>
    %c1_i32_99 = arith.constant 1 : i32
    %212 = tpu.dynamic_rotate %205 by %c1_i32_99 dim 1 : vector<4x16x128xf32>, i32 -> vector<4x16x128xf32>
    %213 = vector.extract_strided_slice %3 {offsets = [1, 0, 0], sizes = [1, 1, 128], strides = [1, 1, 1]} : vector<3x3x128xf32> to vector<1x1x128xf32>
    %214 = vector.shape_cast %213 : vector<1x1x128xf32> to vector<128xf32>
    %215 = vector.shape_cast %214 : vector<128xf32> to vector<1x1x128xf32>
    %216 = vector.broadcast %215 : vector<1x1x128xf32> to vector<4x16x128xf32>
    %217 = arith.mulf %212, %216 : vector<4x16x128xf32>
    %218 = arith.addf %196, %217 : vector<4x16x128xf32>
    %c15_i32_100 = arith.constant 15 : i32
    %219 = tpu.dynamic_rotate %205 by %c15_i32_100 dim 1 : vector<4x16x128xf32>, i32 -> vector<4x16x128xf32>
    %220 = vector.extract_strided_slice %3 {offsets = [1, 2, 0], sizes = [1, 1, 128], strides = [1, 1, 1]} : vector<3x3x128xf32> to vector<1x1x128xf32>
    %221 = vector.shape_cast %220 : vector<1x1x128xf32> to vector<128xf32>
    %222 = vector.shape_cast %221 : vector<128xf32> to vector<1x1x128xf32>
    %223 = vector.broadcast %222 : vector<1x1x128xf32> to vector<4x16x128xf32>
    %224 = arith.mulf %219, %223 : vector<4x16x128xf32>
    %225 = arith.addf %203, %224 : vector<4x16x128xf32>
    %c6 = arith.constant 6 : index
    %c0_101 = arith.constant 0 : index
    %c0_102 = arith.constant 0 : index
    %226 = vector.load %arg9[%c6, %c0_101, %c0_102] : memref<18x16x128xbf16, #tpu.memory_space<vmem>>, vector<4x16x128xbf16>
    %227 = arith.extf %226 : vector<4x16x128xbf16> to vector<4x16x128xf32>
    %228 = vector.extract_strided_slice %3 {offsets = [2, 1, 0], sizes = [1, 1, 128], strides = [1, 1, 1]} : vector<3x3x128xf32> to vector<1x1x128xf32>
    %229 = vector.shape_cast %228 : vector<1x1x128xf32> to vector<128xf32>
    %230 = vector.shape_cast %229 : vector<128xf32> to vector<1x1x128xf32>
    %231 = vector.broadcast %230 : vector<1x1x128xf32> to vector<4x16x128xf32>
    %232 = arith.mulf %227, %231 : vector<4x16x128xf32>
    %233 = arith.addf %211, %232 : vector<4x16x128xf32>
    %c1_i32_103 = arith.constant 1 : i32
    %234 = tpu.dynamic_rotate %227 by %c1_i32_103 dim 1 : vector<4x16x128xf32>, i32 -> vector<4x16x128xf32>
    %235 = vector.extract_strided_slice %3 {offsets = [2, 0, 0], sizes = [1, 1, 128], strides = [1, 1, 1]} : vector<3x3x128xf32> to vector<1x1x128xf32>
    %236 = vector.shape_cast %235 : vector<1x1x128xf32> to vector<128xf32>
    %237 = vector.shape_cast %236 : vector<128xf32> to vector<1x1x128xf32>
    %238 = vector.broadcast %237 : vector<1x1x128xf32> to vector<4x16x128xf32>
    %239 = arith.mulf %234, %238 : vector<4x16x128xf32>
    %240 = arith.addf %218, %239 : vector<4x16x128xf32>
    %c15_i32_104 = arith.constant 15 : i32
    %241 = tpu.dynamic_rotate %227 by %c15_i32_104 dim 1 : vector<4x16x128xf32>, i32 -> vector<4x16x128xf32>
    %242 = vector.extract_strided_slice %3 {offsets = [2, 2, 0], sizes = [1, 1, 128], strides = [1, 1, 1]} : vector<3x3x128xf32> to vector<1x1x128xf32>
    %243 = vector.shape_cast %242 : vector<1x1x128xf32> to vector<128xf32>
    %244 = vector.shape_cast %243 : vector<128xf32> to vector<1x1x128xf32>
    %245 = vector.broadcast %244 : vector<1x1x128xf32> to vector<4x16x128xf32>
    %246 = arith.mulf %241, %245 : vector<4x16x128xf32>
    %247 = arith.addf %225, %246 : vector<4x16x128xf32>
    %cst_105 = arith.constant 0.000000e+00 : f32
    %248 = vector.shape_cast %6 : vector<1x16x128xi1> to vector<1x16x128xi1>
    %249 = vector.broadcast %248 : vector<1x16x128xi1> to vector<4x16x128xi1>
    %250 = vector.broadcast %cst_105 : f32 to vector<4x16x128xf32>
    %251 = arith.select %249, %240, %250 : vector<4x16x128xi1>, vector<4x16x128xf32>
    %252 = arith.addf %233, %251 : vector<4x16x128xf32>
    %cst_106 = arith.constant 0.000000e+00 : f32
    %253 = vector.shape_cast %8 : vector<1x16x128xi1> to vector<1x16x128xi1>
    %254 = vector.broadcast %253 : vector<1x16x128xi1> to vector<4x16x128xi1>
    %255 = vector.broadcast %cst_106 : f32 to vector<4x16x128xf32>
    %256 = arith.select %254, %247, %255 : vector<4x16x128xi1>, vector<4x16x128xf32>
    %257 = arith.addf %252, %256 : vector<4x16x128xf32>
    %258 = vector.shape_cast %1 : vector<1x128xf32> to vector<1x1x128xf32>
    %259 = vector.broadcast %258 : vector<1x1x128xf32> to vector<4x16x128xf32>
    %260 = arith.addf %257, %259 : vector<4x16x128xf32>
    %cst_107 = arith.constant 0.000000e+00 : f32
    %cst_108 = arith.constant 6.000000e+00 : f32
    %261 = vector.broadcast %cst_107 : f32 to vector<4x16x128xf32>
    %262 = arith.maximumf %261, %260 : vector<4x16x128xf32>
    %263 = vector.broadcast %cst_108 : f32 to vector<4x16x128xf32>
    %264 = arith.minimumf %263, %262 : vector<4x16x128xf32>
    %265 = vector.shape_cast %264 : vector<4x16x128xf32> to vector<64x128xf32>
    %266 = arith.truncf %265 : vector<64x128xf32> to vector<64x128xbf16>
    %c0_109 = arith.constant 0 : index
    %c0_110 = arith.constant 0 : index
    %267 = vector.load %arg6[%c0_109, %c0_110] : memref<128x128xbf16, #tpu.memory_space<vmem>>, vector<128x128xbf16>
    %cst_111 = arith.constant dense<0.000000e+00> : vector<64x128xf32>
    %268 = tpu.matmul %266, %267, %cst_111 {dimension_numbers = #tpu.dot_dimension_numbers<[1], [0], [0], [1], [0, 0, 1, 1], [], []>} : vector<64x128xbf16>, vector<128x128xbf16>, vector<64x128xf32> -> vector<64x128xf32>
    %269 = arith.addf %178, %268 : vector<64x128xf32>
    %270 = vector.broadcast %2 : vector<1x128xf32> to vector<64x128xf32>
    %271 = arith.addf %269, %270 : vector<64x128xf32>
    %272 = vector.shape_cast %271 : vector<64x128xf32> to vector<4x16x128xf32>
    %c0_112 = arith.constant 0 : index
    %c4_113 = arith.constant 4 : index
    %c0_114 = arith.constant 0 : index
    %c0_115 = arith.constant 0 : index
    %273 = vector.load %arg1[%c0_112, %c4_113, %c0_114, %c0_115] : memref<1x16x16x128xf32, #tpu.memory_space<vmem>>, vector<1x4x16x128xf32>
    %274 = vector.shape_cast %273 : vector<1x4x16x128xf32> to vector<4x16x128xf32>
    %275 = arith.addf %272, %274 : vector<4x16x128xf32>
    %c0_116 = arith.constant 0 : index
    %c4_117 = arith.constant 4 : index
    %c0_118 = arith.constant 0 : index
    %c0_119 = arith.constant 0 : index
    %276 = vector.load %arg8[%c0_116, %c4_117, %c0_118, %c0_119] : memref<1x16x16x128xf32, #tpu.memory_space<vmem>>, vector<1x4x16x128xf32>
    %277 = vector.shape_cast %276 : vector<1x4x16x128xf32> to vector<4x16x128xf32>
    %278 = vector.shape_cast %275 : vector<4x16x128xf32> to vector<1x4x16x128xf32>
    tpu.vector_store %arg8[%c0_116, %c4_117, %c0_118, %c0_119], %278 {strides = array<i32>} : memref<1x16x16x128xf32, #tpu.memory_space<vmem>>, vector<1x4x16x128xf32>,
    %cst_120 = arith.constant 0.000000e+00 : f32
    %279 = vector.broadcast %cst_120 : f32 to vector<64x128xf32>
    %cst_121 = arith.constant 0.000000e+00 : f32
    %280 = vector.broadcast %cst_121 : f32 to vector<4x16x128xf32>
    %cst_122 = arith.constant 0.000000e+00 : f32
    %281 = vector.broadcast %cst_122 : f32 to vector<4x16x128xf32>
    %cst_123 = arith.constant 0.000000e+00 : f32
    %282 = vector.broadcast %cst_123 : f32 to vector<4x16x128xf32>
    %c8_124 = arith.constant 8 : index
    %c0_125 = arith.constant 0 : index
    %c0_126 = arith.constant 0 : index
    %283 = vector.load %arg9[%c8_124, %c0_125, %c0_126] : memref<18x16x128xbf16, #tpu.memory_space<vmem>>, vector<4x16x128xbf16>
    %284 = arith.extf %283 : vector<4x16x128xbf16> to vector<4x16x128xf32>
    %285 = vector.extract_strided_slice %3 {offsets = [0, 1, 0], sizes = [1, 1, 128], strides = [1, 1, 1]} : vector<3x3x128xf32> to vector<1x1x128xf32>
    %286 = vector.shape_cast %285 : vector<1x1x128xf32> to vector<128xf32>
    %287 = vector.shape_cast %286 : vector<128xf32> to vector<1x1x128xf32>
    %288 = vector.broadcast %287 : vector<1x1x128xf32> to vector<4x16x128xf32>
    %289 = arith.mulf %284, %288 : vector<4x16x128xf32>
    %290 = arith.addf %280, %289 : vector<4x16x128xf32>
    %c1_i32_127 = arith.constant 1 : i32
    %291 = tpu.dynamic_rotate %284 by %c1_i32_127 dim 1 : vector<4x16x128xf32>, i32 -> vector<4x16x128xf32>
    %292 = vector.extract_strided_slice %3 {offsets = [0, 0, 0], sizes = [1, 1, 128], strides = [1, 1, 1]} : vector<3x3x128xf32> to vector<1x1x128xf32>
    %293 = vector.shape_cast %292 : vector<1x1x128xf32> to vector<128xf32>
    %294 = vector.shape_cast %293 : vector<128xf32> to vector<1x1x128xf32>
    %295 = vector.broadcast %294 : vector<1x1x128xf32> to vector<4x16x128xf32>
    %296 = arith.mulf %291, %295 : vector<4x16x128xf32>
    %297 = arith.addf %281, %296 : vector<4x16x128xf32>
    %c15_i32_128 = arith.constant 15 : i32
    %298 = tpu.dynamic_rotate %284 by %c15_i32_128 dim 1 : vector<4x16x128xf32>, i32 -> vector<4x16x128xf32>
    %299 = vector.extract_strided_slice %3 {offsets = [0, 2, 0], sizes = [1, 1, 128], strides = [1, 1, 1]} : vector<3x3x128xf32> to vector<1x1x128xf32>
    %300 = vector.shape_cast %299 : vector<1x1x128xf32> to vector<128xf32>
    %301 = vector.shape_cast %300 : vector<128xf32> to vector<1x1x128xf32>
    %302 = vector.broadcast %301 : vector<1x1x128xf32> to vector<4x16x128xf32>
    %303 = arith.mulf %298, %302 : vector<4x16x128xf32>
    %304 = arith.addf %282, %303 : vector<4x16x128xf32>
    %c9_129 = arith.constant 9 : index
    %c0_130 = arith.constant 0 : index
    %c0_131 = arith.constant 0 : index
    %305 = vector.load %arg9[%c9_129, %c0_130, %c0_131] : memref<18x16x128xbf16, #tpu.memory_space<vmem>>, vector<4x16x128xbf16>
    %306 = arith.extf %305 : vector<4x16x128xbf16> to vector<4x16x128xf32>
    %307 = vector.extract_strided_slice %3 {offsets = [1, 1, 0], sizes = [1, 1, 128], strides = [1, 1, 1]} : vector<3x3x128xf32> to vector<1x1x128xf32>
    %308 = vector.shape_cast %307 : vector<1x1x128xf32> to vector<128xf32>
    %309 = vector.shape_cast %308 : vector<128xf32> to vector<1x1x128xf32>
    %310 = vector.broadcast %309 : vector<1x1x128xf32> to vector<4x16x128xf32>
    %311 = arith.mulf %306, %310 : vector<4x16x128xf32>
    %312 = arith.addf %290, %311 : vector<4x16x128xf32>
    %c1_i32_132 = arith.constant 1 : i32
    %313 = tpu.dynamic_rotate %306 by %c1_i32_132 dim 1 : vector<4x16x128xf32>, i32 -> vector<4x16x128xf32>
    %314 = vector.extract_strided_slice %3 {offsets = [1, 0, 0], sizes = [1, 1, 128], strides = [1, 1, 1]} : vector<3x3x128xf32> to vector<1x1x128xf32>
    %315 = vector.shape_cast %314 : vector<1x1x128xf32> to vector<128xf32>
    %316 = vector.shape_cast %315 : vector<128xf32> to vector<1x1x128xf32>
    %317 = vector.broadcast %316 : vector<1x1x128xf32> to vector<4x16x128xf32>
    %318 = arith.mulf %313, %317 : vector<4x16x128xf32>
    %319 = arith.addf %297, %318 : vector<4x16x128xf32>
    %c15_i32_133 = arith.constant 15 : i32
    %320 = tpu.dynamic_rotate %306 by %c15_i32_133 dim 1 : vector<4x16x128xf32>, i32 -> vector<4x16x128xf32>
    %321 = vector.extract_strided_slice %3 {offsets = [1, 2, 0], sizes = [1, 1, 128], strides = [1, 1, 1]} : vector<3x3x128xf32> to vector<1x1x128xf32>
    %322 = vector.shape_cast %321 : vector<1x1x128xf32> to vector<128xf32>
    %323 = vector.shape_cast %322 : vector<128xf32> to vector<1x1x128xf32>
    %324 = vector.broadcast %323 : vector<1x1x128xf32> to vector<4x16x128xf32>
    %325 = arith.mulf %320, %324 : vector<4x16x128xf32>
    %326 = arith.addf %304, %325 : vector<4x16x128xf32>
    %c10 = arith.constant 10 : index
    %c0_134 = arith.constant 0 : index
    %c0_135 = arith.constant 0 : index
    %327 = vector.load %arg9[%c10, %c0_134, %c0_135] : memref<18x16x128xbf16, #tpu.memory_space<vmem>>, vector<4x16x128xbf16>
    %328 = arith.extf %327 : vector<4x16x128xbf16> to vector<4x16x128xf32>
    %329 = vector.extract_strided_slice %3 {offsets = [2, 1, 0], sizes = [1, 1, 128], strides = [1, 1, 1]} : vector<3x3x128xf32> to vector<1x1x128xf32>
    %330 = vector.shape_cast %329 : vector<1x1x128xf32> to vector<128xf32>
    %331 = vector.shape_cast %330 : vector<128xf32> to vector<1x1x128xf32>
    %332 = vector.broadcast %331 : vector<1x1x128xf32> to vector<4x16x128xf32>
    %333 = arith.mulf %328, %332 : vector<4x16x128xf32>
    %334 = arith.addf %312, %333 : vector<4x16x128xf32>
    %c1_i32_136 = arith.constant 1 : i32
    %335 = tpu.dynamic_rotate %328 by %c1_i32_136 dim 1 : vector<4x16x128xf32>, i32 -> vector<4x16x128xf32>
    %336 = vector.extract_strided_slice %3 {offsets = [2, 0, 0], sizes = [1, 1, 128], strides = [1, 1, 1]} : vector<3x3x128xf32> to vector<1x1x128xf32>
    %337 = vector.shape_cast %336 : vector<1x1x128xf32> to vector<128xf32>
    %338 = vector.shape_cast %337 : vector<128xf32> to vector<1x1x128xf32>
    %339 = vector.broadcast %338 : vector<1x1x128xf32> to vector<4x16x128xf32>
    %340 = arith.mulf %335, %339 : vector<4x16x128xf32>
    %341 = arith.addf %319, %340 : vector<4x16x128xf32>
    %c15_i32_137 = arith.constant 15 : i32
    %342 = tpu.dynamic_rotate %328 by %c15_i32_137 dim 1 : vector<4x16x128xf32>, i32 -> vector<4x16x128xf32>
    %343 = vector.extract_strided_slice %3 {offsets = [2, 2, 0], sizes = [1, 1, 128], strides = [1, 1, 1]} : vector<3x3x128xf32> to vector<1x1x128xf32>
    %344 = vector.shape_cast %343 : vector<1x1x128xf32> to vector<128xf32>
    %345 = vector.shape_cast %344 : vector<128xf32> to vector<1x1x128xf32>
    %346 = vector.broadcast %345 : vector<1x1x128xf32> to vector<4x16x128xf32>
    %347 = arith.mulf %342, %346 : vector<4x16x128xf32>
    %348 = arith.addf %326, %347 : vector<4x16x128xf32>
    %cst_138 = arith.constant 0.000000e+00 : f32
    %349 = vector.shape_cast %6 : vector<1x16x128xi1> to vector<1x16x128xi1>
    %350 = vector.broadcast %349 : vector<1x16x128xi1> to vector<4x16x128xi1>
    %351 = vector.broadcast %cst_138 : f32 to vector<4x16x128xf32>
    %352 = arith.select %350, %341, %351 : vector<4x16x128xi1>, vector<4x16x128xf32>
    %353 = arith.addf %334, %352 : vector<4x16x128xf32>
    %cst_139 = arith.constant 0.000000e+00 : f32
    %354 = vector.shape_cast %8 : vector<1x16x128xi1> to vector<1x16x128xi1>
    %355 = vector.broadcast %354 : vector<1x16x128xi1> to vector<4x16x128xi1>
    %356 = vector.broadcast %cst_139 : f32 to vector<4x16x128xf32>
    %357 = arith.select %355, %348, %356 : vector<4x16x128xi1>, vector<4x16x128xf32>
    %358 = arith.addf %353, %357 : vector<4x16x128xf32>
    %359 = vector.shape_cast %1 : vector<1x128xf32> to vector<1x1x128xf32>
    %360 = vector.broadcast %359 : vector<1x1x128xf32> to vector<4x16x128xf32>
    %361 = arith.addf %358, %360 : vector<4x16x128xf32>
    %cst_140 = arith.constant 0.000000e+00 : f32
    %cst_141 = arith.constant 6.000000e+00 : f32
    %362 = vector.broadcast %cst_140 : f32 to vector<4x16x128xf32>
    %363 = arith.maximumf %362, %361 : vector<4x16x128xf32>
    %364 = vector.broadcast %cst_141 : f32 to vector<4x16x128xf32>
    %365 = arith.minimumf %364, %363 : vector<4x16x128xf32>
    %366 = vector.shape_cast %365 : vector<4x16x128xf32> to vector<64x128xf32>
    %367 = arith.truncf %366 : vector<64x128xf32> to vector<64x128xbf16>
    %c0_142 = arith.constant 0 : index
    %c0_143 = arith.constant 0 : index
    %368 = vector.load %arg6[%c0_142, %c0_143] : memref<128x128xbf16, #tpu.memory_space<vmem>>, vector<128x128xbf16>
    %cst_144 = arith.constant dense<0.000000e+00> : vector<64x128xf32>
    %369 = tpu.matmul %367, %368, %cst_144 {dimension_numbers = #tpu.dot_dimension_numbers<[1], [0], [0], [1], [0, 0, 1, 1], [], []>} : vector<64x128xbf16>, vector<128x128xbf16>, vector<64x128xf32> -> vector<64x128xf32>
    %370 = arith.addf %279, %369 : vector<64x128xf32>
    %371 = vector.broadcast %2 : vector<1x128xf32> to vector<64x128xf32>
    %372 = arith.addf %370, %371 : vector<64x128xf32>
    %373 = vector.shape_cast %372 : vector<64x128xf32> to vector<4x16x128xf32>
    %c0_145 = arith.constant 0 : index
    %c8_146 = arith.constant 8 : index
    %c0_147 = arith.constant 0 : index
    %c0_148 = arith.constant 0 : index
    %374 = vector.load %arg1[%c0_145, %c8_146, %c0_147, %c0_148] : memref<1x16x16x128xf32, #tpu.memory_space<vmem>>, vector<1x4x16x128xf32>
    %375 = vector.shape_cast %374 : vector<1x4x16x128xf32> to vector<4x16x128xf32>
    %376 = arith.addf %373, %375 : vector<4x16x128xf32>
    %c0_149 = arith.constant 0 : index
    %c8_150 = arith.constant 8 : index
    %c0_151 = arith.constant 0 : index
    %c0_152 = arith.constant 0 : index
    %377 = vector.load %arg8[%c0_149, %c8_150, %c0_151, %c0_152] : memref<1x16x16x128xf32, #tpu.memory_space<vmem>>, vector<1x4x16x128xf32>
    %378 = vector.shape_cast %377 : vector<1x4x16x128xf32> to vector<4x16x128xf32>
    %379 = vector.shape_cast %376 : vector<4x16x128xf32> to vector<1x4x16x128xf32>
    tpu.vector_store %arg8[%c0_149, %c8_150, %c0_151, %c0_152], %379 {strides = array<i32>} : memref<1x16x16x128xf32, #tpu.memory_space<vmem>>, vector<1x4x16x128xf32>,
    %cst_153 = arith.constant 0.000000e+00 : f32
    %380 = vector.broadcast %cst_153 : f32 to vector<64x128xf32>
    %cst_154 = arith.constant 0.000000e+00 : f32
    %381 = vector.broadcast %cst_154 : f32 to vector<4x16x128xf32>
    %cst_155 = arith.constant 0.000000e+00 : f32
    %382 = vector.broadcast %cst_155 : f32 to vector<4x16x128xf32>
    %cst_156 = arith.constant 0.000000e+00 : f32
    %383 = vector.broadcast %cst_156 : f32 to vector<4x16x128xf32>
    %c12_157 = arith.constant 12 : index
    %c0_158 = arith.constant 0 : index
    %c0_159 = arith.constant 0 : index
    %384 = vector.load %arg9[%c12_157, %c0_158, %c0_159] : memref<18x16x128xbf16, #tpu.memory_space<vmem>>, vector<4x16x128xbf16>
    %385 = arith.extf %384 : vector<4x16x128xbf16> to vector<4x16x128xf32>
    %386 = vector.extract_strided_slice %3 {offsets = [0, 1, 0], sizes = [1, 1, 128], strides = [1, 1, 1]} : vector<3x3x128xf32> to vector<1x1x128xf32>
    %387 = vector.shape_cast %386 : vector<1x1x128xf32> to vector<128xf32>
    %388 = vector.shape_cast %387 : vector<128xf32> to vector<1x1x128xf32>
    %389 = vector.broadcast %388 : vector<1x1x128xf32> to vector<4x16x128xf32>
    %390 = arith.mulf %385, %389 : vector<4x16x128xf32>
    %391 = arith.addf %381, %390 : vector<4x16x128xf32>
    %c1_i32_160 = arith.constant 1 : i32
    %392 = tpu.dynamic_rotate %385 by %c1_i32_160 dim 1 : vector<4x16x128xf32>, i32 -> vector<4x16x128xf32>
    %393 = vector.extract_strided_slice %3 {offsets = [0, 0, 0], sizes = [1, 1, 128], strides = [1, 1, 1]} : vector<3x3x128xf32> to vector<1x1x128xf32>
    %394 = vector.shape_cast %393 : vector<1x1x128xf32> to vector<128xf32>
    %395 = vector.shape_cast %394 : vector<128xf32> to vector<1x1x128xf32>
    %396 = vector.broadcast %395 : vector<1x1x128xf32> to vector<4x16x128xf32>
    %397 = arith.mulf %392, %396 : vector<4x16x128xf32>
    %398 = arith.addf %382, %397 : vector<4x16x128xf32>
    %c15_i32_161 = arith.constant 15 : i32
    %399 = tpu.dynamic_rotate %385 by %c15_i32_161 dim 1 : vector<4x16x128xf32>, i32 -> vector<4x16x128xf32>
    %400 = vector.extract_strided_slice %3 {offsets = [0, 2, 0], sizes = [1, 1, 128], strides = [1, 1, 1]} : vector<3x3x128xf32> to vector<1x1x128xf32>
    %401 = vector.shape_cast %400 : vector<1x1x128xf32> to vector<128xf32>
    %402 = vector.shape_cast %401 : vector<128xf32> to vector<1x1x128xf32>
    %403 = vector.broadcast %402 : vector<1x1x128xf32> to vector<4x16x128xf32>
    %404 = arith.mulf %399, %403 : vector<4x16x128xf32>
    %405 = arith.addf %383, %404 : vector<4x16x128xf32>
    %c13_162 = arith.constant 13 : index
    %c0_163 = arith.constant 0 : index
    %c0_164 = arith.constant 0 : index
    %406 = vector.load %arg9[%c13_162, %c0_163, %c0_164] : memref<18x16x128xbf16, #tpu.memory_space<vmem>>, vector<4x16x128xbf16>
    %407 = arith.extf %406 : vector<4x16x128xbf16> to vector<4x16x128xf32>
    %408 = vector.extract_strided_slice %3 {offsets = [1, 1, 0], sizes = [1, 1, 128], strides = [1, 1, 1]} : vector<3x3x128xf32> to vector<1x1x128xf32>
    %409 = vector.shape_cast %408 : vector<1x1x128xf32> to vector<128xf32>
    %410 = vector.shape_cast %409 : vector<128xf32> to vector<1x1x128xf32>
    %411 = vector.broadcast %410 : vector<1x1x128xf32> to vector<4x16x128xf32>
    %412 = arith.mulf %407, %411 : vector<4x16x128xf32>
    %413 = arith.addf %391, %412 : vector<4x16x128xf32>
    %c1_i32_165 = arith.constant 1 : i32
    %414 = tpu.dynamic_rotate %407 by %c1_i32_165 dim 1 : vector<4x16x128xf32>, i32 -> vector<4x16x128xf32>
    %415 = vector.extract_strided_slice %3 {offsets = [1, 0, 0], sizes = [1, 1, 128], strides = [1, 1, 1]} : vector<3x3x128xf32> to vector<1x1x128xf32>
    %416 = vector.shape_cast %415 : vector<1x1x128xf32> to vector<128xf32>
    %417 = vector.shape_cast %416 : vector<128xf32> to vector<1x1x128xf32>
    %418 = vector.broadcast %417 : vector<1x1x128xf32> to vector<4x16x128xf32>
    %419 = arith.mulf %414, %418 : vector<4x16x128xf32>
    %420 = arith.addf %398, %419 : vector<4x16x128xf32>
    %c15_i32_166 = arith.constant 15 : i32
    %421 = tpu.dynamic_rotate %407 by %c15_i32_166 dim 1 : vector<4x16x128xf32>, i32 -> vector<4x16x128xf32>
    %422 = vector.extract_strided_slice %3 {offsets = [1, 2, 0], sizes = [1, 1, 128], strides = [1, 1, 1]} : vector<3x3x128xf32> to vector<1x1x128xf32>
    %423 = vector.shape_cast %422 : vector<1x1x128xf32> to vector<128xf32>
    %424 = vector.shape_cast %423 : vector<128xf32> to vector<1x1x128xf32>
    %425 = vector.broadcast %424 : vector<1x1x128xf32> to vector<4x16x128xf32>
    %426 = arith.mulf %421, %425 : vector<4x16x128xf32>
    %427 = arith.addf %405, %426 : vector<4x16x128xf32>
    %c14 = arith.constant 14 : index
    %c0_167 = arith.constant 0 : index
    %c0_168 = arith.constant 0 : index
    %428 = vector.load %arg9[%c14, %c0_167, %c0_168] : memref<18x16x128xbf16, #tpu.memory_space<vmem>>, vector<4x16x128xbf16>
    %429 = arith.extf %428 : vector<4x16x128xbf16> to vector<4x16x128xf32>
    %430 = vector.extract_strided_slice %3 {offsets = [2, 1, 0], sizes = [1, 1, 128], strides = [1, 1, 1]} : vector<3x3x128xf32> to vector<1x1x128xf32>
    %431 = vector.shape_cast %430 : vector<1x1x128xf32> to vector<128xf32>
    %432 = vector.shape_cast %431 : vector<128xf32> to vector<1x1x128xf32>
    %433 = vector.broadcast %432 : vector<1x1x128xf32> to vector<4x16x128xf32>
    %434 = arith.mulf %429, %433 : vector<4x16x128xf32>
    %435 = arith.addf %413, %434 : vector<4x16x128xf32>
    %c1_i32_169 = arith.constant 1 : i32
    %436 = tpu.dynamic_rotate %429 by %c1_i32_169 dim 1 : vector<4x16x128xf32>, i32 -> vector<4x16x128xf32>
    %437 = vector.extract_strided_slice %3 {offsets = [2, 0, 0], sizes = [1, 1, 128], strides = [1, 1, 1]} : vector<3x3x128xf32> to vector<1x1x128xf32>
    %438 = vector.shape_cast %437 : vector<1x1x128xf32> to vector<128xf32>
    %439 = vector.shape_cast %438 : vector<128xf32> to vector<1x1x128xf32>
    %440 = vector.broadcast %439 : vector<1x1x128xf32> to vector<4x16x128xf32>
    %441 = arith.mulf %436, %440 : vector<4x16x128xf32>
    %442 = arith.addf %420, %441 : vector<4x16x128xf32>
    %c15_i32_170 = arith.constant 15 : i32
    %443 = tpu.dynamic_rotate %429 by %c15_i32_170 dim 1 : vector<4x16x128xf32>, i32 -> vector<4x16x128xf32>
    %444 = vector.extract_strided_slice %3 {offsets = [2, 2, 0], sizes = [1, 1, 128], strides = [1, 1, 1]} : vector<3x3x128xf32> to vector<1x1x128xf32>
    %445 = vector.shape_cast %444 : vector<1x1x128xf32> to vector<128xf32>
    %446 = vector.shape_cast %445 : vector<128xf32> to vector<1x1x128xf32>
    %447 = vector.broadcast %446 : vector<1x1x128xf32> to vector<4x16x128xf32>
    %448 = arith.mulf %443, %447 : vector<4x16x128xf32>
    %449 = arith.addf %427, %448 : vector<4x16x128xf32>
    %cst_171 = arith.constant 0.000000e+00 : f32
    %450 = vector.shape_cast %6 : vector<1x16x128xi1> to vector<1x16x128xi1>
    %451 = vector.broadcast %450 : vector<1x16x128xi1> to vector<4x16x128xi1>
    %452 = vector.broadcast %cst_171 : f32 to vector<4x16x128xf32>
    %453 = arith.select %451, %442, %452 : vector<4x16x128xi1>, vector<4x16x128xf32>
    %454 = arith.addf %435, %453 : vector<4x16x128xf32>
    %cst_172 = arith.constant 0.000000e+00 : f32
    %455 = vector.shape_cast %8 : vector<1x16x128xi1> to vector<1x16x128xi1>
    %456 = vector.broadcast %455 : vector<1x16x128xi1> to vector<4x16x128xi1>
    %457 = vector.broadcast %cst_172 : f32 to vector<4x16x128xf32>
    %458 = arith.select %456, %449, %457 : vector<4x16x128xi1>, vector<4x16x128xf32>
    %459 = arith.addf %454, %458 : vector<4x16x128xf32>
    %460 = vector.shape_cast %1 : vector<1x128xf32> to vector<1x1x128xf32>
    %461 = vector.broadcast %460 : vector<1x1x128xf32> to vector<4x16x128xf32>
    %462 = arith.addf %459, %461 : vector<4x16x128xf32>
    %cst_173 = arith.constant 0.000000e+00 : f32
    %cst_174 = arith.constant 6.000000e+00 : f32
    %463 = vector.broadcast %cst_173 : f32 to vector<4x16x128xf32>
    %464 = arith.maximumf %463, %462 : vector<4x16x128xf32>
    %465 = vector.broadcast %cst_174 : f32 to vector<4x16x128xf32>
    %466 = arith.minimumf %465, %464 : vector<4x16x128xf32>
    %467 = vector.shape_cast %466 : vector<4x16x128xf32> to vector<64x128xf32>
    %468 = arith.truncf %467 : vector<64x128xf32> to vector<64x128xbf16>
    %c0_175 = arith.constant 0 : index
    %c0_176 = arith.constant 0 : index
    %469 = vector.load %arg6[%c0_175, %c0_176] : memref<128x128xbf16, #tpu.memory_space<vmem>>, vector<128x128xbf16>
    %cst_177 = arith.constant dense<0.000000e+00> : vector<64x128xf32>
    %470 = tpu.matmul %468, %469, %cst_177 {dimension_numbers = #tpu.dot_dimension_numbers<[1], [0], [0], [1], [0, 0, 1, 1], [], []>} : vector<64x128xbf16>, vector<128x128xbf16>, vector<64x128xf32> -> vector<64x128xf32>
    %471 = arith.addf %380, %470 : vector<64x128xf32>
    %472 = vector.broadcast %2 : vector<1x128xf32> to vector<64x128xf32>
    %473 = arith.addf %471, %472 : vector<64x128xf32>
    %474 = vector.shape_cast %473 : vector<64x128xf32> to vector<4x16x128xf32>
    %c0_178 = arith.constant 0 : index
    %c12_179 = arith.constant 12 : index
    %c0_180 = arith.constant 0 : index
    %c0_181 = arith.constant 0 : index
    %475 = vector.load %arg1[%c0_178, %c12_179, %c0_180, %c0_181] : memref<1x16x16x128xf32, #tpu.memory_space<vmem>>, vector<1x4x16x128xf32>
    %476 = vector.shape_cast %475 : vector<1x4x16x128xf32> to vector<4x16x128xf32>
    %477 = arith.addf %474, %476 : vector<4x16x128xf32>
    %c0_182 = arith.constant 0 : index
    %c12_183 = arith.constant 12 : index
    %c0_184 = arith.constant 0 : index
    %c0_185 = arith.constant 0 : index
    %478 = vector.load %arg8[%c0_182, %c12_183, %c0_184, %c0_185] : memref<1x16x16x128xf32, #tpu.memory_space<vmem>>, vector<1x4x16x128xf32>
    %479 = vector.shape_cast %478 : vector<1x4x16x128xf32> to vector<4x16x128xf32>
    %480 = vector.shape_cast %477 : vector<4x16x128xf32> to vector<1x4x16x128xf32>
    tpu.vector_store %arg8[%c0_182, %c12_183, %c0_184, %c0_185], %480 {strides = array<i32>} : memref<1x16x16x128xf32, #tpu.memory_space<vmem>>, vector<1x4x16x128xf32>,
    return
  }
  func.func @transform_0(%arg0: i32) -> (i32, i32, i32, i32) {
    %c0_i32 = arith.constant 0 : i32
    %c0_i32_0 = arith.constant 0 : i32
    %c0_i32_1 = arith.constant 0 : i32
    %c0_i32_2 = arith.constant 0 : i32
    return %arg0, %c0_i32, %c0_i32_0, %c0_i32_1 : i32, i32, i32, i32
  }
  func.func @transform_1(%arg0: i32) -> (i32, i32) {
    %c0_i32 = arith.constant 0 : i32
    %c0_i32_0 = arith.constant 0 : i32
    %c0_i32_1 = arith.constant 0 : i32
    return %c0_i32, %c0_i32_0 : i32, i32
  }
  func.func @transform_2(%arg0: i32) -> (i32, i32) {
    %c0_i32 = arith.constant 0 : i32
    %c0_i32_0 = arith.constant 0 : i32
    %c0_i32_1 = arith.constant 0 : i32
    return %c0_i32, %c0_i32_0 : i32, i32
  }
  func.func @transform_3(%arg0: i32) -> (i32, i32, i32) {
    %c0_i32 = arith.constant 0 : i32
    %c0_i32_0 = arith.constant 0 : i32
    %c0_i32_1 = arith.constant 0 : i32
    %c0_i32_2 = arith.constant 0 : i32
    return %c0_i32, %c0_i32_0, %c0_i32_1 : i32, i32, i32
  }
  func.func @transform_4(%arg0: i32) -> (i32, i32) {
    %c0_i32 = arith.constant 0 : i32
    %c0_i32_0 = arith.constant 0 : i32
    %c0_i32_1 = arith.constant 0 : i32
    return %c0_i32, %c0_i32_0 : i32, i32
  }
  func.func @transform_5(%arg0: i32) -> (i32, i32) {
    %c0_i32 = arith.constant 0 : i32
    %c0_i32_0 = arith.constant 0 : i32
    %c0_i32_1 = arith.constant 0 : i32
    return %c0_i32, %c0_i32_0 : i32, i32
  }
  func.func @transform_6(%arg0: i32) -> (i32, i32) {
    %c0_i32 = arith.constant 0 : i32
    %c0_i32_0 = arith.constant 0 : i32
    %c0_i32_1 = arith.constant 0 : i32
    return %c0_i32, %c0_i32_0 : i32, i32
  }
  func.func @transform_7(%arg0: i32) -> (i32, i32, i32, i32) {
    %c0_i32 = arith.constant 0 : i32
    %c0_i32_0 = arith.constant 0 : i32
    %c0_i32_1 = arith.constant 0 : i32
    %c0_i32_2 = arith.constant 0 : i32
    return %arg0, %c0_i32, %c0_i32_0, %c0_i32_1 : i32, i32, i32, i32
  }
}

</mosaic_0001>

<bundles_post_ra>
// kernel: tpu_custom_call.1
= control target key start
LH: loop header
LB: loop body
LE: loop exit
PB: predicated region body
PF: predicated region fallthrough
CT: control target
= control target key end

     0   :  { %12 = vsyncpa [#allocation4], 0  ;;  %s5908_s0 = inlined_call_operand.hbm [shape: f32[2,16,16,128], index: 0, kind: input, shape index: {}]   ;;  %s5909_s1 = inlined_call_operand.hbm [shape: bf16[128,128], index: 1, kind: input, shape index: {}]   ;;  %s5910_s2 = inlined_call_operand.vmem [shape: f32[1,128], index: 2, kind: input, shape index: {}]   ;;  %s5911_s3 = inlined_call_operand.hbm [shape: f32[3,3,128], index: 3, kind: input, shape index: {}]   ;;  %s5912_s4 = inlined_call_operand.vmem [shape: f32[1,128], index: 4, kind: input, shape index: {}]   ;;  %s5913_s5 = inlined_call_operand.hbm [shape: bf16[128,128], index: 5, kind: input, shape index: {}]   ;;  %s5914_s6 = inlined_call_operand.vmem [shape: f32[1,128], index: 6, kind: input, shape index: {}]   ;;  %s5915_s7 = inlined_call_operand.hbm [shape: f32[2,16,16,128], index: 7, kind: output, shape index: {}]  }
   0x1   :  { %14 = vsyncpa [#allocation4 + $0x1], 0 }
   0x2   :  { %15 = vsyncpa [#allocation7], 0 }
   0x3   :  { %16 = vsyncpa [#allocation10], 0 }
   0x4   :  { %17 = vsyncpa [#allocation5], 0 }
   0x5   :  { %19 = vsyncpa [#allocation5 + $0x1], 0  ;;  %s4012_s24 = smov 0   ;;  %s4014_s25 = smov 0  }
   0x6   :  { %s4016_s26 = smov 0   ;;  %s4018_s27 = smov 0  }
   0x7 LB: > { %s4033_s28 = sadd.s32 4294967295, %s3958_s27   ;;  %s3171_s29 = sadd.s32 4294967294, %s3958_s27   ;;  %s3958_s27 = sphi %s4018_s27, %s6254_s27   ;;  %s3954_s26 = sphi %s4016_s26, %s6253_s26   ;;  %s3950_s25 = sphi %s4014_s25, %s6252_s25   ;;  %s3946_s24 = sphi %s4012_s24, %s6251_s24  }
   0x8   : > { %p45_p0 = scmp.ne.s32.totalorder %s3950_s25, %s3946_s24  ;;  %p5916_p1 = scmp.eq.s32.totalorder %s4033_s28, 0 }
   0x9   : > { %p201_p3 = scmp.eq.s32.totalorder %s3171_s29, 1  ;;  %p3172_p5 = scmp.ge.s32.totalorder %s3958_s27, 1 }
   0xa   : > { %p4042_p4 = por %p5916_p1, %p45_p0  ;;  %p208_p7 = scmp.lt.s32.totalorder %s3958_s27, 3 }
   0xb   : > { %p4047_p6 = por %p201_p3, %p45_p0  ;;  %s3960_s10 = smov [#allocation6]  }
   0xc   : > { %s6009_s30 = scalar_select %p4042_p4, 1, 0 }
   0xd   : > { %s6010_s8 = scalar_select %p4047_p6, 1, 0 }
   0xe   : > { %p4052_p8 = pnand %p3172_p5, %p208_p7  ;;  %s220_s11 = sshll.u32 %s3960_s10, 4  ;;  %s4056_s11 = int_to_ptr.vmem [resolvable:$true] %s220_s11 }
   0xf   : > { %6011 = sst [smem:[#allocation16_spill]] %s6010_s8  ;;  %s3961_s13 = smov [#allocation8]  }
  0x10   : > { %s6012_s9 = scalar_select %p4052_p8, 1, 0 }
  0x11   : > { %p3636_p9 = pneg %p4052_p8  ;;  %s236_s14 = sshll.u32 %s3961_s13, 4  ;;  %s4067_s14 = int_to_ptr.vmem [resolvable:$true] %s236_s14 }
  0x12   : > { %s3962_s15 = smov [#allocation9]   ;;  %s3770_s19 = scalar_lea.hbm %s5909_s1, 1024 }
  0x13   : > { %p4063_p11 = pnand %p3636_p9, %p5916_p1  ;;  %s4069_s16 = sshll.u32 %s3962_s15, 4  ;;  %s253_s16 = int_to_ptr.vmem [resolvable:$true] %s4069_s16 }
  0x14   : > { %p3771_p12 = scmp.ne.s32.totalorder %s5909_s1, %s3770_s19  ;;  %p3777_p5 = scmp.lt.u32.totalorder %s3770_s19, %s5909_s1 }
  0x15   : > { %p4079_p13 = pneg %p4063_p11 }
  0x17   : > { %p3773_p0 = pnand %p4079_p13, %p3771_p12 }
  0x19   : > { %p3774_p3 = pneg %p3773_p0 }
  0x1b   : > { %p3779_p7 = pnand %p3777_p5, %p3774_p3 }
  0x1d   : > { %3782 = shalt.err (!%p3779_p7)
}
  0x1e   : > { %s3783_s10 = scalar_lea.vmem %s4056_s11, 1024  ;;  %p3791_p2 = scmp.lt.s32.totalorder %s4056_s11, %s4056_s11 }
  0x1f   : > { %p3784_p9 = scmp.ne.s32.totalorder %s4056_s11, %s3783_s10  ;;  %p3792_p6 = scmp.lt.s32.totalorder %s3783_s10, %s3783_s10 }
  0x21   : > { %p3786_p10 = pnand %p3784_p9, %p4079_p13  ;;  %p3793_p12 = por %p3792_p6, %p3791_p2 }
  0x23   : > { %p3787_p1 = pneg %p3786_p10 }
  0x25   : > { %p3794_p0 = pnand %p3793_p12, %p3787_p1 }
  0x27   : > { %3797 = shalt.err (!%p3794_p0)
}
  0x28   : > { %s3963_s13 = smov 64   ;;  %s3964_s15 = smov 4  }
  0x29   : > { %3639 = dma.hbm_to_vmem [thread:$0]  (!%p4063_p11), %s5909_s1, 1024, %s4056_s11, [#allocation7], %s3963_s13, %s3963_s13, %s3964_s15  }
  0x2a   : > { %s3798_s21 = scalar_lea.hbm %s5911_s3, 192 }
  0x2b   : > { %p3799_p1 = scmp.ne.s32.totalorder %s5911_s3, %s3798_s21  ;;  %p3805_p10 = scmp.lt.u32.totalorder %s3798_s21, %s5911_s3 }
  0x2d   : > { %p3801_p2 = pnand %p3799_p1, %p4079_p13 }
  0x2f   : > { %p3802_p6 = pneg %p3801_p2 }
  0x31   : > { %p3807_p3 = pnand %p3805_p10, %p3802_p6 }
  0x33   : > { %3810 = shalt.err (!%p3807_p3)
}
  0x34   : > { %s3811_s11 = scalar_lea.vmem %s4067_s14, 192  ;;  %p3819_p12 = scmp.lt.s32.totalorder %s4067_s14, %s4067_s14 }
  0x35   : > { %p3812_p5 = scmp.ne.s32.totalorder %s4067_s14, %s3811_s11  ;;  %p3820_p0 = scmp.lt.s32.totalorder %s3811_s11, %s3811_s11 }
  0x37   : > { %p3814_p7 = pnand %p3812_p5, %p4079_p13  ;;  %p3821_p1 = por %p3820_p0, %p3819_p12 }
  0x39   : > { %p3815_p9 = pneg %p3814_p7 }
  0x3b   : > { %p3822_p2 = pnand %p3821_p1, %p3815_p9 }
  0x3d   : > { %3825 = shalt.err (!%p3822_p2)
}
  0x3e   : > { %3642 = dma.hbm_to_vmem [thread:$0]  (!%p4063_p11), %s5911_s3, 192, %s4067_s14, [#allocation7], %s3963_s13, %s3963_s13, %s3964_s15  }
  0x3f   : > { %s3826_s20 = scalar_lea.hbm %s5913_s5, 1024 }
  0x40   : > { %p3827_p6 = scmp.ne.s32.totalorder %s5913_s5, %s3826_s20  ;;  %p3833_p5 = scmp.lt.u32.totalorder %s3826_s20, %s5913_s5 }
  0x42   : > { %p3829_p10 = pnand %p3827_p6, %p4079_p13 }
  0x44   : > { %p3830_p3 = pneg %p3829_p10 }
  0x46   : > { %p3835_p7 = pnand %p3833_p5, %p3830_p3 }
  0x48   : > { %3838 = shalt.err (!%p3835_p7)
}
  0x49   : > { %s3839_s11 = scalar_lea.vmem %s253_s16, 1024  ;;  %p3847_p1 = scmp.lt.s32.totalorder %s253_s16, %s253_s16 }
  0x4a   : > { %p3840_p9 = scmp.ne.s32.totalorder %s253_s16, %s3839_s11  ;;  %p3848_p2 = scmp.lt.s32.totalorder %s3839_s11, %s3839_s11 }
  0x4c   : > { %p3842_p12 = pnand %p3840_p9, %p4079_p13  ;;  %p3849_p4 = por %p3848_p2, %p3847_p1 }
  0x4e   : > { %p3843_p0 = pneg %p3842_p12 }
  0x50   : > { %p3850_p8 = pnand %p3849_p4, %p3843_p0 }
  0x52   : > { %3853 = shalt.err (!%p3850_p8)
}
  0x53   : > { %3645 = dma.hbm_to_vmem [thread:$0]  (!%p4063_p11), %s5913_s5, 1024, %s253_s16, [#allocation10], %s3963_s13, %s3963_s13, %s3964_s15  }
  0x54   : > { %s4152_s22 = sadd.s32 1, %s3958_s27   ;;  %s32_s17 = sadd.s32 1, %s3954_s26 }
  0x55   : > { %s29_s12 = ssub.s32 %s3958_s27, %s4152_s22  ;;  %p39_p8 = scmp.ne.s32.totalorder %s3954_s26, %s3950_s25 }
  0x56   : > { %p30_p4 = scmp.eq.s32.totalorder %s29_s12, 0  ;;  %p40_p13 = scmp.eq.s32.totalorder %s3958_s27, 0 }
  0x57   : > { %p3657_p6 = scmp.lt.s32.totalorder %s3958_s27, 2  ;;  %p6015_p3 = scmp.eq.s32.totalorder %s4033_s28, 1 }
  0x58   : > { %s4162_s18 = scalar_select %p30_p4, %s3954_s26, %s32_s17  }
  0x59   : > { %p41_p10 = por %p40_p13, %p39_p8  ;;  %p4166_p5 = por %p6015_p3, %p39_p8 }
  0x5a   : > { %s269_s20 = sand.u32 1, %s3954_s26   ;;  %s3330_s21 = sshll.u32 %s3958_s27, 12 }
  0x5b   : > { %s3177_s16 = sshll.u32 %s269_s20, 8  ;;  %s4175_s23 = scalar_lea.hbm %s5908_s0, %s3330_s21 }
  0x5c   : > { %s273_s29 = scalar_lea.vmem [#allocation3], %s3177_s16  ;;  %p4177_p11 = pnand %p3657_p6, %p41_p10 }
  0x5d   : > { %s280_s10 = sshll.u32 %s273_s29, 4  ;;  %s4183_s14 = scalar_lea.sflag [#allocation4], %s269_s20  ;;  %s4181_s10 = int_to_ptr.vmem [resolvable:$true] %s280_s10 }
  0x5e   : > { %s3854_s8 = scalar_lea.hbm %s4175_s23, 4096  ;;  %p3856_p9 = pneg %p4177_p11 }
  0x5f   : > { %p3855_p7 = scmp.ne.s32.totalorder %s4175_s23, %s3854_s8  ;;  %s3859_s21 = scalar_lea.hbm %s5908_s0, 8192 }
  0x60   : > { %p3860_p1 = scmp.lt.u32.totalorder %s4175_s23, %s5908_s0  ;;  %p3861_p2 = scmp.lt.u32.totalorder %s3859_s21, %s3854_s8 }
  0x61   : > { %p3857_p12 = pnand %p3856_p9, %p3855_p7  ;;  %p3863_p8 = scmp.lt.u32.totalorder %s3854_s8, %s4175_s23 }
  0x62   : > { %p3862_p4 = por %p3861_p2, %p3860_p1 }
  0x63   : > { %p3858_p0 = pneg %p3857_p12 }
  0x64   : > { %p3864_p13 = por %p3863_p8, %p3862_p4 }
  0x66   : > { %p3865_p6 = pnand %p3864_p13, %p3858_p0 }
  0x68   : > { %3868 = shalt.err (!%p3865_p6)
}
  0x69   : > { %s3869_s20 = scalar_lea.vmem %s4181_s10, 4096  ;;  %s3965_s15 = smov [#allocation3]  }
  0x6a   : > { %p3870_p10 = scmp.ne.s32.totalorder %s4181_s10, %s3869_s20  ;;  %s3874_s29 = sshll.u32 %s3965_s15, 4  ;;  %s3875_s29 = int_to_ptr.vmem [resolvable:$false] %s3874_s29 }
  0x6b   : > { %s3876_s12 = scalar_lea.vmem %s3875_s29, 8192  ;;  %p3877_p12 = scmp.lt.s32.totalorder %s4181_s10, %s3875_s29 }
  0x6c   : > { %p3872_p3 = pnand %p3870_p10, %p3856_p9  ;;  %p3878_p1 = scmp.lt.s32.totalorder %s3876_s12, %s3869_s20 }
  0x6e   : > { %p3873_p7 = pneg %p3872_p3  ;;  %p3879_p2 = por %p3878_p1, %p3877_p12 }
  0x70   : > { %p3880_p4 = pnand %p3879_p2, %p3873_p7 }
  0x72   : > { %3883 = shalt.err (!%p3880_p4)
}
  0x73   : > { %s3966_s8 = smov 128   ;;  %s3967_s17 = smov 8  }
  0x74   : > { %3649 = dma.hbm_to_vmem [thread:$0]  (!%p4177_p11), %s4175_s23, 4096, %s4181_s10, %s4183_s14, %s3966_s8, %s3966_s8, %s3967_s17  }
  0x75   : > { %p6018_p9 = scmp.ne.s32.totalorder %s6012_s9, 0 }
  0x77   : > { %292 = sbr.rel (%p6018_p9) target bundleno = 880 (0x370), region = 48 }
  0x7e   : > { %s4214_s21 = sand.u32 1, %s3950_s25   ;;  %p6019_p0 = scmp.ne.s32.totalorder %s6009_s30, 0 }
  0x7f   : > { %s3181_s16 = sshll.u32 %s4214_s21, 8  ;;  %s295_s13 = scalar_lea.sflag [#allocation4], %s4214_s21 }
  0x80   : > { %s4220_s20 = scalar_lea.vmem [#allocation3], %s3181_s16 }
  0x81   : > { %3929 = dma.done.wait (%p6019_p0), %s295_s13, 4096  }
  0x82   : > { %3931 = vsyncadd (%p6019_p0), %s295_s13, 4294963200  ;;  %p6020_p11 = scmp.eq.s32.totalorder %s4033_s28, 0 }
  0x84   : > { %3933 = dma.done.wait (%p6020_p11), [#allocation7], 1216   ;;  %p6021_p8 = pmov %p6020_p11 }
  0x86   : > { %3935 = vsyncadd (%p6021_p8), [#allocation7], 4294966080  ;;  %p6022_p13 = pmov %p6021_p8 }
  0x87   : > { %p6023_p6 = pmov %p6021_p8 }
  0x88   : > { %3937 = dma.done.wait (%p6022_p13), [#allocation10], 1024  }
  0x89   : > { %3939 = vsyncadd (%p6023_p6), [#allocation10], 4294966272  ;;  %v3704_v0 = vld [vmem:[#allocation6] sm:$0xff]   ;;  %v3706_v2 = vld [vmem:[#allocation6 + $0x8] sm:$0xff]   ;;  %s5767_s12 = scalar_lea.vmem [#allocation11], %s3181_s16  ;;  %s3331_s8 = sshll.u32 %s4033_s28, 12 }
  0x8a   : > { %v3705_v1 = vld [vmem:[#allocation6] sm:$0xff]   ;;  %3428 = vmatprep.subr.bf16.mxu0 %v3704_v0  ;;  %v3707_v3 = vld [vmem:[#allocation6 + $0x8] sm:$0xff]   ;;  %v3708_v4 = vld [vmem:[#allocation6 + $0x10] sm:$0xff]   ;;  %s3069_s17 = sshll.u32 %s5767_s12, 4  ;;  %s5859_s30 = scalar_lea.hbm %s5915_s7, %s3331_s8  ;;  %s5861_s17 = int_to_ptr.vmem [resolvable:$true] %s3069_s17 }
  0x8b   : > { %3452 = vmatprep.subr.bf16.mxu1 %v3705_v1  ;;  %3429 = vmatpush3.bf16.msra.mxu0 %v3704_v0  ;;  %v3709_v5 = vld [vmem:[#allocation6 + $0x10] sm:$0xff]   ;;  %v3710_v6 = vld [vmem:[#allocation6 + $0x18] sm:$0xff]   ;;  %v3712_v8 = vld [vmem:[#allocation6 + $0x20] sm:$0xff]   ;;  %s3056_s28 = scalar_lea.sflag [#allocation5], %s4214_s21  ;;  %s3969_s9 = smov [#allocation11]  }
  0x8c   : > { %3453 = vmatpush3.bf16.msra.mxu1 %v3705_v1  ;;  %3430 = vmatprep.subr.bf16.mxu0 %v3706_v2  ;;  %v3711_v7 = vld [vmem:[#allocation6 + $0x18] sm:$0xff]   ;;  %v3713_v9 = vld [vmem:[#allocation6 + $0x20] sm:$0xff]   ;;  %v3714_v10 = vld [vmem:[#allocation6 + $0x28] sm:$0xff]   ;;  %s3888_s23 = sshll.u32 %s3969_s9, 4  ;;  %s3889_s23 = int_to_ptr.vmem [resolvable:$false] %s3888_s23 }
  0x8d   : > { %3454 = vmatprep.subr.bf16.mxu1 %v3707_v3  ;;  %v358_v11 = vld [vmem:[%s4220_s20] sm:$0xff]  ;;  %v359_v12 = vld [vmem:[%s4220_s20 + $0x8] sm:$0xff]  ;;  %v3716_v18 = vld [vmem:[#allocation6 + $0x30] sm:$0xff]   ;;  %s3890_s10 = scalar_lea.vmem %s3889_s23, 8192  ;;  %p3891_p12 = scmp.lt.s32.totalorder %s5861_s17, %s3889_s23 }
  0x8e   : > { %v3195_v13 = vld [vmem:[%s4220_s20 + $0x40] sm:$0xff]  ;;  %v3715_v14 = vld [vmem:[#allocation6 + $0x28] sm:$0xff]   ;;  %v366_v15 = vpack.c.bf16 %v359_v12, %v358_v11  ;;  %v3717_v19 = vld [vmem:[#allocation6 + $0x30] sm:$0xff]  }
  0x8f   : > { %3431 = vmatpush3.bf16.msra.mxu0 %v3706_v2  ;;  %v3196_v16 = vld [vmem:[%s4220_s20 + $0x48] sm:$0xff]  ;;  %v3718_v20 = vld [vmem:[#allocation6 + $0x38] sm:$0xff]   ;;  %v360_v22 = vld [vmem:[%s4220_s20 + $0x10] sm:$0xff] }
  0x90   : > { %3455 = vmatpush3.bf16.msra.mxu1 %v3707_v3  ;;  %3432 = vmatprep.subr.bf16.mxu0 %v3708_v4  ;;  %v539_v17 = vpack.c.bf16 %v3196_v16, %v3195_v13  ;;  %v3719_v21 = vld [vmem:[#allocation6 + $0x38] sm:$0xff]   ;;  %v3197_v24 = vld [vmem:[%s4220_s20 + $0x50] sm:$0xff]  ;;  %v3720_v26 = vld [vmem:[#allocation6] sm:$0xff]  }
  0x91   : > { %3456 = vmatprep.subr.bf16.mxu1 %v3709_v5  ;;  %3444 = vmatprep.mubr.bf16.mxu0 %v366_v15  ;;  %v361_v23 = vld [vmem:[%s4220_s20 + $0x18] sm:$0xff]  ;;  %v3721_v27 = vld [vmem:[#allocation6] sm:$0xff]   ;;  %v363_v29 = vld [vmem:[%s4220_s20 + $0x28] sm:$0xff] }
  0x92   : > { %3468 = vmatprep.mubr.bf16.mxu1 %v539_v17  ;;  %v3198_v25 = vld [vmem:[%s4220_s20 + $0x58] sm:$0xff]  ;;  %v362_v28 = vld [vmem:[%s4220_s20 + $0x20] sm:$0xff]  ;;  %v367_v30 = vpack.c.bf16 %v361_v23, %v360_v22  ;;  %v3722_v31 = vld [vmem:[#allocation6 + $0x8] sm:$0xff]  }
  0x93   : > { %3433 = vmatpush3.bf16.msra.mxu0 %v3708_v4  ;;  %v3199_v32 = vld [vmem:[%s4220_s20 + $0x60] sm:$0xff]  ;;  %v540_v33 = vpack.c.bf16 %v3198_v25, %v3197_v24  ;;  %v3200_v34 = vld [vmem:[%s4220_s20 + $0x68] sm:$0xff]  ;;  %v368_v36 = vpack.c.bf16 %v363_v29, %v362_v28  ;;  %v364_v37 = vld [vmem:[%s4220_s20 + $0x30] sm:$0xff] }
  0x94   : > { %3457 = vmatpush3.bf16.msra.mxu1 %v3709_v5  ;;  %3434 = vmatprep.subr.bf16.mxu0 %v3710_v6  ;;  %v3723_v35 = vld [vmem:[#allocation6 + $0x8] sm:$0xff]   ;;  %v365_v38 = vld [vmem:[%s4220_s20 + $0x38] sm:$0xff]  ;;  %v541_v39 = vpack.c.bf16 %v3200_v34, %v3199_v32  ;;  %v3201_v40 = vld [vmem:[%s4220_s20 + $0x70] sm:$0xff] }
  0x95   : > { %3458 = vmatprep.subr.bf16.mxu1 %v3711_v7  ;;  %v3202_v41 = vld [vmem:[%s4220_s20 + $0x78] sm:$0xff]  ;;  %v3724_v42 = vld [vmem:[#allocation6 + $0x10] sm:$0xff]   ;;  %v369_v44 = vpack.c.bf16 %v365_v38, %v364_v37  ;;  %v3211_v45 = vld [vmem:[%s4220_s20 + $0x80] sm:$0xff] }
  0x96   : > { %v3725_v43 = vld [vmem:[#allocation6 + $0x10] sm:$0xff]   ;;  %v3212_v46 = vld [vmem:[%s4220_s20 + $0x88] sm:$0xff]  ;;  %v542_v47 = vpack.c.bf16 %v3202_v41, %v3201_v40  ;;  %v3227_v48 = vld [vmem:[%s4220_s20 + $0xc0] sm:$0xff] }
  0x97   : > { %3435 = vmatpush3.bf16.msra.mxu0 %v3710_v6  ;;  %v3228_v49 = vld [vmem:[%s4220_s20 + $0xc8] sm:$0xff]  ;;  %v3726_v50 = vld [vmem:[#allocation6 + $0x18] sm:$0xff]   ;;  %v706_v52 = vpack.c.bf16 %v3212_v46, %v3211_v45  ;;  %v3728_v53 = vld [vmem:[#allocation6 + $0x20] sm:$0xff]  }
  0x98   : > { %3459 = vmatpush3.bf16.msra.mxu1 %v3711_v7  ;;  %3436 = vmatprep.subr.bf16.mxu0 %v3712_v8  ;;  %v3727_v51 = vld [vmem:[#allocation6 + $0x18] sm:$0xff]   ;;  %v873_v54 = vpack.c.bf16 %v3228_v49, %v3227_v48  ;;  %v3729_v55 = vld [vmem:[#allocation6 + $0x20] sm:$0xff]   ;;  %v3730_v56 = vld [vmem:[#allocation6 + $0x28] sm:$0xff]  }
  0x99   : > { %3460 = vmatprep.subr.bf16.mxu1 %v3713_v9  ;;  %v3731_v57 = vld [vmem:[#allocation6 + $0x28] sm:$0xff]   ;;  %v3732_v58 = vld [vmem:[#allocation6 + $0x30] sm:$0xff]   ;;  %v3734_v60 = vld [vmem:[#allocation6 + $0x38] sm:$0xff]  }
  0x9a   : > { %v3733_v59 = vld [vmem:[#allocation6 + $0x30] sm:$0xff]   ;;  %v3735_v61 = vld [vmem:[#allocation6 + $0x38] sm:$0xff]   ;;  %v3215_v2 = vld [vmem:[%s4220_s20 + $0xa0] sm:$0xff] }
  0x9b   : > { %3437 = vmatpush3.bf16.msra.mxu0 %v3712_v8  ;;  %v3213_v62 = vld [vmem:[%s4220_s20 + $0x90] sm:$0xff]  ;;  %v3214_v63 = vld [vmem:[%s4220_s20 + $0x98] sm:$0xff]  ;;  %v3216_v3 = vld [vmem:[%s4220_s20 + $0xa8] sm:$0xff] }
  0x9c   : > { %3461 = vmatpush3.bf16.msra.mxu1 %v3713_v9  ;;  %3438 = vmatprep.subr.bf16.mxu0 %v3714_v10  ;;  %v3229_v0 = vld [vmem:[%s4220_s20 + $0xd0] sm:$0xff]  ;;  %v3230_v1 = vld [vmem:[%s4220_s20 + $0xd8] sm:$0xff]  ;;  %v3231_v4 = vld [vmem:[%s4220_s20 + $0xe0] sm:$0xff]  ;;  %v707_v6 = vpack.c.bf16 %v3214_v63, %v3213_v62  ;;  %v708_v8 = vpack.c.bf16 %v3216_v3, %v3215_v2 }
  0x9d   : > { %3462 = vmatprep.subr.bf16.mxu1 %v3715_v14  ;;  %v3232_v5 = vld [vmem:[%s4220_s20 + $0xe8] sm:$0xff]  ;;  %v874_v7 = vpack.c.bf16 %v3230_v1, %v3229_v0  ;;  %v3218_v11 = vld [vmem:[%s4220_s20 + $0xb8] sm:$0xff]  ;;  %v3233_v12 = vld [vmem:[%s4220_s20 + $0xf0] sm:$0xff] }
  0x9e   : > { %v875_v9 = vpack.c.bf16 %v3232_v5, %v3231_v4  ;;  %v3234_v13 = vld [vmem:[%s4220_s20 + $0xf8] sm:$0xff]  ;;  %v3736_v16 = vld [vmem:[#allocation9] sm:$0xff]   ;;  %v3742_v22 = vld [vmem:[#allocation9 + $0x18] sm:$0xff]  }
  0x9f   : > { %3439 = vmatpush3.bf16.msra.mxu0 %v3714_v10  ;;  %v3217_v10 = vld [vmem:[%s4220_s20 + $0xb0] sm:$0xff]  ;;  %v876_v15 = vpack.c.bf16 %v3234_v13, %v3233_v12  ;;  %v3743_v23 = vld [vmem:[#allocation9 + $0x18] sm:$0xff]   ;;  %v3748_v28 = vld [vmem:[#allocation9 + $0x30] sm:$0xff]  }
  0xa0   : > { %3463 = vmatpush3.bf16.msra.mxu1 %v3715_v14  ;;  %3440 = vmatprep.subr.bf16.mxu0 %v3716_v18  ;;  %v709_v14 = vpack.c.bf16 %v3218_v11, %v3217_v10  ;;  %v3737_v17 = vld [vmem:[#allocation9] sm:$0xff]   ;;  %v3749_v29 = vld [vmem:[#allocation9 + $0x30] sm:$0xff]   ;;  %v346_v46 = vld [vmem:[#allocation8 + $0x4] sm:$0x7] }
  0xa1   : > { %3464 = vmatprep.subr.bf16.mxu1 %v3717_v19  ;;  %v3744_v24 = vld [vmem:[#allocation9 + $0x20] sm:$0xff]   ;;  %v345_v40 = vld [vmem:[#allocation8] sm:$0x7]  ;;  %v4293_v49 = vld [vmem:[#allocation8 + $0x8] sm:$0x7] }
  0xa2   : > { %v3745_v25 = vld [vmem:[#allocation9 + $0x20] sm:$0xff]  }
  0xa3   : > { %3441 = vmatpush3.bf16.msra.mxu0 %v3716_v18  ;;  %v3738_v18 = vld [vmem:[#allocation9 + $0x8] sm:$0xff]   ;;  %v4266_v32 = vld [vmem:[#allocation9] sm:$0xff]  }
  0xa4   : > { %3465 = vmatpush3.bf16.msra.mxu1 %v3717_v19  ;;  %3442 = vmatprep.subr.bf16.mxu0 %v3718_v20  ;;  %v3739_v19 = vld [vmem:[#allocation9 + $0x8] sm:$0xff]   ;;  %6024 = vst [vmem:[#allocation17_spill] sm:$0xff] %v4266_v32  ;;  %v3753_v13 = vld [vmem:[#allocation9] sm:$0xff]  }
  0xa5   : > { %3466 = vmatprep.subr.bf16.mxu1 %v3719_v21 }
  0xa7   : > { %3443 = vmatpush3.bf16.msra.mxu0 %v3718_v20  ;;  %v3740_v20 = vld [vmem:[#allocation9 + $0x10] sm:$0xff]  }
  0xa8   : > { %3467 = vmatpush3.bf16.msra.mxu1 %v3719_v21  ;;  %3476 = vmatprep.subr.bf16.mxu0 %v3720_v26  ;;  %v3741_v21 = vld [vmem:[#allocation9 + $0x10] sm:$0xff]  }
  0xa9   : > { %3500 = vmatprep.subr.bf16.mxu1 %v3721_v27 }
  0xaa   : > { %3445 = vmatmul.mubr.bf16.vlgmr.msra.gmra.mrb[0].mxu0 %v367_v30  ;;  %v3750_v30 = vld [vmem:[#allocation9 + $0x38] sm:$0xff]  }
  0xab   : > { %3469 = vmatmul.mubr.bf16.vlgmr.msra.gmra.mrb[0].mxu1 %v540_v33  ;;  %3477 = vmatpush3.bf16.msra.mxu0 %v3720_v26  ;;  %v3746_v26 = vld [vmem:[#allocation9 + $0x28] sm:$0xff]   ;;  %v348_v33 = vlaneseq }
  0xac   : > { %3501 = vmatpush3.bf16.msra.mxu1 %v3721_v27  ;;  %3478 = vmatprep.subr.bf16.mxu0 %v3722_v31  ;;  %v3747_v27 = vld [vmem:[#allocation9 + $0x28] sm:$0xff]  }
  0xad   : > { %3502 = vmatprep.subr.bf16.mxu1 %v3723_v35  ;;  %3448 = vmatprep.mubr.bf16.mxu0 %v368_v36  ;;  %v4269_v34 = vshrl.u32 %v348_v33, 7 }
  0xae   : > { %3472 = vmatprep.mubr.bf16.mxu1 %v541_v39 }
  0xaf   : > { %3479 = vmatpush3.bf16.msra.mxu0 %v3722_v31  ;;  %v3751_v31 = vld [vmem:[#allocation9 + $0x38] sm:$0xff]   ;;  %v1045_v38 = vsub.s32 1, %v4269_v34  ;;  %v4277_v39 = vsub.s32 0, %v4269_v34  ;;  %vm1071_vm0 = vcmp.lt.s32.totalorder %v4269_v34, 1  ;;  %vm1108_vm1 = vcmp.lt.s32.totalorder %v4269_v34, 7 }
  0xb0   : > { %3503 = vmatpush3.bf16.msra.mxu1 %v3723_v35  ;;  %3480 = vmatprep.subr.bf16.mxu0 %v3724_v42  ;;  %v3968_v35 = vmov 0   ;;  %vm351_vm2 = vcmp.ne.s32.totalorder %v4269_v34, 0 }
  0xb1   : > { %3504 = vmatprep.subr.bf16.mxu1 %v3725_v43  ;;  %v4271_v36 = vunpack.c.l.bf16 %v3968_v35  ;;  %v4273_v37 = vunpack.c.h.bf16 %v3968_v35  ;;  %v4291_v48 = vrot.slane %v345_v40, %v4277_v39 }
  0xb2   : > { %3449 = vmatmul.mubr.bf16.gmra.mrb[4].mxu0 %v369_v44 }
  0xb3   : > { %3473 = vmatmul.mubr.bf16.gmra.mrb[4].mxu1 %v542_v47  ;;  %3481 = vmatpush3.bf16.msra.mxu0 %v3724_v42  ;;  %6025 = vst [vmem:[#allocation18_spill] sm:$0xff] %v4271_v36  ;;  %6026 = vst [vmem:[#allocation19_spill] sm:$0xff] %v4273_v37  ;;  %v1063_v41 = vrot.slane %v4271_v36, 7  ;;  %v1067_v42 = vrot.slane %v4273_v37, 7  ;;  %v1100_v44 = vrot.slane %v4271_v36, 1  ;;  %v1104_v45 = vrot.slane %v4273_v37, 1 }
  0xb4   : > { %3505 = vmatpush3.bf16.msra.mxu1 %v3725_v43  ;;  %3482 = vmatprep.subr.bf16.mxu0 %v3726_v50  ;;  %v4282_v43 = vsub.s32 2, %v4269_v34  ;;  %v4288_v47 = vrot.slane %v345_v40, %v1045_v38  ;;  %6027 = vst [vmem:[#allocation20_spill] sm:$0xff] %v4291_v48 }
  0xb5   : > { %3506 = vmatprep.subr.bf16.mxu1 %v3727_v51  ;;  %3492 = vmatprep.mubr.bf16.mxu0 %v706_v52 }
  0xb6   : > { %3516 = vmatprep.mubr.bf16.mxu1 %v873_v54  ;;  %v4305_v52 = vrot.slane %v345_v40, %v4282_v43  ;;  %v4313_v54 = vsel %vm1108_vm1, %v1100_v44, %v1104_v45  ;;  %v4327_v62 = vmul.f32 %v4288_v47, %v4271_v36  ;;  %v4331_v63 = vmul.f32 %v4288_v47, %v4273_v37 }
  0xb7   : > { %3483 = vmatpush3.bf16.msra.mxu0 %v3726_v50  ;;  %v4298_v50 = vld [vmem:[%s5910_s2] ss:$0 sm:$0xff]  ;;  %6031 = vst [vmem:[#allocation24_spill] sm:$0xff] %v4313_v54  ;;  %v4363_v40 = vrot.slane %v346_v46, %v4282_v43 }
  0xb8   : > { %3507 = vmatpush3.bf16.msra.mxu1 %v3727_v51  ;;  %3484 = vmatprep.subr.bf16.mxu0 %v3728_v53  ;;  %v4302_v51 = vsel %vm1071_vm0, %v1067_v42, %v1063_v41  ;;  %6029 = vst [vmem:[#allocation22_spill] sm:$0xff] %v4305_v52 }
  0xb9   : > { %3508 = vmatprep.subr.bf16.mxu1 %v3729_v55  ;;  %6028 = vst [vmem:[#allocation21_spill] sm:$0xff] %v4302_v51  ;;  %v4335_v0 = vmul.f32 %v4291_v48, %v4302_v51 }
  0xbb   : > { %3485 = vmatpush3.bf16.msra.mxu0 %v3728_v53  ;;  %v4309_v53 = vsel %vm1071_vm0, %v1063_v41, %v1067_v42 }
  0xbc   : > { %3509 = vmatpush3.bf16.msra.mxu1 %v3729_v55  ;;  %3486 = vmatprep.subr.bf16.mxu0 %v3730_v56  ;;  %6030 = vst [vmem:[#allocation23_spill] sm:$0xff] %v4309_v53  ;;  %v4341_v5 = vmul.f32 %v4291_v48, %v4309_v53 }
  0xbd   : > { %3510 = vmatprep.subr.bf16.mxu1 %v3731_v57 }
  0xbf   : > { %3487 = vmatpush3.bf16.msra.mxu0 %v3730_v56  ;;  %v4315_v56 = vrot.slane %v346_v46, %v1045_v38 }
  0xc0   : > { %3511 = vmatpush3.bf16.msra.mxu1 %v3731_v57  ;;  %3488 = vmatprep.subr.bf16.mxu0 %v3732_v58  ;;  %v4318_v57 = vrot.slane %v4293_v49, %v1045_v38 }
  0xc1   : > { %3512 = vmatprep.subr.bf16.mxu1 %v3733_v59 }
  0xc3   : > { %3489 = vmatpush3.bf16.msra.mxu0 %v3732_v58  ;;  %v4322_v58 = vsel %vm1108_vm1, %v1104_v45, %v1100_v44 }
  0xc4   : > { %3513 = vmatpush3.bf16.msra.mxu1 %v3733_v59  ;;  %3490 = vmatprep.subr.bf16.mxu0 %v3734_v60  ;;  %6032 = vst [vmem:[#allocation25_spill] sm:$0xff] %v4322_v58  ;;  %v4351_v12 = vmul.f32 %v4305_v52, %v4322_v58 }
  0xc5   : > { %3514 = vmatprep.subr.bf16.mxu1 %v3735_v61 }
  0xc7   : > { %3491 = vmatpush3.bf16.msra.mxu0 %v3734_v60 }
  0xc8   : > { %3515 = vmatpush3.bf16.msra.mxu1 %v3735_v61  ;;  %3524 = vmatprep.subr.bf16.mxu0 %v3736_v16 }
  0xc9   : > { %3548 = vmatprep.subr.bf16.mxu1 %v3737_v17 }
  0xca   : > { %3493 = vmatmul.mubr.bf16.vlgmr.msra.gmra.mrb[8].mxu0 %v707_v6  ;;  %v4345_v6 = vmul.f32 %v4305_v52, %v4313_v54 }
  0xcb   : > { %3517 = vmatmul.mubr.bf16.vlgmr.msra.gmra.mrb[8].mxu1 %v874_v7  ;;  %3496 = vmatprep.mubr.bf16.mxu0 %v708_v8 }
  0xcc   : > { %3520 = vmatprep.mubr.bf16.mxu1 %v875_v9  ;;  %3525 = vmatpush3.bf16.msra.mxu0 %v3736_v16 }
  0xcd   : > { %3549 = vmatpush3.bf16.msra.mxu1 %v3737_v17  ;;  %3526 = vmatprep.subr.bf16.mxu0 %v3738_v18 }
  0xce   : > { %3550 = vmatprep.subr.bf16.mxu1 %v3739_v19 }
  0xd0   : > { %3527 = vmatpush3.bf16.msra.mxu0 %v3738_v18 }
  0xd1   : > { %3551 = vmatpush3.bf16.msra.mxu1 %v3739_v19  ;;  %3528 = vmatprep.subr.bf16.mxu0 %v3740_v20 }
  0xd2   : > { %3497 = vmatmul.mubr.bf16.gmra.mrb[12].mxu0 %v709_v14  ;;  %3552 = vmatprep.subr.bf16.mxu1 %v3741_v21 }
  0xd3   : > { %3521 = vmatmul.mubr.bf16.gmra.mrb[12].mxu1 %v876_v15 }
  0xd4   : > { %3529 = vmatpush3.bf16.msra.mxu0 %v3740_v20 }
  0xd5   : > { %3553 = vmatpush3.bf16.msra.mxu1 %v3741_v21  ;;  %3530 = vmatprep.subr.bf16.mxu0 %v3742_v22 }
  0xd6   : > { %3554 = vmatprep.subr.bf16.mxu1 %v3743_v23 }
  0xd8   : > { %3531 = vmatpush3.bf16.msra.mxu0 %v3742_v22 }
  0xd9   : > { %3555 = vmatpush3.bf16.msra.mxu1 %v3743_v23  ;;  %3532 = vmatprep.subr.bf16.mxu0 %v3744_v24 }
  0xda   : > { %3556 = vmatprep.subr.bf16.mxu1 %v3745_v25 }
  0xdc   : > { %3533 = vmatpush3.bf16.msra.mxu0 %v3744_v24 }
  0xdd   : > { %3534 = vmatprep.subr.bf16.mxu0 %v3746_v26  ;;  %3557 = vmatpush3.bf16.msra.mxu1 %v3745_v25 }
  0xde   : > { %3558 = vmatprep.subr.bf16.mxu1 %v3747_v27 }
  0xe0   : > { %3535 = vmatpush3.bf16.msra.mxu0 %v3746_v26  ;;  %v4357_v26 = vadd.s32 8, %v4269_v34 }
  0xe1   : > { %3559 = vmatpush3.bf16.msra.mxu1 %v3747_v27  ;;  %3536 = vmatprep.subr.bf16.mxu0 %v3748_v28 }
  0xe2   : > { %3560 = vmatprep.subr.bf16.mxu1 %v3749_v29  ;;  %vm354_vm3 = vcmp.ne.s32.totalorder %v4357_v26, 15  ;;  %v5755_v26 = vld [vmem:[%s5914_s6] ss:$0 sm:$0xff] }
  0xe4   : > { %3537 = vmatpush3.bf16.msra.mxu0 %v3748_v28 }
  0xe5   : > { %3538 = vmatprep.subr.bf16.mxu0 %v3750_v30  ;;  %3561 = vmatpush3.bf16.msra.mxu1 %v3749_v29 }
  0xe6   : > { %3562 = vmatprep.subr.bf16.mxu1 %v3751_v31 }
  0xe8   : > { %3539 = vmatpush3.bf16.msra.mxu0 %v3750_v30  ;;  %v4360_v30 = vrot.slane %v346_v46, %v4277_v39  ;;  %v4373_v46 = vrot.slane %v4293_v49, %v4282_v43 }
  0xe9   : > { %3563 = vmatpush3.bf16.msra.mxu1 %v3751_v31  ;;  %3572 = vmatprep.subr.bf16.mxu0 %v4266_v32 }
  0xea   : > { %3596 = vmatprep.subr.bf16.mxu1 %v3753_v13 }
 0x17d   : > { %v3446_v55 = vpop.f32.mrb[0].mxu0 }
 0x17e   : > { %v483_v59 = vadd.f32 %v3446_v55, %v4298_v50  ;;  %v3470_v60 = vpop.f32.mrb[0].mxu1  ;;  %v474_v61 = vpop.f32.mrb[1].mxu0 }
 0x17f   : > { %v650_v1 = vadd.f32 %v3470_v60, %v4298_v50  ;;  %v475_v2 = vadd.f32 %v4298_v50, %v474_v61  ;;  %v641_v3 = vpop.f32.mrb[1].mxu1  ;;  %v3447_v4 = vpop.f32.mrb[2].mxu0 }
 0x180   : > { %v507_v7 = vmax.f32 %v483_v59, 0.0  ;;  %v642_v8 = vadd.f32 %v4298_v50, %v641_v3  ;;  %v486_v9 = vadd.f32 %v3447_v4, %v4298_v50  ;;  %v3471_v10 = vpop.f32.mrb[2].mxu1  ;;  %v477_v11 = vpop.f32.mrb[3].mxu0  ;;  %v4368_v59 = vrot.slane %v4293_v49, %v4277_v39 }
 0x181   : > { %v674_v14 = vmax.f32 %v650_v1, 0.0  ;;  %v505_v15 = vmax.f32 %v475_v2, 0.0  ;;  %v653_v16 = vadd.f32 %v3471_v10, %v4298_v50  ;;  %v478_v17 = vadd.f32 %v4298_v50, %v477_v11  ;;  %v644_v18 = vpop.f32.mrb[3].mxu1 }
 0x182   : > { %v515_v19 = vmin.f32 %v507_v7, 6.0  ;;  %v672_v20 = vmax.f32 %v642_v8, 0.0  ;;  %v508_v21 = vmax.f32 %v486_v9, 0.0  ;;  %v645_v22 = vadd.f32 %v4298_v50, %v644_v18 }
 0x183   : > { %v682_v23 = vmin.f32 %v674_v14, 6.0  ;;  %v675_v24 = vmax.f32 %v653_v16, 0.0  ;;  %v506_v25 = vmax.f32 %v478_v17, 0.0  ;;  %v513_v31 = vmin.f32 %v505_v15, 6.0 }
 0x184   : > { %v680_v27 = vmin.f32 %v672_v20, 6.0  ;;  %v516_v28 = vmin.f32 %v508_v21, 6.0  ;;  %v673_v29 = vmax.f32 %v645_v22, 0.0 }
 0x185   : > { %v683_v33 = vmin.f32 %v675_v24, 6.0  ;;  %v514_v35 = vmin.f32 %v506_v25, 6.0  ;;  %v3450_v38 = vpop.f32.mrb[4].mxu0 }
 0x186   : > { %v522_v41 = vpack.c.bf16 %v516_v28, %v515_v19  ;;  %v681_v42 = vmin.f32 %v673_v29, 6.0  ;;  %v499_v44 = vadd.f32 %v3450_v38, %v4298_v50  ;;  %v3474_v45 = vpop.f32.mrb[4].mxu1  ;;  %v490_v55 = vpop.f32.mrb[5].mxu0 }
 0x187   : > { %v689_v60 = vpack.c.bf16 %v683_v33, %v682_v23  ;;  %v521_v61 = vpack.c.bf16 %v514_v35, %v513_v31  ;;  %v666_v1 = vadd.f32 %v3474_v45, %v4298_v50  ;;  %v657_v2 = vpop.f32.mrb[5].mxu1  ;;  %v3451_v3 = vpop.f32.mrb[6].mxu0  ;;  %v491_v9 = vadd.f32 %v4298_v50, %v490_v55 }
 0x188   : > { %v4375_v4 = vunpack.c.l.bf16 %v522_v41  ;;  %v4377_v7 = vunpack.c.h.bf16 %v522_v41  ;;  %v688_v8 = vpack.c.bf16 %v681_v42, %v680_v27  ;;  %v3475_v10 = vpop.f32.mrb[6].mxu1  ;;  %v493_v39 = vpop.f32.mrb[7].mxu0  ;;  %v511_v18 = vmax.f32 %v499_v44, 0.0 }
 0x189   : > { %v4380_v11 = vunpack.c.l.bf16 %v689_v60  ;;  %v4382_v13 = vunpack.c.h.bf16 %v689_v60  ;;  %v4384_v14 = vunpack.c.l.bf16 %v521_v61  ;;  %v4386_v15 = vunpack.c.h.bf16 %v521_v61  ;;  %v660_v16 = vpop.f32.mrb[7].mxu1 }
 0x18a   : > { %v1065_v43 = vrot.slane %v4375_v4, 7  ;;  %v1069_v49 = vrot.slane %v4377_v7, 7  ;;  %v1155_v41 = vmul.f32 %v4315_v56, %v4375_v4  ;;  %v1156_v42 = vmul.f32 %v4315_v56, %v4377_v7 }
 0x18b   : > { %6033 = vst [vmem:[#allocation26_spill] sm:$0xff] %v4380_v11  ;;  %6034 = vst [vmem:[#allocation27_spill] sm:$0xff] %v4382_v13  ;;  %v1686_v24 = vmul.f32 %v4380_v11, %v4315_v56  ;;  %v1049_v25 = vmul.f32 %v4288_v47, %v4384_v14  ;;  %v1050_v27 = vmul.f32 %v4288_v47, %v4386_v15  ;;  %v1064_v29 = vrot.slane %v4384_v14, 7 }
 0x18c   : > { %v1687_v28 = vmul.f32 %v4382_v13, %v4315_v56  ;;  %v1068_v31 = vrot.slane %v4386_v15, 7  ;;  %v1101_v33 = vrot.slane %v4384_v14, 1  ;;  %v1105_v35 = vrot.slane %v4386_v15, 1 }
 0x18d   : > { %v4410_v38 = vmul.f32 %v4315_v56, %v4384_v14  ;;  %v4422_v45 = vmul.f32 %v4315_v56, %v4386_v15  ;;  %v4424_v55 = vunpack.c.l.bf16 %v688_v8  ;;  %v4426_v60 = vunpack.c.h.bf16 %v688_v8 }
 0x18e   : > { %v4418_v44 = vsel %vm1071_vm0, %v1068_v31, %v1064_v29  ;;  %v4428_v61 = vadd.f32 %v1155_v41, %v1049_v25  ;;  %v4430_v14 = vadd.f32 %v1156_v42, %v1050_v27  ;;  %v519_v22 = vmin.f32 %v511_v18, 6.0 }
 0x18f   : > { %6035 = vst [vmem:[#allocation28_spill] sm:$0xff] %v4424_v55  ;;  %6036 = vst [vmem:[#allocation29_spill] sm:$0xff] %v4426_v60  ;;  %v678_v23 = vmax.f32 %v666_v1, 0.0  ;;  %v4434_v20 = vmul.f32 %v4291_v48, %v4418_v44  ;;  %v1594_v8 = vmul.f32 %v4424_v55, %v4288_v47  ;;  %v1595_v25 = vmul.f32 %v4426_v60, %v4288_v47 }
 0x190   : > { %v509_v18 = vmax.f32 %v491_v9, 0.0  ;;  %v658_v1 = vadd.f32 %v4298_v50, %v657_v2  ;;  %v502_v27 = vadd.f32 %v3451_v3, %v4298_v50  ;;  %v669_v41 = vadd.f32 %v3475_v10, %v4298_v50 }
 0x191   : > { %v494_v42 = vadd.f32 %v4298_v50, %v493_v39  ;;  %v4448_v21 = vadd.f32 %v1686_v24, %v1594_v8  ;;  %v4450_v15 = vadd.f32 %v1687_v28, %v1595_v25  ;;  %v686_v19 = vmin.f32 %v678_v23, 6.0 }
 0x192   : > { %v661_v17 = vadd.f32 %v4298_v50, %v660_v16  ;;  %v676_v58 = vmax.f32 %v658_v1, 0.0  ;;  %v512_v54 = vmax.f32 %v502_v27, 0.0  ;;  %v679_v53 = vmax.f32 %v669_v41, 0.0 }
 0x193   : > { %v510_v51 = vmax.f32 %v494_v42, 0.0  ;;  %v517_v9 = vmin.f32 %v509_v18, 6.0  ;;  %v4455_v2 = vsel %vm1071_vm0, %v1064_v29, %v1068_v31  ;;  %v4459_v3 = vsel %vm1071_vm0, %v1065_v43, %v1069_v49 }
 0x194   : > { %v677_v36 = vmax.f32 %v661_v17, 0.0  ;;  %v684_v10 = vmin.f32 %v676_v58, 6.0  ;;  %v520_v39 = vmin.f32 %v512_v54, 6.0  ;;  %v687_v24 = vmin.f32 %v679_v53, 6.0 }
 0x195   : > { %v518_v23 = vmin.f32 %v510_v51, 6.0  ;;  %v4463_v16 = vsel %vm1071_vm0, %v1069_v49, %v1065_v43  ;;  %v4467_v17 = vmul.f32 %v4291_v48, %v4455_v2  ;;  %v4471_v29 = vsel %vm1108_vm1, %v1101_v33, %v1105_v35 }
 0x196   : > { %v685_v28 = vmin.f32 %v677_v36, 6.0  ;;  %v524_v31 = vpack.c.bf16 %v520_v39, %v519_v22  ;;  %v691_v8 = vpack.c.bf16 %v687_v24, %v686_v19  ;;  %v6037_v54 = vrot.slane %v4377_v7, 1 }
 0x197   : > { %v523_v25 = vpack.c.bf16 %v518_v23, %v517_v9  ;;  %v6038_v51 = vrot.slane %v4375_v4, 1  ;;  %v4483_v58 = vsel %vm1108_vm1, %v1105_v35, %v1101_v33  ;;  %v4495_v22 = vmul.f32 %v4305_v52, %v4471_v29 }
 0x198   : > { %v690_v53 = vpack.c.bf16 %v685_v28, %v684_v10  ;;  %v6040_v49 = vmov %v6037_v54  ;;  %v4497_v18 = vunpack.c.l.bf16 %v524_v31  ;;  %v4499_v1 = vunpack.c.h.bf16 %v524_v31 }
 0x199   : > { %v4479_v36 = vsel %vm1108_vm1, %v6038_v51, %v6037_v54  ;;  %v6039_v43 = vmov %v6038_v51  ;;  %v4501_v27 = vunpack.c.l.bf16 %v691_v8  ;;  %v4503_v33 = vunpack.c.h.bf16 %v691_v8 }
 0x19a   : > { %v4491_v19 = vsel %vm1108_vm1, %v6040_v49, %v6039_v43  ;;  %6041 = vst [vmem:[#allocation30_spill] sm:$0xff] %v4497_v18  ;;  %6042 = vst [vmem:[#allocation31_spill] sm:$0xff] %v4499_v1  ;;  %v4505_v35 = vunpack.c.l.bf16 %v523_v25  ;;  %v4507_v41 = vunpack.c.h.bf16 %v523_v25  ;;  %v4509_v42 = vunpack.c.l.bf16 %v690_v53 }
 0x19b   : > { %6043 = vst [vmem:[#allocation32_spill] sm:$0xff] %v4501_v27  ;;  %6044 = vst [vmem:[#allocation33_spill] sm:$0xff] %v4503_v33  ;;  %v4511_v9 = vunpack.c.h.bf16 %v690_v53  ;;  %v4518_v28 = vmul.f32 %v4305_v52, %v4483_v58 }
 0x19c   : > { %6045 = vst [vmem:[#allocation34_spill] sm:$0xff] %v4505_v35  ;;  %6046 = vst [vmem:[#allocation35_spill] sm:$0xff] %v4507_v41  ;;  %v1066_v43 = vrot.slane %v4505_v35, 7  ;;  %v1070_v49 = vrot.slane %v4507_v41, 7  ;;  %v1103_v24 = vrot.slane %v4505_v35, 1  ;;  %v1107_v10 = vrot.slane %v4507_v41, 1 }
 0x19d   : > { %6047 = vst [vmem:[#allocation36_spill] sm:$0xff] %v4509_v42  ;;  %6048 = vst [vmem:[#allocation37_spill] sm:$0xff] %v4511_v9  ;;  %v3494_v23 = vpop.f32.mrb[8].mxu0  ;;  %v1260_v31 = vmul.f32 %v4318_v57, %v4505_v35  ;;  %v1261_v8 = vmul.f32 %v4318_v57, %v4507_v41  ;;  %v1611_v54 = vrot.slane %v4509_v42, 7  ;;  %v1615_v25 = vrot.slane %v4511_v9, 7 }
 0x19e   : > { %v3518_v51 = vpop.f32.mrb[8].mxu1  ;;  %v808_v53 = vpop.f32.mrb[9].mxu0  ;;  %v4537_v32 = vsel %vm1071_vm0, %v1066_v43, %v1070_v49  ;;  %v4541_v11 = vsel %vm1071_vm0, %v1070_v49, %v1066_v43  ;;  %v4545_v35 = vsel %vm1108_vm1, %v1103_v24, %v1107_v10  ;;  %v4549_v13 = vsel %vm1108_vm1, %v1107_v10, %v1103_v24 }
 0x19f   : > { %v975_v39 = vpop.f32.mrb[9].mxu1  ;;  %v3495_v37 = vpop.f32.mrb[10].mxu0  ;;  %v4552_v55 = vadd.f32 %v1260_v31, %v4428_v61  ;;  %v4555_v48 = vadd.f32 %v1261_v8, %v4430_v14  ;;  %v4559_v33 = vsel %vm1071_vm0, %v1611_v54, %v1615_v25  ;;  %v1643_v43 = vrot.slane %v4509_v42, 1 }
 0x1a0   : > { %v3519_v27 = vpop.f32.mrb[10].mxu1  ;;  %v811_v52 = vpop.f32.mrb[11].mxu0  ;;  %6051 = vst [vmem:[#allocation40_spill] sm:$0xff] %v4559_v33  ;;  %v1647_v49 = vrot.slane %v4511_v9, 1  ;;  %v1779_v60 = vmul.f32 %v4509_v42, %v4318_v57  ;;  %v1780_v10 = vmul.f32 %v4511_v9, %v4318_v57  ;;  %v817_v61 = vadd.f32 %v3494_v23, %v4298_v50 }
 0x1a1   : > { %v978_v41 = vpop.f32.mrb[11].mxu1  ;;  %6049 = vst [vmem:[#allocation38_spill] sm:$0xff] %v4552_v55  ;;  %6050 = vst [vmem:[#allocation39_spill] sm:$0xff] %v4555_v48  ;;  %v984_v24 = vadd.f32 %v3518_v51, %v4298_v50  ;;  %v809_v14 = vadd.f32 %v4298_v50, %v808_v53  ;;  %v976_v31 = vadd.f32 %v4298_v50, %v975_v39 }
 0x1a2   : > { %v4573_v8 = vsel %vm1071_vm0, %v1615_v25, %v1611_v54  ;;  %v4577_v33 = vsel %vm1108_vm1, %v1643_v43, %v1647_v49  ;;  %v4580_v42 = vadd.f32 %v1779_v60, %v4448_v21  ;;  %v4583_v9 = vadd.f32 %v1780_v10, %v4450_v15 }
 0x1a3   : > { %6052 = vst [vmem:[#allocation41_spill] sm:$0xff] %v4573_v8  ;;  %6053 = vst [vmem:[#allocation42_spill] sm:$0xff] %v4577_v33  ;;  %v841_v51 = vmax.f32 %v817_v61, 0.0  ;;  %v1008_v53 = vmax.f32 %v984_v24, 0.0  ;;  %v839_v18 = vmax.f32 %v809_v14, 0.0  ;;  %v1006_v39 = vmax.f32 %v976_v31, 0.0 }
 0x1a4   : > { %6054 = vst [vmem:[#allocation43_spill] sm:$0xff] %v4580_v42  ;;  %6055 = vst [vmem:[#allocation44_spill] sm:$0xff] %v4583_v9  ;;  %v820_v54 = vadd.f32 %v3495_v37, %v4298_v50  ;;  %v987_v33 = vadd.f32 %v3519_v27, %v4298_v50  ;;  %v812_v21 = vadd.f32 %v4298_v50, %v811_v52 }
 0x1a5   : > { %v4585_v23 = vpop.f32.mrb[12].mxu0  ;;  %v979_v60 = vadd.f32 %v4298_v50, %v978_v41  ;;  %v4601_v61 = vsel %vm1108_vm1, %v1647_v49, %v1643_v43  ;;  %v849_v24 = vmin.f32 %v841_v51, 6.0  ;;  %v1016_v14 = vmin.f32 %v1008_v53, 6.0 }
 0x1a6   : > { %v4587_v1 = vpop.f32.mrb[12].mxu1  ;;  %v4589_v25 = vpop.f32.mrb[13].mxu0  ;;  %6056 = vst [vmem:[#allocation45_spill] sm:$0xff] %v4601_v61  ;;  %v1014_v31 = vmin.f32 %v1006_v39, 6.0  ;;  %v842_v27 = vmax.f32 %v820_v54, 0.0  ;;  %v1009_v9 = vmax.f32 %v987_v33, 0.0  ;;  %v4611_v48 = vadd.f32 %v4410_v38, %v4327_v62 }
 0x1a7   : > { %v4595_v15 = vpop.f32.mrb[13].mxu1  ;;  %v4597_v10 = vpop.f32.mrb[14].mxu0  ;;  %v840_v52 = vmax.f32 %v812_v21, 0.0  ;;  %v1007_v8 = vmax.f32 %v979_v60, 0.0  ;;  %v847_v55 = vmin.f32 %v839_v18, 6.0  ;;  %v1189_v43 = vmul.f32 %v4360_v30, %v4418_v44 }
 0x1a8   : > { %v4603_v42 = vpop.f32.mrb[14].mxu1  ;;  %v4605_v37 = vpop.f32.mrb[15].mxu0  ;;  %v1190_v49 = vmul.f32 %v4360_v30, %v4455_v2  ;;  %v850_v51 = vmin.f32 %v842_v27, 6.0  ;;  %v1017_v53 = vmin.f32 %v1009_v9, 6.0  ;;  %v4619_v33 = vadd.f32 %v4422_v45, %v4331_v63 }
 0x1a9   : > { %v4607_v41 = vpop.f32.mrb[15].mxu1  ;;  %v848_v39 = vmin.f32 %v840_v52, 6.0  ;;  %v1015_v54 = vmin.f32 %v1007_v8, 6.0  ;;  %v1191_v18 = vmul.f32 %v4360_v30, %v4463_v16  ;;  %v1192_v62 = vmul.f32 %v4360_v30, %v4459_v3 }
 0x1aa   : > { %v4626_v38 = vadd.f32 %v1189_v43, %v4335_v0  ;;  %v856_v44 = vpack.c.bf16 %v850_v51, %v849_v24  ;;  %v1023_v21 = vpack.c.bf16 %v1017_v53, %v1016_v14  ;;  %v1198_v9 = vadd.f32 %v1190_v49, %v4341_v5 }
 0x1ab   : > { %v855_v2 = vpack.c.bf16 %v848_v39, %v847_v55  ;;  %v1022_v60 = vpack.c.bf16 %v1015_v54, %v1014_v31  ;;  %v4630_v8 = vadd.f32 %v1191_v18, %v4434_v20  ;;  %v4633_v63 = vadd.f32 %v1192_v62, %v4467_v17 }
 0x1ac   : > { %v1225_v45 = vmul.f32 %v4363_v40, %v4471_v29  ;;  %v4637_v27 = vunpack.c.l.bf16 %v856_v44  ;;  %v4639_v52 = vunpack.c.h.bf16 %v856_v44  ;;  %v4641_v0 = vunpack.c.l.bf16 %v1023_v21 }
 0x1ad   : > { %v4643_v24 = vunpack.c.h.bf16 %v1023_v21  ;;  %v4645_v55 = vunpack.c.l.bf16 %v855_v2  ;;  %v4647_v5 = vunpack.c.h.bf16 %v855_v2  ;;  %v4649_v20 = vunpack.c.l.bf16 %v1022_v60 }
 0x1ae   : > { %6057 = vst [vmem:[#allocation46_spill] sm:$0xff] %v4637_v27  ;;  %6058 = vst [vmem:[#allocation47_spill] sm:$0xff] %v4639_v52  ;;  %v1226_v17 = vmul.f32 %v4363_v40, %v4483_v58  ;;  %v4656_v43 = vunpack.c.h.bf16 %v1022_v60  ;;  %v2178_v51 = vmul.f32 %v4637_v27, %v4315_v56  ;;  %v2179_v53 = vmul.f32 %v4639_v52, %v4315_v56 }
 0x1af   : > { %6059 = vst [vmem:[#allocation48_spill] sm:$0xff] %v4641_v0  ;;  %6060 = vst [vmem:[#allocation49_spill] sm:$0xff] %v4643_v24  ;;  %v2670_v62 = vmul.f32 %v4641_v0, %v4315_v56  ;;  %v2671_v44 = vmul.f32 %v4643_v24, %v4315_v56  ;;  %v2086_v18 = vmul.f32 %v4645_v55, %v4288_v47 }
 0x1b0   : > { %6061 = vst [vmem:[#allocation50_spill] sm:$0xff] %v4645_v55  ;;  %6062 = vst [vmem:[#allocation51_spill] sm:$0xff] %v4647_v5  ;;  %v2087_v39 = vmul.f32 %v4647_v5, %v4288_v47  ;;  %v2578_v14 = vmul.f32 %v4649_v20, %v4288_v47  ;;  %v2579_v29 = vmul.f32 %v4656_v43, %v4288_v47 }
 0x1b1   : > { %6063 = vst [vmem:[#allocation52_spill] sm:$0xff] %v4649_v20  ;;  %6064 = vst [vmem:[#allocation53_spill] sm:$0xff] %v4656_v43  ;;  %v4688_v60 = vadd.f32 %v2178_v51, %v2086_v18  ;;  %v1227_v21 = vmul.f32 %v4363_v40, %v4479_v36  ;;  %v1228_v58 = vmul.f32 %v4363_v40, %v4491_v19 }
 0x1b2   : > { %v4690_v54 = vadd.f32 %v2179_v53, %v2087_v39  ;;  %v4696_v2 = vadd.f32 %v2670_v62, %v2578_v14  ;;  %v4698_v31 = vadd.f32 %v2671_v44, %v2579_v29  ;;  %v1233_v49 = vadd.f32 %v1225_v45, %v4345_v6 }
 0x1b3   : > { %v1234_v0 = vadd.f32 %v1226_v17, %v4351_v12  ;;  %v4703_v24 = vadd.f32 %v1227_v21, %v4495_v22  ;;  %v1236_v51 = vadd.f32 %v1228_v58, %v4518_v28  ;;  %v1258_v53 = vmul.f32 %v4318_v57, %v4375_v4 }
 0x1b4   : > { %v1259_v39 = vmul.f32 %v4318_v57, %v4377_v7  ;;  %v1294_v14 = vmul.f32 %v4368_v59, %v4463_v16  ;;  %v1295_v29 = vmul.f32 %v4368_v59, %v4459_v3  ;;  %v1330_v6 = vmul.f32 %v4373_v46, %v4479_v36 }
 0x1b5   : > { %v1331_v12 = vmul.f32 %v4373_v46, %v4491_v19  ;;  %v1266_v22 = vadd.f32 %v1258_v53, %v4611_v48  ;;  %v833_v45 = vadd.f32 %v4585_v23, %v4298_v50  ;;  %v1000_v17 = vadd.f32 %v4587_v1, %v4298_v50 }
 0x1b6   : > { %v1267_v28 = vadd.f32 %v1259_v39, %v4619_v33  ;;  %v1302_v58 = vadd.f32 %v1294_v14, %v4626_v38  ;;  %v1303_v18 = vadd.f32 %v1295_v29, %v1198_v9  ;;  %v1338_v62 = vadd.f32 %v1330_v6, %v1233_v49  ;;  %v6087_v9 = vld [vmem:[#allocation28_spill] sm:$0xff] }
 0x1b7   : > { %v1339_v44 = vadd.f32 %v1331_v12, %v1234_v0  ;;  %v845_v21 = vmax.f32 %v833_v45, 0.0  ;;  %v1012_v20 = vmax.f32 %v1000_v17, 0.0  ;;  %v825_v27 = vadd.f32 %v4298_v50, %v4589_v25  ;;  %v4739_v0 = vld [vmem:[%s5912_s4] ss:$0 sm:$0xff] }
 0x1b8   : > { %v992_v48 = vadd.f32 %v4298_v50, %v4595_v15  ;;  %v1350_v33 = vsel %vm351_vm2, %v1302_v58, 0.0  ;;  %v1359_v23 = vadd.f32 %v1303_v18, %v1267_v28  ;;  %v836_v38 = vadd.f32 %v4597_v10, %v4298_v50 }
 0x1b9   : > { %v1371_v1 = vsel %vm354_vm3, %v1339_v44, 0.0  ;;  %v1358_v25 = vadd.f32 %v1350_v33, %v1266_v22  ;;  %v853_v49 = vmin.f32 %v845_v21, 6.0  ;;  %v843_v15 = vmax.f32 %v825_v27, 0.0 }
 0x1ba   : > { %v1379_v53 = vadd.f32 %v1371_v1, %v1359_v23  ;;  %v1020_v39 = vmin.f32 %v1012_v20, 6.0  ;;  %v846_v14 = vmax.f32 %v836_v38, 0.0  ;;  %v1003_v29 = vadd.f32 %v4603_v42, %v4298_v50  ;;  %v6065_v38 = vld [vmem:[#allocation39_spill] sm:$0xff] }
 0x1bb   : > { %v1378_v6 = vadd.f32 %v1358_v25, %v1338_v62  ;;  %v1010_v12 = vmax.f32 %v992_v48, 0.0  ;;  %v1296_v10 = vmul.f32 %v4368_v59, %v4541_v11  ;;  %v1297_v28 = vmul.f32 %v4368_v59, %v4537_v32 }
 0x1bc   : > { %v1393_v45 = vadd.f32 %v4739_v0, %v1379_v53  ;;  %v851_v17 = vmin.f32 %v843_v15, 6.0  ;;  %v854_v22 = vmin.f32 %v846_v14, 6.0  ;;  %v1013_v58 = vmax.f32 %v1003_v29, 0.0 }
 0x1bd   : > { %v1392_v27 = vadd.f32 %v4739_v0, %v1378_v6  ;;  %v1304_v20 = vadd.f32 %v1296_v10, %v4630_v8  ;;  %v1305_v18 = vadd.f32 %v1297_v28, %v4633_v63  ;;  %v1332_v42 = vmul.f32 %v4373_v46, %v4545_v35 }
 0x1be   : > { %v1401_v62 = vmax.f32 %v1393_v45, 0.0  ;;  %v858_v44 = vpack.c.bf16 %v854_v22, %v853_v49  ;;  %v1021_v21 = vmin.f32 %v1013_v58, 6.0  ;;  %v1333_v48 = vmul.f32 %v4373_v46, %v4549_v13  ;;  %v6068_v49 = vld [vmem:[#allocation38_spill] sm:$0xff] }
 0x1bf   : > { %v1400_v33 = vmax.f32 %v1392_v27, 0.0  ;;  %v1018_v23 = vmin.f32 %v1010_v12, 6.0  ;;  %v1352_v1 = vsel %vm351_vm2, %v1304_v20, 0.0  ;;  %v1361_v25 = vadd.f32 %v1305_v18, %v6065_v38 }
 0x1c0   : > { %v1409_v15 = vmin.f32 %v1401_v62, 6.0  ;;  %v4758_v8 = vunpack.c.l.bf16 %v858_v44  ;;  %v4760_v63 = vunpack.c.h.bf16 %v858_v44  ;;  %v1025_v53 = vpack.c.bf16 %v1021_v21, %v1020_v39  ;;  %v6085_v21 = vld [vmem:[#allocation29_spill] sm:$0xff] }
 0x1c1   : > { %v1408_v14 = vmin.f32 %v1400_v33, 6.0  ;;  %v1341_v29 = vadd.f32 %v1333_v48, %v1236_v51  ;;  %v1360_v6 = vadd.f32 %v1352_v1, %v6068_v49  ;;  %v828_v10 = vadd.f32 %v4298_v50, %v4605_v37 }
 0x1c2   : > { %6066 = vst [vmem:[#allocation39_spill] sm:$0xff] %v4758_v8  ;;  %6067 = vst [vmem:[#allocation54_spill] sm:$0xff] %v4760_v63  ;;  %v1340_v22 = vadd.f32 %v1332_v42, %v4703_v24  ;;  %v4769_v27 = vunpack.c.l.bf16 %v1025_v53  ;;  %v4771_v20 = vunpack.c.h.bf16 %v1025_v53  ;;  %v995_v37 = vadd.f32 %v4298_v50, %v4607_v41  ;;  %v6075_v53 = vld [vmem:[#allocation31_spill] sm:$0xff] }
 0x1c3   : > { %v1416_v58 = vpack.c.bf16 %v1409_v15, %v1408_v14  ;;  %v1373_v51 = vsel %vm354_vm3, %v1341_v29, 0.0  ;;  %v844_v62 = vmax.f32 %v828_v10, 0.0  ;;  %v6076_v14 = vrot.slane %v6075_v53, 7  ;;  %v6077_v29 = vld [vmem:[#allocation30_spill] sm:$0xff] }
 0x1c4   : > { %6069 = vst [vmem:[#allocation38_spill] sm:$0xff] %v4769_v27  ;;  %6070 = vst [vmem:[#allocation55_spill] sm:$0xff] %v4771_v20  ;;  %v1380_v39 = vadd.f32 %v1360_v6, %v1340_v22  ;;  %v1381_v18 = vadd.f32 %v1373_v51, %v1361_v25  ;;  %v4780_v24 = vmul.f32 %v4769_v27, %v4315_v56  ;;  %v1011_v15 = vmax.f32 %v995_v37, 0.0 }
 0x1c5   : > { %3540 = vmatprep.mubr.bf16.mxu0 %v1416_v58  ;;  %v4784_v42 = vmul.f32 %v4771_v20, %v4315_v56  ;;  %v4791_v50 = vmul.f32 %v4769_v27, %v4318_v57  ;;  %v4795_v41 = vmul.f32 %v4771_v20, %v4318_v57  ;;  %v852_v25 = vmin.f32 %v844_v62, 6.0 }
 0x1c6   : > { %6071 = vst [vmem:[#allocation56_spill] sm:$0xff] %v4780_v24  ;;  %v1394_v1 = vadd.f32 %v4739_v0, %v1380_v39  ;;  %v1395_v38 = vadd.f32 %v4739_v0, %v1381_v18  ;;  %v6078_v49 = vrot.slane %v6077_v29, 7  ;;  %v6080_v22 = vmov %v6076_v14  ;;  %v6103_v24 = vld [vmem:[#allocation26_spill] sm:$0xff] }
 0x1c7   : > { %6072 = vst [vmem:[#allocation57_spill] sm:$0xff] %v4784_v42  ;;  %6073 = vst [vmem:[#allocation58_spill] sm:$0xff] %v4791_v50  ;;  %v6081_v51 = vrot.slane %v6075_v53, 1  ;;  %v6082_v39 = vrot.slane %v6077_v29, 1  ;;  %v6086_v48 = vrot.slane %v6085_v21, 7  ;;  %v6088_v45 = vrot.slane %v6087_v9, 7 }
 0x1c8   : > { %6074 = vst [vmem:[#allocation59_spill] sm:$0xff] %v4795_v41  ;;  %v4805_v6 = vsel %vm1071_vm0, %v6078_v49, %v6076_v14  ;;  %v6079_v10 = vmov %v6078_v49  ;;  %v1402_v49 = vmax.f32 %v1394_v1, 0.0  ;;  %v1403_v33 = vmax.f32 %v1395_v38, 0.0 }
 0x1c9   : > { %v4813_v58 = vsel %vm1071_vm0, %v6080_v22, %v6079_v10  ;;  %v4821_v18 = vsel %vm1108_vm1, %v6082_v39, %v6081_v51  ;;  %v6083_v62 = vmov %v6082_v39  ;;  %v6084_v37 = vmov %v6081_v51 }
 0x1ca   : > { %v4829_v14 = vsel %vm1108_vm1, %v6084_v37, %v6083_v62  ;;  %v857_v10 = vpack.c.bf16 %v852_v25, %v851_v17  ;;  %v1019_v22 = vmin.f32 %v1011_v15, 6.0  ;;  %v4837_v51 = vsel %vm1071_vm0, %v6088_v45, %v6086_v48 }
 0x1cb   : > { %6089 = vst [vmem:[#allocation31_spill] sm:$0xff] %v4837_v51  ;;  %v6090_v39 = vmov %v6088_v45  ;;  %v6091_v44 = vmov %v6086_v48  ;;  %v6093_v1 = vrot.slane %v6085_v21, 1  ;;  %v6094_v17 = vrot.slane %v6087_v9, 1 }
 0x1cc   : > { %v4845_v62 = vsel %vm1071_vm0, %v6091_v44, %v6090_v39  ;;  %v1410_v15 = vmin.f32 %v1402_v49, 6.0  ;;  %v1411_v37 = vmin.f32 %v1403_v33, 6.0  ;;  %v4863_v44 = vunpack.c.l.bf16 %v857_v10 }
 0x1cd   : > { %6092 = vst [vmem:[#allocation30_spill] sm:$0xff] %v4845_v62  ;;  %v4853_v38 = vsel %vm1108_vm1, %v6094_v17, %v6093_v1  ;;  %v6096_v25 = vmov %v6094_v17  ;;  %v6097_v45 = vmov %v6093_v1  ;;  %v4865_v39 = vunpack.c.h.bf16 %v857_v10  ;;  %v6101_v17 = vld [vmem:[#allocation27_spill] sm:$0xff] }
 0x1ce   : > { %6095 = vst [vmem:[#allocation60_spill] sm:$0xff] %v4853_v38  ;;  %v4861_v48 = vsel %vm1108_vm1, %v6097_v45, %v6096_v25  ;;  %6099 = vst [vmem:[#allocation62_spill] sm:$0xff] %v4863_v44  ;;  %v1024_v12 = vpack.c.bf16 %v1019_v22, %v1018_v23  ;;  %v1592_v28 = vmul.f32 %v6077_v29, %v4288_v47  ;;  %v6102_v42 = vrot.slane %v6101_v17, 7  ;;  %v3754_v22 = vld [vmem:[#allocation9 + $0x8] sm:$0xff]  }
 0x1cf   : > { %6098 = vst [vmem:[#allocation61_spill] sm:$0xff] %v4861_v48  ;;  %6100 = vst [vmem:[#allocation63_spill] sm:$0xff] %v4865_v39  ;;  %v1593_v1 = vmul.f32 %v6075_v53, %v4288_v47  ;;  %v6104_v41 = vrot.slane %v6103_v24, 7  ;;  %v1417_v33 = vpack.c.bf16 %v1411_v37, %v1410_v15  ;;  %v2103_v49 = vrot.slane %v4863_v44, 7 }
 0x1d0   : > { %v2107_v10 = vrot.slane %v4865_v39, 7  ;;  %v2135_v23 = vrot.slane %v4863_v44, 1  ;;  %v2139_v45 = vrot.slane %v4865_v39, 1  ;;  %v2271_v50 = vmul.f32 %v4863_v44, %v4318_v57 }
 0x1d1   : > { %v4877_v25 = vsel %vm1071_vm0, %v6104_v41, %v6102_v42  ;;  %v2272_v27 = vmul.f32 %v4865_v39, %v4318_v57  ;;  %v4887_v43 = vunpack.c.l.bf16 %v1024_v12  ;;  %3541 = vmatmul.mubr.bf16.vlgmr.msra.gmra.mrb[16].mxu0 %v1417_v33  ;;  %v4897_v15 = vunpack.c.h.bf16 %v1024_v12 }
 0x1d2   : > { %v4891_v42 = vsel %vm1071_vm0, %v2103_v49, %v2107_v10  ;;  %v4895_v41 = vsel %vm1071_vm0, %v2107_v10, %v2103_v49  ;;  %v6109_v37 = vrot.slane %v6103_v24, 7  ;;  %v6110_v44 = vrot.slane %v6101_v17, 7  ;;  %v6115_v10 = vld [vmem:[#allocation17_spill] sm:$0xff] }
 0x1d3   : > { %6105 = vst [vmem:[#allocation27_spill] sm:$0xff] %v4887_v43  ;;  %6106 = vst [vmem:[#allocation26_spill] sm:$0xff] %v4891_v42  ;;  %v4909_v33 = vsel %vm1108_vm1, %v2135_v23, %v2139_v45  ;;  %v4913_v8 = vsel %vm1108_vm1, %v2139_v45, %v2135_v23  ;;  %v4916_v49 = vadd.f32 %v2271_v50, %v4688_v60  ;;  %3573 = vmatpush3.bf16.msra.mxu0 %v6115_v10  ;;  %v3756_v42 = vld [vmem:[#allocation9 + $0x10] sm:$0xff]  }
 0x1d4   : > { %6107 = vst [vmem:[#allocation64_spill] sm:$0xff] %v4895_v41  ;;  %6108 = vst [vmem:[#allocation65_spill] sm:$0xff] %v4897_v15  ;;  %v4905_v39 = vsel %vm1071_vm0, %v6110_v44, %v6109_v37  ;;  %v4919_v12 = vadd.f32 %v2272_v27, %v4690_v54  ;;  %v2595_v63 = vrot.slane %v4887_v43, 7  ;;  %v2599_v44 = vrot.slane %v4897_v15, 7  ;;  %3574 = vmatprep.subr.bf16.mxu0 %v3754_v22  ;;  %v6116_v54 = vld [vmem:[#allocation20_spill] sm:$0xff] }
 0x1d5   : > { %6111 = vst [vmem:[#allocation66_spill] sm:$0xff] %v4909_v33  ;;  %6112 = vst [vmem:[#allocation67_spill] sm:$0xff] %v4913_v8  ;;  %v2627_v37 = vrot.slane %v4887_v43, 1  ;;  %v2631_v33 = vrot.slane %v4897_v15, 1  ;;  %v2763_v23 = vmul.f32 %v4887_v43, %v4318_v57  ;;  %v2764_v60 = vmul.f32 %v4897_v15, %v4318_v57 }
 0x1d6   : > { %6113 = vst [vmem:[#allocation68_spill] sm:$0xff] %v4916_v49  ;;  %6114 = vst [vmem:[#allocation69_spill] sm:$0xff] %v4919_v12  ;;  %v1624_v27 = vmul.f32 %v4813_v58, %v6116_v54  ;;  %v1625_v50 = vmul.f32 %v4805_v6, %v6116_v54  ;;  %v4936_v45 = vsel %vm1071_vm0, %v2595_v63, %v2599_v44 }
 0x1d7   : > { %6117 = vst [vmem:[#allocation17_spill] sm:$0xff] %v4936_v45  ;;  %v4940_v10 = vsel %vm1071_vm0, %v2599_v44, %v2595_v63  ;;  %v4944_v43 = vsel %vm1108_vm1, %v2627_v37, %v2631_v33  ;;  %v4948_v15 = vsel %vm1108_vm1, %v2631_v33, %v2627_v37  ;;  %v4951_v12 = vadd.f32 %v2763_v23, %v4696_v2  ;;  %v6127_v23 = vld [vmem:[#allocation22_spill] sm:$0xff] }
 0x1d8   : > { %6118 = vst [vmem:[#allocation20_spill] sm:$0xff] %v4940_v10  ;;  %6119 = vst [vmem:[#allocation70_spill] sm:$0xff] %v4944_v43  ;;  %v4954_v49 = vadd.f32 %v2764_v60, %v4698_v31  ;;  %v1626_v45 = vmul.f32 %v4845_v62, %v6116_v54  ;;  %v1627_v63 = vmul.f32 %v4837_v51, %v6116_v54  ;;  %3575 = vmatpush3.bf16.msra.mxu0 %v3754_v22 }
 0x1d9   : > { %6120 = vst [vmem:[#allocation71_spill] sm:$0xff] %v4948_v15  ;;  %6121 = vst [vmem:[#allocation72_spill] sm:$0xff] %v4951_v12  ;;  %v6123_v44 = vrot.slane %v6101_v17, 1  ;;  %v6124_v43 = vrot.slane %v6103_v24, 1  ;;  %v1656_v60 = vmul.f32 %v4821_v18, %v6127_v23  ;;  %v1657_v22 = vmul.f32 %v4829_v14, %v6127_v23  ;;  %3576 = vmatprep.subr.bf16.mxu0 %v3756_v42  ;;  %v3758_v12 = vld [vmem:[#allocation9 + $0x18] sm:$0xff]  }
 0x1da   : > { %6122 = vst [vmem:[#allocation73_spill] sm:$0xff] %v4954_v49  ;;  %v1684_v49 = vmul.f32 %v6087_v9, %v4315_v56  ;;  %v1717_v15 = vmul.f32 %v4837_v51, %v4360_v30  ;;  %v1718_v10 = vmul.f32 %v4905_v39, %v4360_v30  ;;  %v1719_v8 = vmul.f32 %v4877_v25, %v4360_v30  ;;  %v3760_v9 = vld [vmem:[#allocation9 + $0x20] sm:$0xff]  }
 0x1db   : > { %v4966_v33 = vsel %vm1108_vm1, %v6124_v43, %v6123_v44  ;;  %v6125_v2 = vmov %v6124_v43  ;;  %v6126_v31 = vmov %v6123_v44  ;;  %v1658_v43 = vmul.f32 %v4853_v38, %v6127_v23 }
 0x1dc   : > { %v4974_v37 = vsel %vm1108_vm1, %v6126_v31, %v6125_v2  ;;  %v1659_v44 = vmul.f32 %v4861_v48, %v6127_v23  ;;  %v1685_v2 = vmul.f32 %v6085_v21, %v4315_v56  ;;  %v1716_v31 = vmul.f32 %v4845_v62, %v4360_v30  ;;  %3577 = vmatpush3.bf16.msra.mxu0 %v3756_v42 }
 0x1dd   : > { %v1692_v41 = vadd.f32 %v1684_v49, %v1592_v28  ;;  %v1748_v5 = vmul.f32 %v4853_v38, %v4363_v40  ;;  %v1749_v55 = vmul.f32 %v4861_v48, %v4363_v40  ;;  %v1725_v62 = vadd.f32 %v1717_v15, %v1625_v50  ;;  %3578 = vmatprep.subr.bf16.mxu0 %v3758_v12  ;;  %v6132_v38 = vld [vmem:[#allocation42_spill] sm:$0xff] }
 0x1de   : > { %v1693_v52 = vadd.f32 %v1685_v2, %v1593_v1  ;;  %v1724_v20 = vadd.f32 %v1716_v31, %v1624_v27  ;;  %v5000_v21 = vadd.f32 %v1718_v10, %v1626_v45  ;;  %v5002_v51 = vadd.f32 %v1719_v8, %v1627_v63 }
 0x1df   : > { %v1750_v61 = vmul.f32 %v4966_v33, %v4363_v40  ;;  %v1751_v28 = vmul.f32 %v4974_v37, %v4363_v40  ;;  %v1756_v1 = vadd.f32 %v1748_v5, %v1656_v60  ;;  %v1757_v49 = vadd.f32 %v1749_v55, %v1657_v22  ;;  %v3762_v22 = vld [vmem:[#allocation9 + $0x28] sm:$0xff]  }
 0x1e0   : > { %v1777_v2 = vmul.f32 %v6103_v24, %v4318_v57  ;;  %v1778_v42 = vmul.f32 %v6101_v17, %v4318_v57  ;;  %v1809_v8 = vmul.f32 %v4905_v39, %v4368_v59  ;;  %v1810_v15 = vmul.f32 %v4877_v25, %v4368_v59  ;;  %3579 = vmatpush3.bf16.msra.mxu0 %v3758_v12 }
 0x1e1   : > { %v5016_v27 = vadd.f32 %v1750_v61, %v1658_v43  ;;  %v5018_v50 = vadd.f32 %v1751_v28, %v1659_v44  ;;  %v1841_v5 = vmul.f32 %v4966_v33, %v4373_v46  ;;  %v1842_v55 = vmul.f32 %v4974_v37, %v4373_v46  ;;  %3580 = vmatprep.subr.bf16.mxu0 %v3760_v9 }
 0x1e2   : > { %v1785_v45 = vadd.f32 %v1777_v2, %v1692_v41  ;;  %v1786_v10 = vadd.f32 %v1778_v42, %v1693_v52  ;;  %v1817_v63 = vadd.f32 %v1809_v8, %v1724_v20  ;;  %v1818_v60 = vadd.f32 %v1810_v15, %v1725_v62  ;;  %v6129_v2 = vld [vmem:[#allocation35_spill] sm:$0xff] }
 0x1e3   : > { %v1849_v31 = vadd.f32 %v1841_v5, %v1756_v1  ;;  %v1850_v48 = vadd.f32 %v1842_v55, %v1757_v49  ;;  %v1051_v61 = vmul.f32 %v4288_v47, %v4375_v4  ;;  %v1052_v43 = vmul.f32 %v4288_v47, %v4377_v7  ;;  %v6128_v1 = vld [vmem:[#allocation34_spill] sm:$0xff]  ;;  %v3764_v42 = vld [vmem:[#allocation9 + $0x30] sm:$0xff]  }
 0x1e4   : > { %v1857_v44 = vsel %vm351_vm2, %v1817_v63, 0.0  ;;  %v1866_v28 = vadd.f32 %v1818_v60, %v1786_v10  ;;  %v1088_v41 = vmul.f32 %v6116_v54, %v4463_v16  ;;  %v1089_v52 = vmul.f32 %v6116_v54, %v4459_v3  ;;  %3581 = vmatpush3.bf16.msra.mxu0 %v3760_v9 }
 0x1e5   : > { %v1865_v20 = vadd.f32 %v1857_v44, %v1785_v45  ;;  %v1874_v62 = vsel %vm354_vm3, %v1850_v48, 0.0  ;;  %v1125_v4 = vmul.f32 %v6127_v23, %v4479_v36  ;;  %v1126_v7 = vmul.f32 %v6127_v23, %v4491_v19  ;;  %3582 = vmatprep.subr.bf16.mxu0 %v3762_v22 }
 0x1e6   : > { %v1882_v12 = vadd.f32 %v1874_v62, %v1866_v28  ;;  %v1157_v49 = vmul.f32 %v4315_v56, %v6128_v1  ;;  %v1158_v16 = vmul.f32 %v4315_v56, %v6129_v2  ;;  %v1193_v3 = vmul.f32 %v4360_v30, %v4541_v11 }
 0x1e7   : > { %v1881_v48 = vadd.f32 %v1865_v20, %v1849_v31  ;;  %v1194_v36 = vmul.f32 %v4360_v30, %v4537_v32  ;;  %v1229_v19 = vmul.f32 %v4363_v40, %v4545_v35  ;;  %v1230_v9 = vmul.f32 %v4363_v40, %v4549_v13 }
 0x1e8   : > { %v1890_v8 = vadd.f32 %v4739_v0, %v1882_v12  ;;  %v1165_v15 = vadd.f32 %v1157_v49, %v1051_v61  ;;  %v1166_v5 = vadd.f32 %v1158_v16, %v1052_v43  ;;  %v1201_v55 = vadd.f32 %v1193_v3, %v1088_v41  ;;  %3583 = vmatpush3.bf16.msra.mxu0 %v3762_v22  ;;  %v3766_v61 = vld [vmem:[#allocation9 + $0x38] sm:$0xff]  }
 0x1e9   : > { %v1889_v45 = vadd.f32 %v4739_v0, %v1881_v48  ;;  %v1202_v10 = vadd.f32 %v1194_v36, %v1089_v52  ;;  %v1237_v63 = vadd.f32 %v1229_v19, %v1125_v4  ;;  %v1238_v60 = vadd.f32 %v1230_v9, %v1126_v7  ;;  %3584 = vmatprep.subr.bf16.mxu0 %v3764_v42  ;;  %v6130_v19 = vld [vmem:[#allocation41_spill] sm:$0xff] }
 0x1ea   : > { %v1898_v31 = vmax.f32 %v1890_v8, 0.0  ;;  %v1262_v44 = vmul.f32 %v4318_v57, %v6077_v29  ;;  %v1263_v28 = vmul.f32 %v4318_v57, %v6075_v53  ;;  %v1298_v20 = vmul.f32 %v4368_v59, %v4813_v58  ;;  %v6131_v8 = vld [vmem:[#allocation40_spill] sm:$0xff] }
 0x1eb   : > { %v1897_v43 = vmax.f32 %v1889_v45, 0.0  ;;  %v1299_v41 = vmul.f32 %v4368_v59, %v4805_v6  ;;  %v1334_v52 = vmul.f32 %v4373_v46, %v4821_v18  ;;  %v1335_v22 = vmul.f32 %v4373_v46, %v4829_v14 }
 0x1ec   : > { %v1906_v62 = vmin.f32 %v1898_v31, 6.0  ;;  %v1270_v4 = vadd.f32 %v1262_v44, %v1165_v15  ;;  %v1271_v7 = vadd.f32 %v1263_v28, %v1166_v5  ;;  %v1306_v12 = vadd.f32 %v1298_v20, %v1201_v55  ;;  %3585 = vmatpush3.bf16.msra.mxu0 %v3764_v42 }
 0x1ed   : > { %v1905_v49 = vmin.f32 %v1897_v43, 6.0  ;;  %v1307_v16 = vadd.f32 %v1299_v41, %v1202_v10  ;;  %v1342_v3 = vadd.f32 %v1334_v52, %v1237_v63  ;;  %v1343_v48 = vadd.f32 %v1335_v22, %v1238_v60  ;;  %3586 = vmatprep.subr.bf16.mxu0 %v3766_v61  ;;  %v6133_v60 = vld [vmem:[#allocation45_spill] sm:$0xff] }
 0x1ee   : > { %v1354_v36 = vsel %vm351_vm2, %v1306_v12, 0.0  ;;  %v1811_v9 = vmul.f32 %v6130_v19, %v4368_v59  ;;  %v1812_v45 = vmul.f32 %v6131_v8, %v4368_v59  ;;  %v1843_v31 = vmul.f32 %v6132_v38, %v4373_v46  ;;  %v6135_v12 = vld [vmem:[#allocation43_spill] sm:$0xff] }
 0x1ef   : > { %v1913_v15 = vpack.c.bf16 %v1906_v62, %v1905_v49  ;;  %v1362_v5 = vadd.f32 %v1354_v36, %v1270_v4  ;;  %v1363_v55 = vadd.f32 %v1307_v16, %v1271_v7  ;;  %v1375_v10 = vsel %vm354_vm3, %v1343_v48, 0.0 }
 0x1f0   : > { %v1819_v42 = vadd.f32 %v1811_v9, %v5000_v21  ;;  %v1820_v63 = vadd.f32 %v1812_v45, %v5002_v51  ;;  %v1844_v44 = vmul.f32 %v6133_v60, %v4373_v46  ;;  %v1851_v28 = vadd.f32 %v1843_v31, %v5016_v27  ;;  %v6134_v51 = vld [vmem:[#allocation44_spill] sm:$0xff]  ;;  %3587 = vmatpush3.bf16.msra.mxu0 %v3766_v61  ;;  %v6137_v45 = vld [vmem:[#allocation37_spill] sm:$0xff] }
 0x1f1   : > { %3564 = vmatprep.mubr.bf16.mxu1 %v1913_v15  ;;  %v1382_v20 = vadd.f32 %v1362_v5, %v1342_v3  ;;  %v1383_v43 = vadd.f32 %v1375_v10, %v1363_v55  ;;  %v1596_v41 = vmul.f32 %v6103_v24, %v4288_v47  ;;  %v1597_v52 = vmul.f32 %v6101_v17, %v4288_v47  ;;  %v6138_v15 = vld [vmem:[#allocation33_spill] sm:$0xff]  ;;  %v6140_v55 = vld [vmem:[#allocation32_spill] sm:$0xff] }
 0x1f2   : > { %v1852_v22 = vadd.f32 %v1844_v44, %v5018_v50  ;;  %v1859_v21 = vsel %vm351_vm2, %v1819_v42, 0.0  ;;  %v1868_v62 = vadd.f32 %v1820_v63, %v6134_v51  ;;  %v1628_v4 = vmul.f32 %v4905_v39, %v6116_v54  ;;  %v6136_v39 = vld [vmem:[#allocation36_spill] sm:$0xff] }
 0x1f3   : > { %v1396_v27 = vadd.f32 %v4739_v0, %v1382_v20  ;;  %v1397_v7 = vadd.f32 %v4739_v0, %v1383_v43  ;;  %v1867_v24 = vadd.f32 %v1859_v21, %v6135_v12  ;;  %v1629_v17 = vmul.f32 %v4877_v25, %v6116_v54 }
 0x1f4   : > { %v1876_v50 = vsel %vm354_vm3, %v1852_v22, 0.0  ;;  %v1660_v49 = vmul.f32 %v4966_v33, %v6127_v23  ;;  %v1661_v16 = vmul.f32 %v4974_v37, %v6127_v23  ;;  %v1688_v61 = vmul.f32 %v6136_v39, %v4315_v56 }
 0x1f5   : > { %v1404_v3 = vmax.f32 %v1396_v27, 0.0  ;;  %v1405_v48 = vmax.f32 %v1397_v7, 0.0  ;;  %v1883_v36 = vadd.f32 %v1867_v24, %v1851_v28  ;;  %v1884_v9 = vadd.f32 %v1876_v50, %v1868_v62 }
 0x1f6   : > { %v1689_v31 = vmul.f32 %v6137_v45, %v4315_v56  ;;  %v1696_v25 = vadd.f32 %v1688_v61, %v1596_v41  ;;  %v6139_v5 = vrot.slane %v6138_v15, 7  ;;  %v6141_v10 = vrot.slane %v6140_v55, 7 }
 0x1f7   : > { %v1412_v44 = vmin.f32 %v1404_v3, 6.0  ;;  %v1413_v28 = vmin.f32 %v1405_v48, 6.0  ;;  %v1891_v20 = vadd.f32 %v4739_v0, %v1883_v36  ;;  %v1892_v43 = vadd.f32 %v4739_v0, %v1884_v9 }
 0x1f8   : > { %v5112_v33 = vsel %vm1071_vm0, %v6141_v10, %v6139_v5  ;;  %v6142_v37 = vmov %v6141_v10  ;;  %v6143_v42 = vmov %v6139_v5  ;;  %v1697_v41 = vadd.f32 %v1689_v31, %v1597_v52 }
 0x1f9   : > { %v5120_v63 = vsel %vm1071_vm0, %v6143_v42, %v6142_v37  ;;  %v1720_v22 = vmul.f32 %v6130_v19, %v4360_v30  ;;  %v1721_v21 = vmul.f32 %v6131_v8, %v4360_v30  ;;  %v6144_v51 = vrot.slane %v6138_v15, 1 }
 0x1fa   : > { %v6145_v62 = vrot.slane %v6140_v55, 1  ;;  %v1418_v7 = vpack.c.bf16 %v1413_v28, %v1412_v44  ;;  %v1899_v12 = vmax.f32 %v1891_v20, 0.0  ;;  %v1900_v24 = vmax.f32 %v1892_v43, 0.0 }
 0x1fb   : > { %v6147_v52 = vmov %v6144_v51  ;;  %v1728_v3 = vadd.f32 %v1720_v22, %v1628_v4  ;;  %v1729_v48 = vadd.f32 %v1721_v21, %v1629_v17  ;;  %v1752_v36 = vmul.f32 %v6132_v38, %v4363_v40  ;;  %v3755_v21 = vld [vmem:[#allocation9 + $0x8] sm:$0xff]  }
 0x1fc   : > { %v5134_v27 = vsel %vm1108_vm1, %v6145_v62, %v6144_v51  ;;  %v6146_v50 = vmov %v6145_v62  ;;  %v1753_v9 = vmul.f32 %v6133_v60, %v4363_v40  ;;  %3544 = vmatprep.mubr.bf16.mxu0 %v1418_v7  ;;  %v1907_v31 = vmin.f32 %v1899_v12, 6.0 }
 0x1fd   : > { %v5142_v61 = vsel %vm1108_vm1, %v6147_v52, %v6146_v50  ;;  %v1908_v5 = vmin.f32 %v1900_v24, 6.0  ;;  %v1781_v10 = vmul.f32 %v6140_v55, %v4318_v57  ;;  %v1782_v37 = vmul.f32 %v6138_v15, %v4318_v57 }
 0x1fe   : > { %v1760_v42 = vadd.f32 %v1752_v36, %v1660_v49  ;;  %v1761_v44 = vadd.f32 %v1753_v9, %v1661_v16  ;;  %v1813_v4 = vmul.f32 %v5120_v63, %v4368_v59  ;;  %v1814_v17 = vmul.f32 %v5112_v33, %v4368_v59  ;;  %v3757_v36 = vld [vmem:[#allocation9 + $0x10] sm:$0xff]  }
 0x1ff   : > { %v1914_v28 = vpack.c.bf16 %v1908_v5, %v1907_v31  ;;  %v1789_v20 = vadd.f32 %v1781_v10, %v1696_v25  ;;  %v1790_v43 = vadd.f32 %v1782_v37, %v1697_v41  ;;  %v1845_v22 = vmul.f32 %v5134_v27, %v4373_v46 }
 0x200   : > { %v1821_v51 = vadd.f32 %v1813_v4, %v1728_v3  ;;  %v1822_v62 = vadd.f32 %v1814_v17, %v1729_v48  ;;  %v1846_v7 = vmul.f32 %v5142_v61, %v4373_v46  ;;  %v1053_v49 = vmul.f32 %v4288_v47, %v6128_v1  ;;  %v3768_v3 = vld [vmem:[#allocation9] sm:$0xff]  }
 0x201   : > { %3565 = vmatmul.mubr.bf16.vlgmr.msra.gmra.mrb[16].mxu1 %v1914_v28  ;;  %v1853_v16 = vadd.f32 %v1845_v22, %v1760_v42  ;;  %v1054_v12 = vmul.f32 %v4288_v47, %v6129_v2  ;;  %v1090_v25 = vmul.f32 %v6116_v54, %v4541_v11  ;;  %v1091_v41 = vmul.f32 %v6116_v54, %v4537_v32  ;;  %v6148_v28 = vld [vmem:[#allocation28_spill] sm:$0xff] }
 0x202   : > { %v1854_v24 = vadd.f32 %v1846_v7, %v1761_v44  ;;  %v1861_v50 = vsel %vm351_vm2, %v1821_v51, 0.0  ;;  %v1870_v52 = vadd.f32 %v1822_v62, %v1790_v43  ;;  %3597 = vmatpush3.bf16.msra.mxu1 %v3768_v3  ;;  %v1127_v1 = vmul.f32 %v6127_v23, %v4545_v35  ;;  %v3759_v43 = vld [vmem:[#allocation9 + $0x18] sm:$0xff]   ;;  %v6151_v62 = vld [vmem:[#allocation31_spill] sm:$0xff] }
 0x203   : > { %v1869_v48 = vadd.f32 %v1861_v50, %v1789_v20  ;;  %3598 = vmatprep.subr.bf16.mxu1 %v3755_v21  ;;  %v1128_v2 = vmul.f32 %v6127_v23, %v4549_v13  ;;  %v1159_v11 = vmul.f32 %v4315_v56, %v6077_v29  ;;  %v1160_v32 = vmul.f32 %v4315_v56, %v6075_v53  ;;  %v6149_v20 = vld [vmem:[#allocation29_spill] sm:$0xff]  ;;  %v6152_v7 = vld [vmem:[#allocation60_spill] sm:$0xff] }
 0x204   : > { %v1878_v9 = vsel %vm354_vm3, %v1854_v24, 0.0  ;;  %v1195_v31 = vmul.f32 %v4360_v30, %v4813_v58  ;;  %v1196_v35 = vmul.f32 %v4360_v30, %v4805_v6  ;;  %v1231_v5 = vmul.f32 %v4363_v40, %v4821_v18 }
 0x205   : > { %v1885_v13 = vadd.f32 %v1869_v48, %v1853_v16  ;;  %v1886_v10 = vadd.f32 %v1878_v9, %v1870_v52  ;;  %v1167_v37 = vadd.f32 %v1159_v11, %v1053_v49  ;;  %v1168_v29 = vadd.f32 %v1160_v32, %v1054_v12  ;;  %v6153_v52 = vld [vmem:[#allocation61_spill] sm:$0xff] }
 0x206   : > { %3599 = vmatpush3.bf16.msra.mxu1 %v3755_v21  ;;  %v1203_v42 = vadd.f32 %v1195_v31, %v1090_v25  ;;  %v1204_v53 = vadd.f32 %v1196_v35, %v1091_v41  ;;  %v1232_v44 = vmul.f32 %v4363_v40, %v4829_v14  ;;  %v1239_v4 = vadd.f32 %v1231_v5, %v1127_v1  ;;  %v6150_v21 = vld [vmem:[#allocation30_spill] sm:$0xff]  ;;  %v3761_v11 = vld [vmem:[#allocation9 + $0x20] sm:$0xff]  }
 0x207   : > { %v1893_v17 = vadd.f32 %v4739_v0, %v1885_v13  ;;  %v1894_v58 = vadd.f32 %v4739_v0, %v1886_v10  ;;  %v1264_v6 = vmul.f32 %v4318_v57, %v6148_v28  ;;  %v1265_v18 = vmul.f32 %v4318_v57, %v6149_v20  ;;  %3600 = vmatprep.subr.bf16.mxu1 %v3757_v36 }
 0x208   : > { %v1240_v22 = vadd.f32 %v1232_v44, %v1128_v2  ;;  %v1300_v51 = vmul.f32 %v4368_v59, %v6150_v21  ;;  %v1301_v14 = vmul.f32 %v4368_v59, %v6151_v62  ;;  %v1336_v49 = vmul.f32 %v4373_v46, %v6152_v7  ;;  %v6155_v62 = vld [vmem:[#allocation50_spill] sm:$0xff]  ;;  %v6156_v7 = vld [vmem:[#allocation51_spill] sm:$0xff] }
 0x209   : > { %v1901_v16 = vmax.f32 %v1893_v17, 0.0  ;;  %v1902_v12 = vmax.f32 %v1894_v58, 0.0  ;;  %v1272_v25 = vadd.f32 %v1264_v6, %v1167_v37  ;;  %v1273_v41 = vadd.f32 %v1265_v18, %v1168_v29 }
 0x20a   : > { %v1308_v24 = vadd.f32 %v1300_v51, %v1203_v42  ;;  %v1309_v50 = vadd.f32 %v1301_v14, %v1204_v53  ;;  %v1337_v3 = vmul.f32 %v4373_v46, %v6153_v52  ;;  %v1344_v1 = vadd.f32 %v1336_v49, %v1239_v4  ;;  %3601 = vmatpush3.bf16.msra.mxu1 %v3757_v36  ;;  %v6154_v53 = vld [vmem:[#allocation55_spill] sm:$0xff] }
 0x20b   : > { %v1909_v48 = vmin.f32 %v1901_v16, 6.0  ;;  %v1910_v2 = vmin.f32 %v1902_v12, 6.0  ;;  %3602 = vmatprep.subr.bf16.mxu1 %v3759_v43  ;;  %v1598_v32 = vmul.f32 %v6136_v39, %v4288_v47  ;;  %v1599_v9 = vmul.f32 %v6137_v45, %v4288_v47  ;;  %v3765_v52 = vld [vmem:[#allocation9 + $0x30] sm:$0xff]  }
 0x20c   : > { %v1345_v31 = vadd.f32 %v1337_v3, %v1240_v22  ;;  %v1356_v35 = vsel %vm351_vm2, %v1308_v24, 0.0  ;;  %v1365_v5 = vadd.f32 %v1309_v50, %v1273_v41  ;;  %v1630_v13 = vmul.f32 %v6130_v19, %v6116_v54 }
 0x20d   : > { %v1915_v10 = vpack.c.bf16 %v1910_v2, %v1909_v48  ;;  %v1364_v36 = vadd.f32 %v1356_v35, %v1272_v25  ;;  %v1631_v37 = vmul.f32 %v6131_v8, %v6116_v54  ;;  %v1662_v29 = vmul.f32 %v6132_v38, %v6127_v23  ;;  %v3763_v38 = vld [vmem:[#allocation9 + $0x28] sm:$0xff]  }
 0x20e   : > { %v1377_v39 = vsel %vm354_vm3, %v1345_v31, 0.0  ;;  %3603 = vmatpush3.bf16.msra.mxu1 %v3759_v43  ;;  %v1663_v45 = vmul.f32 %v6133_v60, %v6127_v23  ;;  %v1690_v42 = vmul.f32 %v6140_v55, %v4315_v56  ;;  %v1691_v19 = vmul.f32 %v6138_v15, %v4315_v56 }
 0x20f   : > { %3568 = vmatprep.mubr.bf16.mxu1 %v1915_v10  ;;  %v1384_v8 = vadd.f32 %v1364_v36, %v1344_v1  ;;  %v1385_v4 = vadd.f32 %v1377_v39, %v1365_v5  ;;  %3604 = vmatprep.subr.bf16.mxu1 %v3761_v11  ;;  %v1722_v17 = vmul.f32 %v5120_v63, %v4360_v30  ;;  %v6157_v41 = vrot.slane %v6156_v7, 7 }
 0x210   : > { %v1698_v58 = vadd.f32 %v1690_v42, %v1598_v32  ;;  %v1699_v28 = vadd.f32 %v1691_v19, %v1599_v9  ;;  %v1723_v60 = vmul.f32 %v5112_v33, %v4360_v30  ;;  %v1754_v6 = vmul.f32 %v5134_v27, %v4363_v40 }
 0x211   : > { %v1398_v20 = vadd.f32 %v4739_v0, %v1384_v8  ;;  %v1399_v18 = vadd.f32 %v4739_v0, %v1385_v4  ;;  %v1730_v43 = vadd.f32 %v1722_v17, %v1630_v13  ;;  %v1755_v22 = vmul.f32 %v5142_v61, %v4363_v40 }
 0x212   : > { %3605 = vmatpush3.bf16.msra.mxu1 %v3761_v11  ;;  %v1731_v21 = vadd.f32 %v1723_v60, %v1631_v37  ;;  %v1762_v51 = vadd.f32 %v1754_v6, %v1662_v29  ;;  %v1783_v14 = vmul.f32 %v6155_v62, %v4318_v57  ;;  %v1784_v49 = vmul.f32 %v6156_v7, %v4318_v57 }
 0x213   : > { %v1406_v16 = vmax.f32 %v1398_v20, 0.0  ;;  %v1407_v12 = vmax.f32 %v1399_v18, 0.0  ;;  %3606 = vmatprep.subr.bf16.mxu1 %v3763_v38  ;;  %v1763_v25 = vadd.f32 %v1755_v22, %v1663_v45  ;;  %v6158_v24 = vrot.slane %v6155_v62, 7 }
 0x214   : > { %v1791_v3 = vadd.f32 %v1783_v14, %v1698_v58  ;;  %v1792_v1 = vadd.f32 %v1784_v49, %v1699_v28  ;;  %v6160_v2 = vmov %v6157_v41  ;;  %v6161_v5 = vrot.slane %v6156_v7, 1  ;;  %v6165_v14 = vld [vmem:[#allocation47_spill] sm:$0xff] }
 0x215   : > { %v1804_v50 = vsel %vm1071_vm0, %v6158_v24, %v6157_v41  ;;  %v6159_v48 = vmov %v6158_v24  ;;  %v1414_v9 = vmin.f32 %v1406_v16, 6.0  ;;  %v1415_v31 = vmin.f32 %v1407_v12, 6.0 }
 0x216   : > { %v1808_v11 = vsel %vm1071_vm0, %v6160_v2, %v6159_v48  ;;  %v1816_v32 = vmul.f32 %v1804_v50, %v4368_v59  ;;  %v6162_v13 = vrot.slane %v6155_v62, 1  ;;  %3607 = vmatpush3.bf16.msra.mxu1 %v3763_v38  ;;  %v6164_v29 = vmov %v6161_v5  ;;  %v3767_v38 = vld [vmem:[#allocation9 + $0x38] sm:$0xff]  }
 0x217   : > { %v1815_v35 = vmul.f32 %v1808_v11, %v4368_v59  ;;  %v2118_v42 = vmul.f32 %v1808_v11, %v6116_v54  ;;  %v1419_v19 = vpack.c.bf16 %v1415_v31, %v1414_v9  ;;  %v2119_v17 = vmul.f32 %v1804_v50, %v6116_v54  ;;  %3608 = vmatprep.subr.bf16.mxu1 %v3765_v52 }
 0x218   : > { %v1836_v10 = vsel %vm1108_vm1, %v6162_v13, %v6161_v5  ;;  %v1824_v36 = vadd.f32 %v1816_v32, %v1731_v21  ;;  %v6163_v37 = vmov %v6162_v13  ;;  %v2085_v22 = vmul.f32 %v6138_v15, %v4288_v47 }
 0x219   : > { %v1840_v39 = vsel %vm1108_vm1, %v6164_v29, %v6163_v37  ;;  %v1847_v45 = vmul.f32 %v1836_v10, %v4373_v46  ;;  %v1823_v8 = vadd.f32 %v1815_v35, %v1730_v43  ;;  %v2150_v60 = vmul.f32 %v1836_v10, %v6127_v23  ;;  %3545 = vmatmul.mubr.bf16.gmra.mrb[20].mxu0 %v1419_v19 }
 0x21a   : > { %v1848_v4 = vmul.f32 %v1840_v39, %v4373_v46  ;;  %v1872_v28 = vadd.f32 %v1824_v36, %v1792_v1  ;;  %v2151_v6 = vmul.f32 %v1840_v39, %v6127_v23  ;;  %v2084_v43 = vmul.f32 %v6140_v55, %v4288_v47  ;;  %3609 = vmatpush3.bf16.msra.mxu1 %v3765_v52 }
 0x21b   : > { %v1855_v58 = vadd.f32 %v1847_v45, %v1762_v51  ;;  %v1863_v18 = vsel %vm351_vm2, %v1823_v8, 0.0  ;;  %v6166_v49 = vrot.slane %v6165_v14, 7  ;;  %v6167_v51 = vld [vmem:[#allocation46_spill] sm:$0xff]  ;;  %v2116_v15 = vmul.f32 %v5120_v63, %v6116_v54  ;;  %3610 = vmatprep.subr.bf16.mxu1 %v3767_v38 }
 0x21c   : > { %v1856_v20 = vadd.f32 %v1848_v4, %v1763_v25  ;;  %v1871_v21 = vadd.f32 %v1863_v18, %v1791_v3  ;;  %v6168_v16 = vrot.slane %v6167_v51, 7  ;;  %v2117_v3 = vmul.f32 %v5112_v33, %v6116_v54 }
 0x21d   : > { %v6170_v41 = vmov %v6166_v49  ;;  %v6171_v1 = vrot.slane %v6165_v14, 1  ;;  %v6172_v48 = vrot.slane %v6167_v51, 1  ;;  %v2148_v33 = vmul.f32 %v5134_v27, %v6127_v23 }
 0x21e   : > { %v5281_v12 = vsel %vm1071_vm0, %v6168_v16, %v6166_v49  ;;  %v6169_v25 = vmov %v6168_v16  ;;  %v1880_v55 = vsel %vm354_vm3, %v1856_v20, 0.0  ;;  %v1887_v52 = vadd.f32 %v1871_v21, %v1855_v58  ;;  %3611 = vmatpush3.bf16.msra.mxu1 %v3767_v38 }
 0x21f   : > { %v5289_v24 = vsel %vm1071_vm0, %v6170_v41, %v6169_v25  ;;  %v5303_v2 = vsel %vm1108_vm1, %v6172_v48, %v6171_v1  ;;  %v6173_v32 = vmov %v6172_v48  ;;  %v6174_v9 = vmov %v6171_v1  ;;  %v6175_v48 = vld [vmem:[#allocation64_spill] sm:$0xff] }
 0x220   : > { %v5311_v63 = vsel %vm1108_vm1, %v6174_v9, %v6173_v32  ;;  %v1888_v31 = vadd.f32 %v1880_v55, %v1872_v28  ;;  %v2149_v35 = vmul.f32 %v5142_v61, %v6127_v23  ;;  %v2176_v5 = vmul.f32 %v6155_v62, %v4315_v56 }
 0x221   : > { %v2177_v13 = vmul.f32 %v6156_v7, %v4315_v56  ;;  %v2208_v36 = vmul.f32 %v1808_v11, %v4360_v30  ;;  %v2209_v37 = vmul.f32 %v1804_v50, %v4360_v30  ;;  %v1895_v29 = vadd.f32 %v4739_v0, %v1887_v52  ;;  %v6177_v52 = vld [vmem:[#allocation66_spill] sm:$0xff] }
 0x222   : > { %v1896_v45 = vadd.f32 %v4739_v0, %v1888_v31  ;;  %v2210_v27 = vmul.f32 %v5289_v24, %v4360_v30  ;;  %v2211_v61 = vmul.f32 %v5281_v12, %v4360_v30  ;;  %v2184_v19 = vadd.f32 %v2176_v5, %v2084_v43 }
 0x223   : > { %v2185_v62 = vadd.f32 %v2177_v13, %v2085_v22  ;;  %v2216_v8 = vadd.f32 %v2208_v36, %v2116_v15  ;;  %v2217_v4 = vadd.f32 %v2209_v37, %v2117_v3  ;;  %v1903_v7 = vmax.f32 %v1895_v29, 0.0 }
 0x224   : > { %v1904_v58 = vmax.f32 %v1896_v45, 0.0  ;;  %v2218_v11 = vadd.f32 %v2210_v27, %v2118_v42  ;;  %v2219_v28 = vadd.f32 %v2211_v61, %v2119_v17  ;;  %v2240_v50 = vmul.f32 %v1836_v10, %v4363_v40 }
 0x225   : > { %v2241_v20 = vmul.f32 %v1840_v39, %v4363_v40  ;;  %v2242_v18 = vmul.f32 %v5303_v2, %v4363_v40  ;;  %v2243_v21 = vmul.f32 %v5311_v63, %v4363_v40  ;;  %v1911_v49 = vmin.f32 %v1903_v7, 6.0 }
 0x226   : > { %v1912_v38 = vmin.f32 %v1904_v58, 6.0  ;;  %v2269_v43 = vmul.f32 %v6167_v51, %v4318_v57  ;;  %v2270_v22 = vmul.f32 %v6165_v14, %v4318_v57  ;;  %v2248_v42 = vadd.f32 %v2240_v50, %v2148_v33  ;;  %v6178_v33 = vld [vmem:[#allocation67_spill] sm:$0xff]  ;;  %v6179_v58 = vld [vmem:[#allocation68_spill] sm:$0xff] }
 0x227   : > { %v2249_v17 = vadd.f32 %v2241_v20, %v2149_v35  ;;  %v2250_v16 = vadd.f32 %v2242_v18, %v2150_v60  ;;  %v2251_v10 = vadd.f32 %v2243_v21, %v2151_v6  ;;  %v2301_v15 = vmul.f32 %v5289_v24, %v4368_v59  ;;  %v6176_v6 = vld [vmem:[#allocation26_spill] sm:$0xff] }
 0x228   : > { %v1916_v25 = vpack.c.bf16 %v1912_v38, %v1911_v49  ;;  %v2277_v39 = vadd.f32 %v2269_v43, %v2184_v19  ;;  %v2278_v41 = vadd.f32 %v2270_v22, %v2185_v62  ;;  %v2302_v55 = vmul.f32 %v5281_v12, %v4368_v59  ;;  %v6181_v18 = vld [vmem:[#allocation54_spill] sm:$0xff] }
 0x229   : > { %v2333_v3 = vmul.f32 %v5303_v2, %v4373_v46  ;;  %v2334_v1 = vmul.f32 %v5311_v63, %v4373_v46  ;;  %v2303_v32 = vmul.f32 %v6175_v48, %v4368_v59  ;;  %v2309_v60 = vadd.f32 %v2301_v15, %v2216_v8 }
 0x22a   : > { %3569 = vmatmul.mubr.bf16.gmra.mrb[20].mxu1 %v1916_v25  ;;  %v2304_v9 = vmul.f32 %v6176_v6, %v4368_v59  ;;  %v2335_v31 = vmul.f32 %v6177_v52, %v4373_v46  ;;  %v2336_v35 = vmul.f32 %v6178_v33, %v4373_v46  ;;  %v2310_v5 = vadd.f32 %v2302_v55, %v2217_v4  ;;  %v6180_v4 = vld [vmem:[#allocation69_spill] sm:$0xff] }
 0x22b   : > { %v2341_v13 = vadd.f32 %v2333_v3, %v2248_v42  ;;  %v2342_v36 = vadd.f32 %v2334_v1, %v2249_v17  ;;  %v2311_v37 = vadd.f32 %v2303_v32, %v2218_v11  ;;  %v2349_v29 = vsel %vm351_vm2, %v2309_v60, 0.0  ;;  %v6191_v32 = vld [vmem:[#allocation53_spill] sm:$0xff] }
 0x22c   : > { %v2312_v45 = vadd.f32 %v2304_v9, %v2219_v28  ;;  %v2343_v27 = vadd.f32 %v2335_v31, %v2250_v16  ;;  %v2344_v61 = vadd.f32 %v2336_v35, %v2251_v10  ;;  %v2357_v19 = vadd.f32 %v2349_v29, %v2277_v39  ;;  %v6183_v28 = vld [vmem:[#allocation39_spill] sm:$0xff]  ;;  %v6193_v9 = vld [vmem:[#allocation52_spill] sm:$0xff] }
 0x22d   : > { %v2358_v62 = vadd.f32 %v2310_v5, %v2278_v41  ;;  %v2366_v8 = vsel %vm354_vm3, %v2342_v36, 0.0  ;;  %v2351_v7 = vsel %vm351_vm2, %v2311_v37, 0.0  ;;  %v6182_v21 = vrot.slane %v6181_v18, 7 }
 0x22e   : > { %v2359_v50 = vadd.f32 %v2351_v7, %v6179_v58  ;;  %v2360_v20 = vadd.f32 %v2312_v45, %v6180_v4  ;;  %v2368_v11 = vsel %vm354_vm3, %v2344_v61, 0.0  ;;  %v6184_v49 = vrot.slane %v6183_v28, 7 }
 0x22f   : > { %v2373_v43 = vadd.f32 %v2357_v19, %v2341_v13  ;;  %v2374_v22 = vadd.f32 %v2366_v8, %v2358_v62  ;;  %v6186_v17 = vmov %v6182_v21  ;;  %v6187_v10 = vrot.slane %v6181_v18, 1 }
 0x230   : > { %v5371_v38 = vsel %vm1071_vm0, %v6184_v49, %v6182_v21  ;;  %v6185_v42 = vmov %v6184_v49  ;;  %v6188_v25 = vrot.slane %v6183_v28, 1  ;;  %v2375_v41 = vadd.f32 %v2359_v50, %v2343_v27  ;;  %v6205_v21 = vld [vmem:[#allocation49_spill] sm:$0xff] }
 0x231   : > { %v5379_v16 = vsel %vm1071_vm0, %v6186_v17, %v6185_v42  ;;  %v2376_v15 = vadd.f32 %v2368_v11, %v2360_v20  ;;  %v6190_v3 = vmov %v6187_v10  ;;  %v6192_v60 = vrot.slane %v6191_v32, 7 }
 0x232   : > { %v5387_v39 = vsel %vm1108_vm1, %v6188_v25, %v6187_v10  ;;  %v6189_v55 = vmov %v6188_v25  ;;  %v6194_v31 = vrot.slane %v6193_v9, 7  ;;  %v2381_v5 = vadd.f32 %v4739_v0, %v2373_v43  ;;  %v6207_v43 = vld [vmem:[#allocation48_spill] sm:$0xff] }
 0x233   : > { %v5395_v1 = vsel %vm1108_vm1, %v6190_v3, %v6189_v55  ;;  %v2382_v13 = vadd.f32 %v4739_v0, %v2374_v22  ;;  %v6197_v37 = vmov %v6192_v60  ;;  %v6199_v45 = vrot.slane %v6191_v32, 1 }
 0x234   : > { %v5403_v35 = vsel %vm1071_vm0, %v6194_v31, %v6192_v60  ;;  %v6196_v36 = vmov %v6194_v31  ;;  %v6200_v27 = vrot.slane %v6193_v9, 1  ;;  %v2383_v19 = vadd.f32 %v4739_v0, %v2375_v41 }
 0x235   : > { %6195 = vst [vmem:[#allocation22_spill] sm:$0xff] %v5403_v35  ;;  %v5413_v29 = vsel %vm1071_vm0, %v6197_v37, %v6196_v36  ;;  %v2384_v62 = vadd.f32 %v4739_v0, %v2376_v15  ;;  %v6203_v7 = vmov %v6199_v45  ;;  %v2576_v50 = vmul.f32 %v6183_v28, %v4288_v47 }
 0x236   : > { %6198 = vst [vmem:[#allocation34_spill] sm:$0xff] %v5413_v29  ;;  %v5421_v61 = vsel %vm1108_vm1, %v6200_v27, %v6199_v45  ;;  %v6202_v8 = vmov %v6200_v27  ;;  %v2389_v4 = vmax.f32 %v2381_v5, 0.0  ;;  %v2390_v20 = vmax.f32 %v2382_v13, 0.0 }
 0x237   : > { %6201 = vst [vmem:[#allocation35_spill] sm:$0xff] %v5421_v61  ;;  %v5431_v58 = vsel %vm1108_vm1, %v6203_v7, %v6202_v8  ;;  %v2577_v11 = vmul.f32 %v6181_v18, %v4288_v47  ;;  %v6206_v49 = vrot.slane %v6205_v21, 7  ;;  %v6208_v0 = vrot.slane %v6207_v43, 7 }
 0x238   : > { %6204 = vst [vmem:[#allocation41_spill] sm:$0xff] %v5431_v58  ;;  %v2391_v42 = vmax.f32 %v2383_v19, 0.0  ;;  %v2392_v17 = vmax.f32 %v2384_v62, 0.0  ;;  %v2608_v15 = vmul.f32 %v5379_v16, %v6116_v54  ;;  %v2397_v55 = vmin.f32 %v2389_v4, 6.0 }
 0x239   : > { %v5443_v22 = vsel %vm1071_vm0, %v6208_v0, %v6206_v49  ;;  %v6209_v10 = vmov %v6208_v0  ;;  %v6210_v25 = vmov %v6206_v49  ;;  %v2398_v3 = vmin.f32 %v2390_v20, 6.0 }
 0x23a   : > { %v5451_v41 = vsel %vm1071_vm0, %v6210_v25, %v6209_v10  ;;  %v2609_v60 = vmul.f32 %v5371_v38, %v6116_v54  ;;  %v2610_v31 = vmul.f32 %v5413_v29, %v6116_v54  ;;  %v2399_v5 = vmin.f32 %v2391_v42, 6.0 }
 0x23b   : > { %v2400_v13 = vmin.f32 %v2392_v17, 6.0  ;;  %v2611_v36 = vmul.f32 %v5403_v35, %v6116_v54  ;;  %v6211_v37 = vrot.slane %v6205_v21, 1  ;;  %v6212_v45 = vrot.slane %v6207_v43, 1 }
 0x23c   : > { %v2405_v19 = vpack.c.bf16 %v2398_v3, %v2397_v55  ;;  %v2640_v4 = vmul.f32 %v5387_v39, %v6127_v23  ;;  %v2641_v20 = vmul.f32 %v5395_v1, %v6127_v23  ;;  %v2642_v0 = vmul.f32 %v5421_v61, %v6127_v23 }
 0x23d   : > { %v5467_v27 = vsel %vm1108_vm1, %v6212_v45, %v6211_v37  ;;  %v6213_v62 = vmov %v6212_v45  ;;  %v6214_v8 = vmov %v6211_v37  ;;  %v2406_v49 = vpack.c.bf16 %v2400_v13, %v2399_v5 }
 0x23e   : > { %v5475_v7 = vsel %vm1108_vm1, %v6214_v8, %v6213_v62  ;;  %v2643_v42 = vmul.f32 %v5431_v58, %v6127_v23  ;;  %v2668_v17 = vmul.f32 %v6193_v9, %v4315_v56  ;;  %3588 = vmatprep.mubr.bf16.mxu0 %v2405_v19  ;;  %v2669_v10 = vmul.f32 %v6191_v32, %v4315_v56 }
 0x23f   : > { %v2700_v25 = vmul.f32 %v5413_v29, %v4360_v30  ;;  %v2701_v55 = vmul.f32 %v5403_v35, %v4360_v30  ;;  %v2702_v3 = vmul.f32 %v5451_v41, %v4360_v30  ;;  %3589 = vmatmul.mubr.bf16.vlgmr.msra.gmra.mrb[24].mxu0 %v2406_v49  ;;  %v2703_v13 = vmul.f32 %v5443_v22, %v4360_v30 }
 0x240   : > { %v2676_v5 = vadd.f32 %v2668_v17, %v2576_v50  ;;  %v2732_v37 = vmul.f32 %v5421_v61, %v4363_v40  ;;  %v2733_v45 = vmul.f32 %v5431_v58, %v4363_v40  ;;  %v2677_v19 = vadd.f32 %v2669_v10, %v2577_v11 }
 0x241   : > { %v2708_v62 = vadd.f32 %v2700_v25, %v2608_v15  ;;  %v2709_v8 = vadd.f32 %v2701_v55, %v2609_v60  ;;  %v5501_v44 = vadd.f32 %v2702_v3, %v2610_v31  ;;  %v5503_v35 = vadd.f32 %v2703_v13, %v2611_v36 }
 0x242   : > { %v2734_v49 = vmul.f32 %v5467_v27, %v4363_v40  ;;  %v2735_v50 = vmul.f32 %v5475_v7, %v4363_v40  ;;  %v2740_v17 = vadd.f32 %v2732_v37, %v2640_v4  ;;  %v2741_v29 = vadd.f32 %v2733_v45, %v2641_v20 }
 0x243   : > { %v2761_v61 = vmul.f32 %v6207_v43, %v4318_v57  ;;  %v2762_v11 = vmul.f32 %v6205_v21, %v4318_v57  ;;  %v2793_v15 = vmul.f32 %v5451_v41, %v4368_v59  ;;  %v2794_v36 = vmul.f32 %v5443_v22, %v4368_v59 }
 0x244   : > { %v5515_v60 = vadd.f32 %v2734_v49, %v2642_v0  ;;  %v5517_v31 = vadd.f32 %v2735_v50, %v2643_v42  ;;  %v2825_v4 = vmul.f32 %v5467_v27, %v4373_v46  ;;  %v2826_v55 = vmul.f32 %v5475_v7, %v4373_v46  ;;  %v6216_v50 = vld [vmem:[#allocation63_spill] sm:$0xff] }
 0x245   : > { %v2769_v20 = vadd.f32 %v2761_v61, %v2676_v5  ;;  %v2770_v10 = vadd.f32 %v2762_v11, %v2677_v19  ;;  %v2801_v25 = vadd.f32 %v2793_v15, %v2708_v62  ;;  %v2802_v3 = vadd.f32 %v2794_v36, %v2709_v8 }
 0x246   : > { %v2833_v13 = vadd.f32 %v2825_v4, %v2740_v17  ;;  %v2088_v0 = vmul.f32 %v6167_v51, %v4288_v47  ;;  %v2089_v42 = vmul.f32 %v6165_v14, %v4288_v47  ;;  %v2834_v37 = vadd.f32 %v2826_v55, %v2741_v29  ;;  %v6215_v29 = vld [vmem:[#allocation62_spill] sm:$0xff] }
 0x247   : > { %v2841_v45 = vsel %vm351_vm2, %v2801_v25, 0.0  ;;  %v2120_v61 = vmul.f32 %v5289_v24, %v6116_v54  ;;  %v2121_v5 = vmul.f32 %v5281_v12, %v6116_v54  ;;  %v2850_v62 = vadd.f32 %v2802_v3, %v2770_v10  ;;  %v5556_v10 = vld [vmem:[%s5912_s4] ss:$0 sm:$0xff] }
 0x248   : > { %v2849_v19 = vadd.f32 %v2841_v45, %v2769_v20  ;;  %v2152_v8 = vmul.f32 %v5303_v2, %v6127_v23  ;;  %v2153_v51 = vmul.f32 %v5311_v63, %v6127_v23  ;;  %v2858_v14 = vsel %vm354_vm3, %v2834_v37, 0.0 }
 0x249   : > { %v2180_v49 = vmul.f32 %v6215_v29, %v4315_v56  ;;  %v2181_v24 = vmul.f32 %v6216_v50, %v4315_v56  ;;  %v2212_v12 = vmul.f32 %v6175_v48, %v4360_v30  ;;  %v2866_v11 = vadd.f32 %v2858_v14, %v2850_v62 }
 0x24a   : > { %v2865_v17 = vadd.f32 %v2849_v19, %v2833_v13  ;;  %v2213_v2 = vmul.f32 %v6176_v6, %v4360_v30  ;;  %v2244_v63 = vmul.f32 %v6177_v52, %v4363_v40  ;;  %v2245_v20 = vmul.f32 %v6178_v33, %v4363_v40 }
 0x24b   : > { %v2188_v15 = vadd.f32 %v2180_v49, %v2088_v0  ;;  %v2189_v36 = vadd.f32 %v2181_v24, %v2089_v42  ;;  %v2220_v4 = vadd.f32 %v2212_v12, %v2120_v61  ;;  %v2874_v55 = vadd.f32 %v5556_v10, %v2866_v11 }
 0x24c   : > { %v2873_v25 = vadd.f32 %v5556_v10, %v2865_v17  ;;  %v2221_v3 = vadd.f32 %v2213_v2, %v2121_v5  ;;  %v2252_v13 = vadd.f32 %v2244_v63, %v2152_v8  ;;  %v2253_v37 = vadd.f32 %v2245_v20, %v2153_v51  ;;  %v6217_v20 = vld [vmem:[#allocation20_spill] sm:$0xff] }
 0x24d   : > { %v2273_v0 = vmul.f32 %v6183_v28, %v4318_v57  ;;  %v2274_v42 = vmul.f32 %v6181_v18, %v4318_v57  ;;  %v2305_v45 = vmul.f32 %v5379_v16, %v4368_v59  ;;  %v2882_v19 = vmax.f32 %v2874_v55, 0.0  ;;  %v6218_v55 = vld [vmem:[#allocation17_spill] sm:$0xff] }
 0x24e   : > { %v2881_v61 = vmax.f32 %v2873_v25, 0.0  ;;  %v2306_v62 = vmul.f32 %v5371_v38, %v4368_v59  ;;  %v2337_v14 = vmul.f32 %v5387_v39, %v4373_v46  ;;  %v2338_v49 = vmul.f32 %v5395_v1, %v4373_v46 }
 0x24f   : > { %v2281_v5 = vadd.f32 %v2273_v0, %v2188_v15  ;;  %v2282_v8 = vadd.f32 %v2274_v42, %v2189_v36  ;;  %v2313_v51 = vadd.f32 %v2305_v45, %v2220_v4  ;;  %v2890_v12 = vmin.f32 %v2882_v19, 6.0  ;;  %v6219_v0 = vld [vmem:[#allocation70_spill] sm:$0xff]  ;;  %v6220_v45 = vld [vmem:[#allocation71_spill] sm:$0xff] }
 0x250   : > { %v2889_v24 = vmin.f32 %v2881_v61, 6.0  ;;  %v2314_v17 = vadd.f32 %v2306_v62, %v2221_v3  ;;  %v2345_v11 = vadd.f32 %v2337_v14, %v2252_v13  ;;  %v2346_v2 = vadd.f32 %v2338_v49, %v2253_v37  ;;  %v6221_v49 = vld [vmem:[#allocation73_spill] sm:$0xff] }
 0x251   : > { %v2353_v63 = vsel %vm351_vm2, %v2313_v51, 0.0  ;;  %v2795_v25 = vmul.f32 %v6217_v20, %v4368_v59  ;;  %v2796_v58 = vmul.f32 %v6218_v55, %v4368_v59  ;;  %v2827_v42 = vmul.f32 %v6219_v0, %v4373_v46 }
 0x252   : > { %v2897_v15 = vpack.c.bf16 %v2890_v12, %v2889_v24  ;;  %v2361_v36 = vadd.f32 %v2353_v63, %v2281_v5  ;;  %v2362_v4 = vadd.f32 %v2314_v17, %v2282_v8  ;;  %v2370_v3 = vsel %vm354_vm3, %v2346_v2, 0.0  ;;  %v6222_v12 = vld [vmem:[#allocation72_spill] sm:$0xff] }
 0x253   : > { %v2803_v13 = vadd.f32 %v2795_v25, %v5501_v44  ;;  %v2804_v37 = vadd.f32 %v2796_v58, %v5503_v35  ;;  %v2828_v61 = vmul.f32 %v6220_v45, %v4373_v46  ;;  %v2835_v14 = vadd.f32 %v2827_v42, %v5515_v60 }
 0x254   : > { %3612 = vmatprep.mubr.bf16.mxu1 %v2897_v15  ;;  %v2377_v19 = vadd.f32 %v2361_v36, %v2345_v11  ;;  %v2378_v62 = vadd.f32 %v2370_v3, %v2362_v4  ;;  %v2580_v5 = vmul.f32 %v6207_v43, %v4288_v47  ;;  %v2581_v35 = vmul.f32 %v6205_v21, %v4288_v47  ;;  %v6223_v36 = vld [vmem:[#allocation27_spill] sm:$0xff] }
 0x255   : > { %v2836_v8 = vadd.f32 %v2828_v61, %v5517_v31  ;;  %v2843_v51 = vsel %vm351_vm2, %v2803_v13, 0.0  ;;  %v2852_v44 = vadd.f32 %v2804_v37, %v6221_v49  ;;  %v2612_v60 = vmul.f32 %v5451_v41, %v6116_v54  ;;  %v6224_v41 = vld [vmem:[#allocation65_spill] sm:$0xff]  ;;  %v6226_v13 = vld [vmem:[#allocation38_spill] sm:$0xff] }
 0x256   : > { %v2385_v58 = vadd.f32 %v5556_v10, %v2377_v19  ;;  %v2386_v24 = vadd.f32 %v5556_v10, %v2378_v62  ;;  %v2851_v17 = vadd.f32 %v2843_v51, %v6222_v12  ;;  %v2613_v31 = vmul.f32 %v5443_v22, %v6116_v54 }
 0x257   : > { %v2860_v43 = vsel %vm354_vm3, %v2836_v8, 0.0  ;;  %v2644_v11 = vmul.f32 %v5467_v27, %v6127_v23  ;;  %v2645_v21 = vmul.f32 %v5475_v7, %v6127_v23  ;;  %v2672_v4 = vmul.f32 %v6223_v36, %v4315_v56 }
 0x258   : > { %v2393_v2 = vmax.f32 %v2385_v58, 0.0  ;;  %v2394_v63 = vmax.f32 %v2386_v24, 0.0  ;;  %v2867_v25 = vadd.f32 %v2851_v17, %v2835_v14  ;;  %v2868_v15 = vadd.f32 %v2860_v43, %v2852_v44 }
 0x259   : > { %v2673_v42 = vmul.f32 %v6224_v41, %v4315_v56  ;;  %v6225_v3 = vrot.slane %v6154_v53, 7  ;;  %v6227_v22 = vrot.slane %v6226_v13, 7  ;;  %v2680_v51 = vadd.f32 %v2672_v4, %v2580_v5 }
 0x25a   : > { %v2401_v19 = vmin.f32 %v2393_v2, 6.0  ;;  %v2402_v62 = vmin.f32 %v2394_v63, 6.0  ;;  %v2875_v14 = vadd.f32 %v5556_v10, %v2867_v25  ;;  %v2876_v8 = vadd.f32 %v5556_v10, %v2868_v15 }
 0x25b   : > { %v5618_v27 = vsel %vm1071_vm0, %v6227_v22, %v6225_v3  ;;  %v6228_v7 = vmov %v6227_v22  ;;  %v6229_v37 = vmov %v6225_v3  ;;  %v2681_v49 = vadd.f32 %v2673_v42, %v2581_v35 }
 0x25c   : > { %v5626_v61 = vsel %vm1071_vm0, %v6229_v37, %v6228_v7  ;;  %v2704_v44 = vmul.f32 %v6217_v20, %v4360_v30  ;;  %v2705_v58 = vmul.f32 %v6218_v55, %v4360_v30  ;;  %v2407_v24 = vpack.c.bf16 %v2402_v62, %v2401_v19  ;;  %v6234_v37 = vld [vmem:[#allocation58_spill] sm:$0xff]  ;;  %v6235_v19 = vld [vmem:[#allocation59_spill] sm:$0xff] }
 0x25d   : > { %v2883_v12 = vmax.f32 %v2875_v14, 0.0  ;;  %v2884_v17 = vmax.f32 %v2876_v8, 0.0  ;;  %v6230_v43 = vrot.slane %v6154_v53, 1  ;;  %v6231_v2 = vrot.slane %v6226_v13, 1 }
 0x25e   : > { %v2712_v25 = vadd.f32 %v2704_v44, %v2612_v60  ;;  %v2713_v5 = vadd.f32 %v2705_v58, %v2613_v31  ;;  %v2736_v42 = vmul.f32 %v6219_v0, %v4363_v40  ;;  %3592 = vmatprep.mubr.bf16.mxu0 %v2407_v24  ;;  %v2737_v7 = vmul.f32 %v6220_v45, %v4363_v40 }
 0x25f   : > { %v5640_v63 = vsel %vm1108_vm1, %v6231_v2, %v6230_v43  ;;  %v6232_v35 = vmov %v6231_v2  ;;  %v6233_v15 = vmov %v6230_v43  ;;  %v2891_v3 = vmin.f32 %v2883_v12, 6.0 }
 0x260   : > { %v5648_v4 = vsel %vm1108_vm1, %v6233_v15, %v6232_v35  ;;  %v2892_v22 = vmin.f32 %v2884_v17, 6.0  ;;  %v2773_v60 = vadd.f32 %v6234_v37, %v2680_v51  ;;  %v2744_v31 = vadd.f32 %v2736_v42, %v2644_v11 }
 0x261   : > { %v2774_v13 = vadd.f32 %v6235_v19, %v2681_v49  ;;  %v2797_v53 = vmul.f32 %v5626_v61, %v4368_v59  ;;  %v2798_v62 = vmul.f32 %v5618_v27, %v4368_v59  ;;  %v2745_v8 = vadd.f32 %v2737_v7, %v2645_v21 }
 0x262   : > { %v2898_v14 = vpack.c.bf16 %v2892_v22, %v2891_v3  ;;  %v2829_v44 = vmul.f32 %v5640_v63, %v4373_v46  ;;  %v2830_v58 = vmul.f32 %v5648_v4, %v4373_v46  ;;  %v2090_v11 = vmul.f32 %v6215_v29, %v4288_v47 }
 0x263   : > { %v2805_v24 = vadd.f32 %v2797_v53, %v2712_v25  ;;  %v2806_v12 = vadd.f32 %v2798_v62, %v2713_v5  ;;  %v2091_v51 = vmul.f32 %v6216_v50, %v4288_v47  ;;  %v2122_v21 = vmul.f32 %v6175_v48, %v6116_v54 }
 0x264   : > { %3613 = vmatmul.mubr.bf16.vlgmr.msra.gmra.mrb[24].mxu1 %v2898_v14  ;;  %v2837_v49 = vadd.f32 %v2829_v44, %v2744_v31  ;;  %v2838_v17 = vadd.f32 %v2830_v58, %v2745_v8  ;;  %v2123_v43 = vmul.f32 %v6176_v6, %v6116_v54  ;;  %v2154_v5 = vmul.f32 %v6177_v52, %v6127_v23  ;;  %v6238_v14 = vld [vmem:[#allocation35_spill] sm:$0xff] }
 0x265   : > { %v2845_v2 = vsel %vm351_vm2, %v2805_v24, 0.0  ;;  %v2854_v25 = vadd.f32 %v2806_v12, %v2774_v13  ;;  %v2155_v29 = vmul.f32 %v6178_v33, %v6127_v23  ;;  %v2182_v48 = vmul.f32 %v6183_v28, %v4315_v56  ;;  %v6236_v13 = vld [vmem:[#allocation34_spill] sm:$0xff]  ;;  %v6239_v12 = vld [vmem:[#allocation41_spill] sm:$0xff] }
 0x266   : > { %v2853_v50 = vadd.f32 %v2845_v2, %v2773_v60  ;;  %v2862_v35 = vsel %vm354_vm3, %v2838_v17, 0.0  ;;  %v2183_v6 = vmul.f32 %v6181_v18, %v4315_v56  ;;  %v2214_v42 = vmul.f32 %v5379_v16, %v4360_v30 }
 0x267   : > { %v2870_v15 = vadd.f32 %v2862_v35, %v2854_v25  ;;  %v2215_v52 = vmul.f32 %v5371_v38, %v4360_v30  ;;  %v2246_v33 = vmul.f32 %v5387_v39, %v4363_v40  ;;  %v2190_v22 = vadd.f32 %v2182_v48, %v2090_v11 }
 0x268   : > { %v2869_v3 = vadd.f32 %v2853_v50, %v2837_v49  ;;  %v2191_v7 = vadd.f32 %v2183_v6, %v2091_v51  ;;  %v2247_v37 = vmul.f32 %v5395_v1, %v4363_v40  ;;  %v2222_v60 = vadd.f32 %v2214_v42, %v2122_v21  ;;  %v6237_v1 = vld [vmem:[#allocation22_spill] sm:$0xff] }
 0x269   : > { %v2878_v28 = vadd.f32 %v5556_v10, %v2870_v15  ;;  %v2223_v56 = vadd.f32 %v2215_v52, %v2123_v43  ;;  %v2254_v18 = vadd.f32 %v2246_v33, %v2154_v5  ;;  %v2275_v38 = vmul.f32 %v6193_v9, %v4318_v57  ;;  %v6241_v52 = vld [vmem:[#allocation57_spill] sm:$0xff] }
 0x26a   : > { %v2877_v31 = vadd.f32 %v5556_v10, %v2869_v3  ;;  %v2255_v16 = vadd.f32 %v2247_v37, %v2155_v29  ;;  %v2276_v39 = vmul.f32 %v6191_v32, %v4318_v57  ;;  %v2307_v53 = vmul.f32 %v6236_v13, %v4368_v59 }
 0x26b   : > { %v2886_v19 = vmax.f32 %v2878_v28, 0.0  ;;  %v2308_v62 = vmul.f32 %v6237_v1, %v4368_v59  ;;  %v2339_v8 = vmul.f32 %v6238_v14, %v4373_v46  ;;  %v2283_v58 = vadd.f32 %v2275_v38, %v2190_v22  ;;  %v6246_v38 = vld [vmem:[#allocation24_spill] sm:$0xff] }
 0x26c   : > { %v2885_v44 = vmax.f32 %v2877_v31, 0.0  ;;  %v2284_v24 = vadd.f32 %v2276_v39, %v2191_v7  ;;  %v2340_v11 = vmul.f32 %v6239_v12, %v4373_v46  ;;  %v2315_v51 = vadd.f32 %v2307_v53, %v2222_v60 }
 0x26d   : > { %v2894_v9 = vmin.f32 %v2886_v19, 6.0  ;;  %v2316_v49 = vadd.f32 %v2308_v62, %v2223_v56  ;;  %v2347_v32 = vadd.f32 %v2339_v8, %v2254_v18  ;;  %v2582_v43 = vmul.f32 %v6223_v36, %v4288_v47  ;;  %v6243_v18 = vld [vmem:[#allocation18_spill] sm:$0xff]  ;;  %v6247_v19 = vld [vmem:[#allocation25_spill] sm:$0xff] }
 0x26e   : > { %v2893_v17 = vmin.f32 %v2885_v44, 6.0  ;;  %v2348_v21 = vadd.f32 %v2340_v11, %v2255_v16  ;;  %v2583_v2 = vmul.f32 %v6224_v41, %v4288_v47  ;;  %v2355_v25 = vsel %vm351_vm2, %v2315_v51, 0.0  ;;  %v6240_v41 = vld [vmem:[#allocation56_spill] sm:$0xff]  ;;  %v6245_v16 = vld [vmem:[#allocation23_spill] sm:$0xff] }
 0x26f   : > { %v2364_v5 = vadd.f32 %v2316_v49, %v2284_v24  ;;  %v2614_v29 = vmul.f32 %v6217_v20, %v6116_v54  ;;  %v2615_v50 = vmul.f32 %v6218_v55, %v6116_v54  ;;  %v2363_v48 = vadd.f32 %v2355_v25, %v2283_v58  ;;  %v1557_v25 = vld [vmem:[%s4220_s20 + $0x10] sm:$0xff] }
 0x270   : > { %v2899_v35 = vpack.c.bf16 %v2894_v9, %v2893_v17  ;;  %v2372_v6 = vsel %vm354_vm3, %v2348_v21, 0.0  ;;  %v2646_v36 = vmul.f32 %v6219_v0, %v6127_v23  ;;  %v2647_v47 = vmul.f32 %v6220_v45, %v6127_v23  ;;  %v6242_v45 = vld [vmem:[#allocation19_spill] sm:$0xff] }
 0x271   : > { %v2380_v15 = vadd.f32 %v2372_v6, %v2364_v5  ;;  %v2682_v42 = vadd.f32 %v6240_v41, %v2582_v43  ;;  %v2683_v33 = vadd.f32 %v6241_v52, %v2583_v2  ;;  %v2379_v20 = vadd.f32 %v2363_v48, %v2347_v32  ;;  %v1558_v48 = vld [vmem:[%s4220_s20 + $0x18] sm:$0xff] }
 0x272   : > { %3616 = vmatprep.mubr.bf16.mxu1 %v2899_v35  ;;  %v2706_v54 = vmul.f32 %v5626_v61, %v4360_v30  ;;  %v2707_v55 = vmul.f32 %v5618_v27, %v4360_v30  ;;  %v2738_v3 = vmul.f32 %v5640_v63, %v4363_v40  ;;  %v2739_v23 = vmul.f32 %v5648_v4, %v4363_v40  ;;  %v6244_v63 = vld [vmem:[#allocation21_spill] sm:$0xff] }
 0x273   : > { %v2388_v0 = vadd.f32 %v5556_v10, %v2380_v15  ;;  %v2768_v22 = vmul.f32 %v4318_v57, %v6242_v45  ;;  %v2387_v7 = vadd.f32 %v5556_v10, %v2379_v20  ;;  %v2767_v30 = vmul.f32 %v4318_v57, %v6243_v18 }
 0x274   : > { %v2714_v37 = vadd.f32 %v2706_v54, %v2614_v29  ;;  %v2715_v28 = vadd.f32 %v2707_v55, %v2615_v50  ;;  %v2746_v60 = vadd.f32 %v2738_v3, %v2646_v36  ;;  %v2747_v56 = vadd.f32 %v2739_v23, %v2647_v47  ;;  %v1555_v50 = vld [vmem:[%s4220_s20] sm:$0xff]  ;;  %v1556_v47 = vld [vmem:[%s4220_s20 + $0x8] sm:$0xff]  ;;  %v3263_v54 = vld [vmem:[%s4220_s20 + $0x50] sm:$0xff] }
 0x275   : > { %v2396_v61 = vmax.f32 %v2388_v0, 0.0  ;;  %v2395_v27 = vmax.f32 %v2387_v7, 0.0  ;;  %v2799_v31 = vmul.f32 %v4368_v59, %v6244_v63  ;;  %v2800_v40 = vmul.f32 %v4368_v59, %v6245_v16  ;;  %v3261_v0 = vld [vmem:[%s4220_s20 + $0x40] sm:$0xff]  ;;  %v1561_v63 = vld [vmem:[%s4220_s20 + $0x30] sm:$0xff] }
 0x276   : > { %v2831_v39 = vmul.f32 %v4373_v46, %v6246_v38  ;;  %v2832_v13 = vmul.f32 %v4373_v46, %v6247_v19  ;;  %v2776_v1 = vadd.f32 %v2768_v22, %v2683_v33  ;;  %v2775_v8 = vadd.f32 %v2767_v30, %v2682_v42  ;;  %v3264_v22 = vld [vmem:[%s4220_s20 + $0x58] sm:$0xff] }
 0x277   : > { %v2404_v4 = vmin.f32 %v2396_v61, 6.0  ;;  %v2403_v53 = vmin.f32 %v2395_v27, 6.0  ;;  %v2807_v62 = vadd.f32 %v2799_v31, %v2714_v37  ;;  %v2808_v14 = vadd.f32 %v2800_v40, %v2715_v28  ;;  %v1559_v40 = vld [vmem:[%s4220_s20 + $0x20] sm:$0xff] }
 0x278   : > { %v2840_v57 = vadd.f32 %v2832_v13, %v2747_v56  ;;  %v2839_v12 = vadd.f32 %v2831_v39, %v2746_v60  ;;  %v3262_v60 = vld [vmem:[%s4220_s20 + $0x48] sm:$0xff]  ;;  %v1562_v39 = vld [vmem:[%s4220_s20 + $0x38] sm:$0xff] }
 0x279   : > { %v2408_v44 = vpack.c.bf16 %v2404_v4, %v2403_v53  ;;  %v2847_v58 = vsel %vm351_vm2, %v2807_v62, 0.0  ;;  %v2856_v24 = vadd.f32 %v2808_v14, %v2776_v1  ;;  %v1560_v1 = vld [vmem:[%s4220_s20 + $0x28] sm:$0xff] }
 0x27a   : > { %v2855_v59 = vadd.f32 %v2847_v58, %v2775_v8  ;;  %v2864_v11 = vsel %vm354_vm3, %v2840_v57, 0.0  ;;  %v3267_v58 = vld [vmem:[%s4220_s20 + $0x70] sm:$0xff] }
 0x27b   : > { %3593 = vmatmul.mubr.bf16.gmra.mrb[28].mxu0 %v2408_v44  ;;  %v2872_v46 = vadd.f32 %v2864_v11, %v2856_v24 }
 0x27c   : > { %v2871_v9 = vadd.f32 %v2855_v59, %v2839_v12  ;;  %v3265_v59 = vld [vmem:[%s4220_s20 + $0x60] sm:$0xff] }
 0x27d   : > { %v2880_v51 = vadd.f32 %v5556_v10, %v2872_v46 }
 0x27e   : > { %v2879_v49 = vadd.f32 %v5556_v10, %v2871_v9  ;;  %v3268_v9 = vld [vmem:[%s4220_s20 + $0x78] sm:$0xff] }
 0x27f   : > { %v2888_v32 = vmax.f32 %v2880_v51, 0.0 }
 0x280   : > { %v2887_v17 = vmax.f32 %v2879_v49, 0.0 }
 0x281   : > { %v2896_v34 = vmin.f32 %v2888_v32, 6.0 }
 0x282   : > { %v2895_v21 = vmin.f32 %v2887_v17, 6.0  ;;  %v3266_v17 = vld [vmem:[%s4220_s20 + $0x68] sm:$0xff] }
 0x284   : > { %v2900_v43 = vpack.c.bf16 %v2896_v34, %v2895_v21 }
 0x286   : > { %3617 = vmatmul.mubr.bf16.gmra.mrb[28].mxu1 %v2900_v43 }
 0x2a4   : > { %v3542_v2 = vpop.f32.mrb[16].mxu0 }
 0x2a5   : > { %v1533_v5 = vadd.f32 %v3542_v2, %v5755_v26  ;;  %v1524_v29 = vpop.f32.mrb[17].mxu0 }
 0x2a6   : > { %v1525_v10 = vadd.f32 %v5755_v26, %v1524_v29  ;;  %v3543_v35 = vpop.f32.mrb[18].mxu0 }
 0x2a7   : > { %v1565_v6 = vadd.f32 %v1557_v25, %v1533_v5  ;;  %v1536_v36 = vadd.f32 %v3543_v35, %v5755_v26  ;;  %v1527_v15 = vpop.f32.mrb[19].mxu0  ;;  %v3287_v5 = vld [vmem:[%s4220_s20 + $0x90] sm:$0xff] }
 0x2a8   : > { %v1563_v41 = vadd.f32 %v1555_v50, %v1525_v10  ;;  %v1528_v42 = vadd.f32 %v5755_v26, %v1527_v15  ;;  %v3285_v10 = vld [vmem:[%s4220_s20 + $0x80] sm:$0xff] }
 0x2a9   : > { %1573 = vst [vmem:[%s5767_s12 + $0x10] sm:$0xff] %v1565_v6  ;;  %v1566_v52 = vadd.f32 %v1558_v48, %v1536_v36  ;;  %v3288_v6 = vld [vmem:[%s4220_s20 + $0x98] sm:$0xff] }
 0x2aa   : > { %1571 = vst [vmem:[%s5767_s12] sm:$0xff] %v1563_v41  ;;  %v1564_v33 = vadd.f32 %v1556_v47, %v1528_v42  ;;  %v3286_v41 = vld [vmem:[%s4220_s20 + $0x88] sm:$0xff] }
 0x2ab   : > { %1574 = vst [vmem:[%s5767_s12 + $0x18] sm:$0xff] %v1566_v52 }
 0x2ac   : > { %1572 = vst [vmem:[%s5767_s12 + $0x8] sm:$0xff] %v1564_v33 }
 0x2d4   : > { %v3566_v20 = vpop.f32.mrb[16].mxu1 }
 0x2d5   : > { %v2024_v55 = vadd.f32 %v3566_v20, %v5755_v26  ;;  %v2015_v3 = vpop.f32.mrb[17].mxu1 }
 0x2d6   : > { %v2016_v23 = vadd.f32 %v5755_v26, %v2015_v3  ;;  %v3567_v45 = vpop.f32.mrb[18].mxu1 }
 0x2d7   : > { %v2056_v7 = vadd.f32 %v3263_v54, %v2024_v55  ;;  %v2027_v37 = vadd.f32 %v3567_v45, %v5755_v26  ;;  %v2018_v28 = vpop.f32.mrb[19].mxu1  ;;  %v3311_v55 = vld [vmem:[%s4220_s20 + $0xd0] sm:$0xff] }
 0x2d8   : > { %v2054_v61 = vadd.f32 %v3261_v0, %v2016_v23  ;;  %v2019_v56 = vadd.f32 %v5755_v26, %v2018_v28  ;;  %v3309_v23 = vld [vmem:[%s4220_s20 + $0xc0] sm:$0xff] }
 0x2d9   : > { %3271 = vst [vmem:[%s5767_s12 + $0x50] sm:$0xff] %v2056_v7  ;;  %v2057_v18 = vadd.f32 %v3264_v22, %v2027_v37  ;;  %v3312_v7 = vld [vmem:[%s4220_s20 + $0xd8] sm:$0xff] }
 0x2da   : > { %3269 = vst [vmem:[%s5767_s12 + $0x40] sm:$0xff] %v2054_v61  ;;  %v2055_v30 = vadd.f32 %v3262_v60, %v2019_v56  ;;  %v3310_v61 = vld [vmem:[%s4220_s20 + $0xc8] sm:$0xff] }
 0x2db   : > { %3272 = vst [vmem:[%s5767_s12 + $0x58] sm:$0xff] %v2057_v18 }
 0x2dc   : > { %3270 = vst [vmem:[%s5767_s12 + $0x48] sm:$0xff] %v2055_v30 }
 0x2ec   : > { %v3546_v27 = vpop.f32.mrb[20].mxu0 }
 0x2ed   : > { %v1549_v31 = vadd.f32 %v3546_v27, %v5755_v26  ;;  %v1540_v16 = vpop.f32.mrb[21].mxu0 }
 0x2ee   : > { %v1541_v4 = vadd.f32 %v5755_v26, %v1540_v16  ;;  %v3547_v38 = vpop.f32.mrb[22].mxu0 }
 0x2ef   : > { %v1569_v19 = vadd.f32 %v1561_v63, %v1549_v31  ;;  %v1552_v13 = vadd.f32 %v3547_v38, %v5755_v26  ;;  %v1543_v53 = vpop.f32.mrb[23].mxu0  ;;  %v3291_v31 = vld [vmem:[%s4220_s20 + $0xb0] sm:$0xff] }
 0x2f0   : > { %v1567_v62 = vadd.f32 %v1559_v40, %v1541_v4  ;;  %v1544_v14 = vadd.f32 %v5755_v26, %v1543_v53  ;;  %v3289_v4 = vld [vmem:[%s4220_s20 + $0xa0] sm:$0xff] }
 0x2f1   : > { %1577 = vst [vmem:[%s5767_s12 + $0x30] sm:$0xff] %v1569_v19  ;;  %v1570_v8 = vadd.f32 %v1562_v39, %v1552_v13  ;;  %v3292_v19 = vld [vmem:[%s4220_s20 + $0xb8] sm:$0xff] }
 0x2f2   : > { %1575 = vst [vmem:[%s5767_s12 + $0x20] sm:$0xff] %v1567_v62  ;;  %v1568_v57 = vadd.f32 %v1560_v1, %v1544_v14  ;;  %v3290_v62 = vld [vmem:[%s4220_s20 + $0xa8] sm:$0xff] }
 0x2f3   : > { %1578 = vst [vmem:[%s5767_s12 + $0x38] sm:$0xff] %v1570_v8 }
 0x2f4   : > { %1576 = vst [vmem:[%s5767_s12 + $0x28] sm:$0xff] %v1568_v57 }
 0x2fd   : > { %v3570_v44 = vpop.f32.mrb[20].mxu1 }
 0x2fe   : > { %v2040_v24 = vadd.f32 %v3570_v44, %v5755_v26  ;;  %v2031_v12 = vpop.f32.mrb[21].mxu1 }
 0x2ff   : > { %v2032_v11 = vadd.f32 %v5755_v26, %v2031_v12  ;;  %v3571_v46 = vpop.f32.mrb[22].mxu1 }
 0x300   : > { %v2060_v51 = vadd.f32 %v3267_v58, %v2040_v24  ;;  %v2043_v49 = vadd.f32 %v3571_v46, %v5755_v26  ;;  %v2034_v32 = vpop.f32.mrb[23].mxu1  ;;  %v3315_v24 = vld [vmem:[%s4220_s20 + $0xf0] sm:$0xff] }
 0x301   : > { %v2058_v34 = vadd.f32 %v3265_v59, %v2032_v11  ;;  %v2035_v21 = vadd.f32 %v5755_v26, %v2034_v32  ;;  %v3313_v11 = vld [vmem:[%s4220_s20 + $0xe0] sm:$0xff] }
 0x302   : > { %3275 = vst [vmem:[%s5767_s12 + $0x70] sm:$0xff] %v2060_v51  ;;  %v2061_v43 = vadd.f32 %v3268_v9, %v2043_v49  ;;  %v3316_v51 = vld [vmem:[%s4220_s20 + $0xf8] sm:$0xff] }
 0x303   : > { %3273 = vst [vmem:[%s5767_s12 + $0x60] sm:$0xff] %v2058_v34  ;;  %v2059_v2 = vadd.f32 %v3266_v17, %v2035_v21  ;;  %v3314_v34 = vld [vmem:[%s4220_s20 + $0xe8] sm:$0xff]  ;;  %s3884_s20 = scalar_lea.vmem %s5861_s17, 4096 }
 0x304   : > { %3276 = vst [vmem:[%s5767_s12 + $0x78] sm:$0xff] %v2061_v43  ;;  %p3885_p10 = scmp.ne.s32.totalorder %s5861_s17, %s3884_s20  ;;  %p3892_p1 = scmp.lt.s32.totalorder %s3890_s10, %s3884_s20 }
 0x305   : > { %3274 = vst [vmem:[%s5767_s12 + $0x68] sm:$0xff] %v2059_v2 }
 0x306   : > { %p3886_p3 = pnand %p3885_p10, %p4166_p5  ;;  %p3893_p2 = por %p3892_p1, %p3891_p12 }
 0x308   : > { %p3887_p7 = pneg %p3886_p3 }
 0x30a   : > { %p3894_p4 = pnand %p3893_p2, %p3887_p7 }
 0x312   : > { %v3590_v25 = vpop.f32.mrb[24].mxu0 }
 0x313   : > { %v2516_v29 = vadd.f32 %v3590_v25, %v5755_v26  ;;  %v2507_v50 = vpop.f32.mrb[25].mxu0 }
 0x314   : > { %v2508_v35 = vadd.f32 %v5755_v26, %v2507_v50  ;;  %v3591_v48 = vpop.f32.mrb[26].mxu0 }
 0x315   : > { %v2548_v36 = vadd.f32 %v3287_v5, %v2516_v29  ;;  %v2519_v15 = vadd.f32 %v3591_v48, %v5755_v26  ;;  %v2510_v47 = vpop.f32.mrb[27].mxu0 }
 0x316   : > { %v2546_v42 = vadd.f32 %v3285_v10, %v2508_v35  ;;  %v2511_v52 = vadd.f32 %v5755_v26, %v2510_v47 }
 0x317   : > { %3295 = vst [vmem:[%s5767_s12 + $0x90] sm:$0xff] %v2548_v36  ;;  %v2549_v33 = vadd.f32 %v3288_v6, %v2519_v15 }
 0x318   : > { %3293 = vst [vmem:[%s5767_s12 + $0x80] sm:$0xff] %v2546_v42  ;;  %v2547_v20 = vadd.f32 %v3286_v41, %v2511_v52 }
 0x319   : > { %3296 = vst [vmem:[%s5767_s12 + $0x98] sm:$0xff] %v2549_v33 }
 0x31a   : > { %3294 = vst [vmem:[%s5767_s12 + $0x88] sm:$0xff] %v2547_v20 }
 0x337   : > { %v3614_v54 = vpop.f32.mrb[24].mxu1 }
 0x338   : > { %v3008_v3 = vadd.f32 %v3614_v54, %v5755_v26  ;;  %v2999_v0 = vpop.f32.mrb[25].mxu1 }
 0x339   : > { %v3000_v45 = vadd.f32 %v5755_v26, %v2999_v0  ;;  %v3615_v22 = vpop.f32.mrb[26].mxu1 }
 0x33a   : > { %v3040_v37 = vadd.f32 %v3311_v55, %v3008_v3  ;;  %v3011_v28 = vadd.f32 %v3615_v22, %v5755_v26  ;;  %v3002_v60 = vpop.f32.mrb[27].mxu1 }
 0x33b   : > { %v3038_v56 = vadd.f32 %v3309_v23, %v3000_v45  ;;  %v3003_v18 = vadd.f32 %v5755_v26, %v3002_v60 }
 0x33c   : > { %3319 = vst [vmem:[%s5767_s12 + $0xd0] sm:$0xff] %v3040_v37  ;;  %v3041_v30 = vadd.f32 %v3312_v7, %v3011_v28 }
 0x33d   : > { %3317 = vst [vmem:[%s5767_s12 + $0xc0] sm:$0xff] %v3038_v56  ;;  %v3039_v27 = vadd.f32 %v3310_v61, %v3003_v18 }
 0x33e   : > { %3320 = vst [vmem:[%s5767_s12 + $0xd8] sm:$0xff] %v3041_v30 }
 0x33f   : > { %3318 = vst [vmem:[%s5767_s12 + $0xc8] sm:$0xff] %v3039_v27 }
 0x34e   : > { %v3594_v63 = vpop.f32.mrb[28].mxu0 }
 0x34f   : > { %v2532_v16 = vadd.f32 %v3594_v63, %v5755_v26  ;;  %v2523_v40 = vpop.f32.mrb[29].mxu0 }
 0x350   : > { %v2524_v38 = vadd.f32 %v5755_v26, %v2523_v40  ;;  %v3595_v39 = vpop.f32.mrb[30].mxu0 }
 0x351   : > { %v2552_v13 = vadd.f32 %v3291_v31, %v2532_v16  ;;  %v2535_v53 = vadd.f32 %v3595_v39, %v5755_v26  ;;  %v2526_v1 = vpop.f32.mrb[31].mxu0 }
 0x352   : > { %v2550_v14 = vadd.f32 %v3289_v4, %v2524_v38  ;;  %v2527_v8 = vadd.f32 %v5755_v26, %v2526_v1 }
 0x353   : > { %3299 = vst [vmem:[%s5767_s12 + $0xb0] sm:$0xff] %v2552_v13  ;;  %v2553_v57 = vadd.f32 %v3292_v19, %v2535_v53 }
 0x354   : > { %3297 = vst [vmem:[%s5767_s12 + $0xa0] sm:$0xff] %v2550_v14  ;;  %v2551_v44 = vadd.f32 %v3290_v62, %v2527_v8 }
 0x355   : > { %3300 = vst [vmem:[%s5767_s12 + $0xb8] sm:$0xff] %v2553_v57 }
 0x356   : > { %3298 = vst [vmem:[%s5767_s12 + $0xa8] sm:$0xff] %v2551_v44 }
 0x359   : > { %v3618_v58 = vpop.f32.mrb[28].mxu1 }
 0x35a   : > { %v3024_v12 = vadd.f32 %v3618_v58, %v5755_v26  ;;  %v3015_v59 = vpop.f32.mrb[29].mxu1 }
 0x35b   : > { %v3016_v46 = vadd.f32 %v5755_v26, %v3015_v59  ;;  %v3619_v9 = vpop.f32.mrb[30].mxu1 }
 0x35c   : > { %v3044_v49 = vadd.f32 %v3315_v24, %v3024_v12  ;;  %v3027_v32 = vadd.f32 %v3619_v9, %v5755_v26  ;;  %v3018_v17 = vpop.f32.mrb[31].mxu1 }
 0x35d   : > { %v3042_v21 = vadd.f32 %v3313_v11, %v3016_v46  ;;  %v3019_v43 = vadd.f32 %v5755_v26, %v3018_v17 }
 0x35e   : > { %3323 = vst [vmem:[%s5767_s12 + $0xf0] sm:$0xff] %v3044_v49  ;;  %v3045_v2 = vadd.f32 %v3316_v51, %v3027_v32 }
 0x35f   : > { %3321 = vst [vmem:[%s5767_s12 + $0xe0] sm:$0xff] %v3042_v21  ;;  %v3043_v25 = vadd.f32 %v3314_v34, %v3019_v43 }
 0x360   : > { %3324 = vst [vmem:[%s5767_s12 + $0xf8] sm:$0xff] %v3045_v2 }
 0x361   : > { %3322 = vst [vmem:[%s5767_s12 + $0xe8] sm:$0xff] %v3043_v25 }
 0x362   : > { %3897 = shalt.err (!%p3894_p4)
}
 0x363   : > { %s3898_s11 = scalar_lea.hbm %s5859_s30, 4096  ;;  %s3902_s29 = scalar_lea.hbm %s5915_s7, 8192 }
 0x364   : > { %p3899_p9 = scmp.ne.s32.totalorder %s5859_s30, %s3898_s11  ;;  %p3903_p8 = scmp.lt.u32.totalorder %s5859_s30, %s5915_s7 }
 0x365   : > { %p3904_p13 = scmp.lt.u32.totalorder %s3902_s29, %s3898_s11  ;;  %p3906_p10 = scmp.lt.u32.totalorder %s3898_s11, %s5859_s30 }
 0x366   : > { %p3900_p0 = pnand %p3899_p9, %p4166_p5 }
 0x367   : > { %p3905_p6 = por %p3904_p13, %p3903_p8 }
 0x368   : > { %p3901_p11 = pneg %p3900_p0 }
 0x369   : > { %p3907_p3 = por %p3906_p10, %p3905_p6 }
 0x36b   : > { %p3908_p7 = pnand %p3907_p3, %p3901_p11 }
 0x36d   : > { %3911 = shalt.err (!%p3908_p7)
}
 0x36e   : > { %s3970_s16 = smov 128   ;;  %s3971_s13 = smov 8  }
 0x36f   : > { %3634 = dma.vmem_to_hbm [thread:$0]  (%p4166_p5), %s5861_s17, 4096, %s5859_s30, %s3056_s28, %s3970_s16, %s3970_s16, %s3971_s13  }
 0x370 PF: > { %s6248_s20 = sld [smem:[#allocation16_spill]]  ;;  %s3084_s9 = sand.u32 1, %s3946_s24  }
 0x371   : > { %p6250_p1 = scmp.ge.s32.totalorder %s3958_s27, 2  ;;  %s3085_s23 = scalar_lea.sflag [#allocation5], %s3084_s9 }
 0x376   : > { %p6249_p12 = scmp.ne.s32.totalorder %s6248_s20, 0 }
 0x378   : > { %p3651_p2 = pnand %p6250_p1, %p6249_p12 }
 0x37a   : > { %3941 = dma.done.wait (!%p3651_p2), %s3085_s23, 4096  }
 0x37b   : > { %3943 = vsyncadd (!%p3651_p2), %s3085_s23, 4294963200  ;;  %p22_p4 = scmp.ge.s32.totalorder %s4152_s22, 4   ;;  %s6251_s24 = smov %s3950_s25 }
 0x37c   : > { %s6252_s25 = smov %s3954_s26  ;;  %s6253_s26 = smov %s4162_s18 }
 0x37d   : > { %s6254_s27 = smov %s4152_s22  ;;  %24 = sbr.rel (!%p22_p4) target bundleno = 7 (0x7), region = 123 }
 0x384   :  { %3090 = vsyncpa [#allocation4], 1 }
 0x385   :  { %3092 = vsyncpa [#allocation4 + $0x1], 1 }
 0x386   :  { %3093 = vsyncpa [#allocation7], 1 }
 0x387   :  { %3094 = vsyncpa [#allocation10], 1 }
 0x388   :  { %3095 = vsyncpa [#allocation5], 1 }
 0x389   :  { %3097 = vsyncpa [#allocation5 + $0x1], 1 }

</bundles_post_ra>
